<compile_context>
chip_gen: v5e
topology: v5e:2x2
jax: 0.10.0
libtpu: 0.0.40
codegen_flags: <defaults>
</compile_context>

<pallas_src>
import functools

import jax
import jax.numpy as jnp
import numpy as np
from jax.experimental import pallas as pl
from jax.experimental.pallas import tpu as pltpu


def _round_up(a, b):
    return (a + b - 1) // b * b


def _prenorm_linattn_kernel(x_ref, wq_ref, wkv_ref, wout_ref, bout_ref,
                            gpre_ref, gout_ref, mask_ref, o_ref,
                            ct_acc, kmax_acc, ksum_acc, m_scr,
                            *, heads, dim_head, scale_over_n, eps,
                            n_true, tile_n, pad_n):
    """Grid = (B, phase, N-tile).  Blocks are channels-first (C, TN).

    x_ref:    (1, C, TN)   input tile, spatial on lanes
    wq_ref:   (hid, C)     q rows of the to_qkv 1x1 conv weight
    wkv_ref:  (2*hid, C)   k,v rows of the to_qkv 1x1 conv weight
    wout_ref: (C, hid)     to_out 1x1 conv weight
    bout_ref: (C, 1)       to_out conv bias
    gpre_ref: (C, 1)       PreNorm LayerNorm gain
    gout_ref: (C, 1)       to_out LayerNorm gain
    mask_ref: (hid, hid)   block-diagonal same-head mask (f32), resident
    o_ref:    (1, C, TN)   output tile
    ct_acc:   (hid, hid)   running context^T accumulator (d, e)
    kmax_acc: (hid, 1)     running k max (per k row d)
    ksum_acc: (hid, 1)     running k exp-sum (per k row d)
    m_scr:    (C, hid)     folded output matrix M, built once per batch elem
    """
    in_dtype = x_ref.dtype
    hid = heads * dim_head
    p = pl.program_id(1)
    j = pl.program_id(2)

    # ---- PreNorm: LayerNorm over channels. Column-local -> safe per N-tile.
    x = x_ref[0].astype(jnp.float32)                               # (C, TN)
    mu = jnp.mean(x, axis=0, keepdims=True)
    var = jnp.mean(jnp.square(x - mu), axis=0, keepdims=True)
    xn = (x - mu) * jax.lax.rsqrt(var + eps) * gpre_ref[...]       # (C, TN) f32
    xn_c = xn.astype(in_dtype)

    # ---------------- phase 0: k/v context accumulation -----------------
    @pl.when(p == 0)
    def _kv_phase():
        @pl.when(j == 0)
        def _init():
            ct_acc[...] = jnp.zeros(ct_acc.shape, jnp.float32)
            ksum_acc[...] = jnp.zeros(ksum_acc.shape, jnp.float32)
            kmax_acc[...] = jnp.full(kmax_acc.shape, -1e30, jnp.float32)

        kv = jnp.dot(wkv_ref[...], xn_c,
                     preferred_element_type=jnp.float32)           # (2*hid, TN)
        k = kv[:hid]                                               # (hid, TN)
        v = kv[hid:]                                               # (hid, TN)

        # Online (flash-style) k softmax statistics over the spatial axis.
        m_loc = jnp.max(k, axis=1, keepdims=True)                  # (hid, 1)
        m_new = jnp.maximum(kmax_acc[...], m_loc)
        alpha = jnp.exp(kmax_acc[...] - m_new)                     # (hid, 1)
        ek = jnp.exp(k - m_new)                                    # (hid, TN)
        if pad_n:  # mask padded spatial columns out of the k statistics
            col = jax.lax.broadcasted_iota(jnp.int32, (1, tile_n), 1) + j * tile_n
            ek = jnp.where(col < n_true, ek, 0.0)
        ksum_acc[...] = alpha * ksum_acc[...] + jnp.sum(ek, axis=1, keepdims=True)

        # ct[d, e] += sum_n ek[d, n] * v[e, n]   (head-batched on the MXU;
        # cross-head entries are masked out later, v at padded n is 0 anyway).
        ct_new = jax.lax.dot_general(
            ek.astype(in_dtype), v.astype(in_dtype),
            dimension_numbers=(((1,), (1,)), ((), ())),
            preferred_element_type=jnp.float32)                    # (hid, hid)
        ct_acc[...] = alpha * ct_acc[...] + ct_new
        kmax_acc[...] = m_new

    # ---------------- phase 1: q softmax, projection, output LN ----------
    @pl.when(p == 1)
    def _q_phase():
        @pl.when(j == 0)
        def _fold():
            # Fold the k-softmax denominator, the 1/(H*W) v-scaling, the
            # attention scale and the to_out 1x1 conv into one tiny (C, hid)
            # matrix, once per batch element:
            #   M[c, d] = scale/N * sum_e Wout[c, e] * mask[d, e] * ct[d, e]/ksum[d]
            ctn = ct_acc[...] * pl.reciprocal(ksum_acc[...], approx=True)
            a = mask_ref[...] * ctn                                # (hid, hid)
            m_scr[...] = jax.lax.dot_general(
                wout_ref[...].astype(jnp.float32), a,
                dimension_numbers=(((1,), (1,)), ((), ())),
                preferred_element_type=jnp.float32) * scale_over_n  # (C, hid)

        q = jnp.dot(wq_ref[...], xn_c,
                    preferred_element_type=jnp.float32)            # (hid, TN)
        # q softmax over dim_head (per head, per column). Subtracting the
        # per-column GLOBAL max is exact (softmax is shift-invariant within
        # each head block); clamp the denominator so a fully-underflowed head
        # cannot produce Inf/NaN through the approximate reciprocal.
        eq = jnp.exp(q - jnp.max(q, axis=0, keepdims=True))
        q_den = jnp.dot(mask_ref[...].astype(in_dtype), eq.astype(in_dtype),
                        preferred_element_type=jnp.float32)        # (hid, TN)
        qs = eq * pl.reciprocal(jnp.maximum(q_den, 1e-30), approx=True)

        # proj = M @ q_softmax + bias   (single N-scale matmul, 128-wide K)
        proj = jnp.dot(m_scr[...].astype(in_dtype), qs.astype(in_dtype),
                       preferred_element_type=jnp.float32) + bout_ref[...]

        # to_out LayerNorm over channels.
        pm = jnp.mean(proj, axis=0, keepdims=True)
        pv = jnp.mean(jnp.square(proj - pm), axis=0, keepdims=True)
        y = (proj - pm) * jax.lax.rsqrt(pv + eps) * gout_ref[...]
        o_ref[0] = y.astype(o_ref.dtype)


def prenorm_linear_attention(x_nchw, g_pre, w_qkv, w_out, b_out, g_out, *,
                             heads, dim_head):
    """PreNorm(dim, LinearAttention(dim)) forward. x_nchw: (B, C, H, W)."""
    B, C, H, W = x_nchw.shape
    N = H * W
    hid = heads * dim_head
    scale_over_n = (float(dim_head) ** -0.5) / float(N)
    eps = 1e-5 if x_nchw.dtype == jnp.float32 else 1e-3
    itemsize = jnp.dtype(x_nchw.dtype).itemsize

    # ---- generation-aware VMEM budget -----------------------------------
    try:
        vmem_cap = int(getattr(pltpu.get_tpu_info(), "vmem_capacity_bytes",
                               128 * 1024 * 1024))
    except Exception:  # CPU / interpret fallback
        vmem_cap = 128 * 1024 * 1024
    vmem_cap_budget = int(0.80 * vmem_cap)   # ~100 MiB on v5e/v6e, ~51 MiB on v7x

    # ---- pick the spatial tile (lane-dense, bounded f32 working set) ----
    f32_cols_bytes = 4 * (2 * C + 8 * hid)          # per-column f32 temporaries
    blk_cols_bytes = 4 * C * itemsize               # double-buffered x + out
    tile_budget = max(8 * 1024 * 1024, vmem_cap_budget // 4)
    tn_cap = max(128, (tile_budget // (f32_cols_bytes + blk_cols_bytes)) // 128 * 128)
    TN = int(min(_round_up(N, 128), tn_cap, 4096))
    N_pad = _round_up(N, TN)
    NT = N_pad // TN
    pad_n = N_pad != N

    # Pure reshapes / zero-pad (contiguous dim merges) -- no HBM transposes.
    x_flat = x_nchw.reshape(B, C, N)
    if pad_n:
        x_flat = jnp.pad(x_flat, ((0, 0), (0, 0), (0, N_pad - N)))
    wqkv2 = w_qkv.reshape(3 * hid, C)     # torch Conv2d weight (3*hid, C, 1, 1)
    wq2 = wqkv2[:hid]
    wkv2 = wqkv2[hid:]
    wout2 = w_out.reshape(C, hid)         # torch Conv2d weight (C, hid, 1, 1)
    bout2 = b_out.reshape(C, 1)
    gpre2 = g_pre.reshape(C, 1)
    gout2 = g_out.reshape(C, 1)

    # Same-head block-diagonal mask, built once, resident in VMEM.
    hh = np.arange(hid) // dim_head
    same_head = jnp.asarray((hh[:, None] == hh[None, :]).astype(np.float32))

    kernel = functools.partial(
        _prenorm_linattn_kernel, heads=heads, dim_head=dim_head,
        scale_over_n=scale_over_n, eps=eps, n_true=N, tile_n=TN, pad_n=pad_n)

    # VMEM estimate: blocks (double-buffered) + resident weights/mask +
    # f32 scratch accumulators + in-body f32 temporaries.
    est = (4 * C * TN * itemsize
           + 2 * itemsize * (3 * hid * C + C * hid + 3 * C)
           + 2 * 4 * hid * hid
           + 4 * (hid * hid + 2 * hid * 128 + C * hid)
           + f32_cols_bytes * TN)
    vmem_limit = int(min(max(2 * est, 16 * 1024 * 1024), vmem_cap_budget))

    x_index = lambda b, p, j: (b, 0, j)
    if NT >= 3:  # deeper buffering only pays off when there are several tiles
        x_spec = pl.BlockSpec((1, C, TN), x_index, pipeline_mode=pl.Buffered(3))
    else:
        x_spec = pl.BlockSpec((1, C, TN), x_index)

    out_flat = pl.pallas_call(
        kernel,
        out_shape=jax.ShapeDtypeStruct((B, C, N_pad), x_nchw.dtype),
        grid_spec=pltpu.PrefetchScalarGridSpec(
            num_scalar_prefetch=0,
            grid=(B, 2, NT),                                   # batch, phase, N-tile
            in_specs=[
                x_spec,                                        # x tile
                pl.BlockSpec((hid, C), lambda b, p, j: (0, 0)),      # q weight
                pl.BlockSpec((2 * hid, C), lambda b, p, j: (0, 0)),  # k,v weight
                pl.BlockSpec((C, hid), lambda b, p, j: (0, 0)),      # to_out weight
                pl.BlockSpec((C, 1), lambda b, p, j: (0, 0)),        # to_out bias
                pl.BlockSpec((C, 1), lambda b, p, j: (0, 0)),        # prenorm gain
                pl.BlockSpec((C, 1), lambda b, p, j: (0, 0)),        # out-LN gain
                pl.BlockSpec((hid, hid), lambda b, p, j: (0, 0)),    # same-head mask
            ],
            # Output tiles are only produced in phase 1; keep the block index
            # pinned to tile 0 during phase 0 so no junk writebacks happen.
            out_specs=pl.BlockSpec((1, C, TN), lambda b, p, j: (b, 0, j * p)),
            scratch_shapes=[
                pltpu.VMEM((hid, hid), jnp.float32),   # context^T accumulator
                pltpu.VMEM((hid, 1), jnp.float32),     # running k max
                pltpu.VMEM((hid, 1), jnp.float32),     # running k exp-sum
                pltpu.VMEM((C, hid), jnp.float32),     # folded output matrix M
            ]),
        compiler_params=pltpu.CompilerParams(
            dimension_semantics=("parallel", "arbitrary", "arbitrary"),
            vmem_limit_bytes=vmem_limit),
    )(x_flat, wq2, wkv2, wout2, bout2, gpre2, gout2, same_head)

    if pad_n:
        out_flat = out_flat[:, :, :N]
    return out_flat.reshape(B, C, H, W)


def prenorm_linear_attention_ref(x, g_pre, w_qkv, w_out, b_out, g_out, *,
                                 heads, dim_head):
    """Pure-JAX reference mirroring the PyTorch forward (NCHW)."""
    B, C, H, W = x.shape
    N = H * W
    hid = heads * dim_head
    scale = float(dim_head) ** -0.5
    eps = 1e-5 if x.dtype == jnp.float32 else 1e-3

    def layernorm_c(t, g):                       # t: (B, C, N)
        mean = jnp.mean(t, axis=1, keepdims=True)
        var = jnp.mean(jnp.square(t - mean), axis=1, keepdims=True)
        return (t - mean) * jax.lax.rsqrt(var + eps) * g.reshape(1, C, 1)

    xf = x.reshape(B, C, N).astype(jnp.float32)
    xn = layernorm_c(xf, g_pre)                                   # PreNorm
    qkv = jnp.einsum('kc,bcn->bkn', w_qkv.reshape(3 * hid, C), xn)
    q, k, v = jnp.split(qkv, 3, axis=1)
    q = q.reshape(B, heads, dim_head, N)
    k = k.reshape(B, heads, dim_head, N)
    v = v.reshape(B, heads, dim_head, N) / N
    q = jax.nn.softmax(q, axis=-2) * scale
    k = jax.nn.softmax(k, axis=-1)
    context = jnp.einsum('bhdn,bhen->bhde', k, v)
    out = jnp.einsum('bhde,bhdn->bhen', context, q).reshape(B, hid, N)
    proj = jnp.einsum('ck,bkn->bcn', w_out.reshape(C, hid), out) \
        + b_out.reshape(1, C, 1)
    y = layernorm_c(proj, g_out)
    return y.reshape(B, C, H, W).astype(x.dtype)


if __name__ == "__main__":
    B, C, H, W = 2, 4, 16, 16          # dim = 4
    heads, dim_head = 4, 32            # hidden_dim = 128
    hid = heads * dim_head

    key = jax.random.PRNGKey(0)
    k1, k2, k3, k4, k5 = jax.random.split(key, 5)
    x = jax.random.normal(k1, (B, C, H, W), jnp.float32)
    # Parameters in their PyTorch module shapes (Conv2d 1x1 weights, LN gains).
    w_qkv = jax.random.normal(k2, (3 * hid, C, 1, 1), jnp.float32) * 0.2
    w_out = jax.random.normal(k3, (C, hid, 1, 1), jnp.float32) * 0.1
    b_out = jax.random.normal(k4, (C,), jnp.float32) * 0.1
    g_pre = 1.0 + 0.1 * jax.random.normal(k5, (1, C, 1, 1), jnp.float32)
    g_out = jnp.ones((1, C, 1, 1), jnp.float32)

    out = jax.block_until_ready(
        prenorm_linear_attention(x, g_pre, w_qkv, w_out, b_out, g_out,
                                 heads=heads, dim_head=dim_head))
    ref = prenorm_linear_attention_ref(x, g_pre, w_qkv, w_out, b_out, g_out,
                                       heads=heads, dim_head=dim_head)
    np.testing.assert_allclose(np.asarray(out), np.asarray(ref),
                               rtol=2e-2, atol=2e-2)
    print("KERNEL_OK")
</pallas_src>

<mosaic_0001>
module attributes {stable_mosaic.version = 11 : i64} {
  func.func @_prenorm_linattn_kernel(%arg0: i32, %arg1: i32, %arg2: i32, %arg3: memref<1x4x256xf32, #tpu.memory_space<vmem>>, %arg4: memref<128x4xf32, #tpu.memory_space<vmem>>, %arg5: memref<256x4xf32, #tpu.memory_space<vmem>>, %arg6: memref<4x128xf32, #tpu.memory_space<vmem>>, %arg7: memref<4x1xf32, #tpu.memory_space<vmem>>, %arg8: memref<4x1xf32, #tpu.memory_space<vmem>>, %arg9: memref<4x1xf32, #tpu.memory_space<vmem>>, %arg10: memref<128x128xf32, #tpu.memory_space<vmem>>, %arg11: memref<1x4x256xf32, #tpu.memory_space<vmem>>, %arg12: memref<128x128xf32, #tpu.memory_space<vmem>>, %arg13: memref<128x1xf32, #tpu.memory_space<vmem>>, %arg14: memref<128x1xf32, #tpu.memory_space<vmem>>, %arg15: memref<4x128xf32, #tpu.memory_space<vmem>>) attributes {dimension_semantics = [#tpu.dimension_semantics<parallel>, #tpu.dimension_semantics<arbitrary>, #tpu.dimension_semantics<arbitrary>], iteration_bounds = array<i64: 2, 2, 1>, scalar_prefetch = 0 : i64, scratch_operands = 4 : i64, tpu.core_type = #tpu.core_type<tc>, window_params = [{transform_indices = @transform_0, window_bounds = array<i64: 1, 4, 256>}, {pipeline_mode = #tpu.pipeline_mode<synchronous>, transform_indices = @transform_1, window_bounds = array<i64: 128, 4>}, {pipeline_mode = #tpu.pipeline_mode<synchronous>, transform_indices = @transform_2, window_bounds = array<i64: 256, 4>}, {pipeline_mode = #tpu.pipeline_mode<synchronous>, transform_indices = @transform_3, window_bounds = array<i64: 4, 128>}, {pipeline_mode = #tpu.pipeline_mode<synchronous>, transform_indices = @transform_4, window_bounds = array<i64: 4, 1>}, {pipeline_mode = #tpu.pipeline_mode<synchronous>, transform_indices = @transform_5, window_bounds = array<i64: 4, 1>}, {pipeline_mode = #tpu.pipeline_mode<synchronous>, transform_indices = @transform_6, window_bounds = array<i64: 4, 1>}, {pipeline_mode = #tpu.pipeline_mode<synchronous>, transform_indices = @transform_7, window_bounds = array<i64: 128, 128>}, {transform_indices = @transform_8, window_bounds = array<i64: 1, 4, 256>}]} {
    %c0 = arith.constant 0 : index
    %c0_0 = arith.constant 0 : index
    %c0_1 = arith.constant 0 : index
    %0 = vector.load %arg3[%c0, %c0_0, %c0_1] : memref<1x4x256xf32, #tpu.memory_space<vmem>>, vector<1x4x256xf32>
    %1 = vector.shape_cast %0 : vector<1x4x256xf32> to vector<4x256xf32>
    %cst = arith.constant dense<0.000000e+00> : vector<256xf32>
    %2 = vector.multi_reduction <add>, %1, %cst [0] : vector<4x256xf32> to vector<256xf32>
    %3 = vector.shape_cast %2 : vector<256xf32> to vector<1x256xf32>
    %cst_2 = arith.constant 4.000000e+00 : f32
    %4 = vector.broadcast %cst_2 : f32 to vector<1x256xf32>
    %5 = arith.divf %3, %4 : vector<1x256xf32>
    %6 = vector.broadcast %5 : vector<1x256xf32> to vector<4x256xf32>
    %7 = arith.subf %1, %6 : vector<4x256xf32>
    %8 = arith.mulf %7, %7 : vector<4x256xf32>
    %cst_3 = arith.constant dense<0.000000e+00> : vector<256xf32>
    %9 = vector.multi_reduction <add>, %8, %cst_3 [0] : vector<4x256xf32> to vector<256xf32>
    %10 = vector.shape_cast %9 : vector<256xf32> to vector<1x256xf32>
    %cst_4 = arith.constant 4.000000e+00 : f32
    %11 = vector.broadcast %cst_4 : f32 to vector<1x256xf32>
    %12 = arith.divf %10, %11 : vector<1x256xf32>
    %13 = vector.broadcast %5 : vector<1x256xf32> to vector<4x256xf32>
    %14 = arith.subf %1, %13 : vector<4x256xf32>
    %cst_5 = arith.constant 9.99999974E-6 : f32
    %15 = vector.broadcast %cst_5 : f32 to vector<1x256xf32>
    %16 = arith.addf %12, %15 : vector<1x256xf32>
    %17 = math.rsqrt %16 : vector<1x256xf32>
    %18 = vector.broadcast %17 : vector<1x256xf32> to vector<4x256xf32>
    %19 = arith.mulf %14, %18 : vector<4x256xf32>
    %c0_6 = arith.constant 0 : index
    %c0_7 = arith.constant 0 : index
    %20 = vector.load %arg8[%c0_6, %c0_7] : memref<4x1xf32, #tpu.memory_space<vmem>>, vector<4x1xf32>
    %21 = vector.broadcast %20 : vector<4x1xf32> to vector<4x256xf32>
    %22 = arith.mulf %19, %21 : vector<4x256xf32>
    %c0_i32 = arith.constant 0 : i32
    %23 = arith.cmpi eq, %arg1, %c0_i32 : i32
    %24 = arith.extui %23 : i1 to i32
    %c0_i32_8 = arith.constant 0 : i32
    %25 = arith.cmpi ne, %24, %c0_i32_8 : i32
    scf.if %25 {
      %c0_i32_10 = arith.constant 0 : i32
      %29 = arith.cmpi eq, %arg2, %c0_i32_10 : i32
      %30 = arith.extui %29 : i1 to i32
      %c0_i32_11 = arith.constant 0 : i32
      %31 = arith.cmpi ne, %30, %c0_i32_11 : i32
      scf.if %31 {
        %cst_32 = arith.constant 0.000000e+00 : f32
        %59 = vector.broadcast %cst_32 : f32 to vector<128x128xf32>
        %c0_33 = arith.constant 0 : index
        %c0_34 = arith.constant 0 : index
        %60 = vector.load %arg12[%c0_33, %c0_34] : memref<128x128xf32, #tpu.memory_space<vmem>>, vector<128x128xf32>
        tpu.vector_store %arg12[%c0_33, %c0_34], %59 {strides = array<i32>} : memref<128x128xf32, #tpu.memory_space<vmem>>, vector<128x128xf32>,
        %cst_35 = arith.constant 0.000000e+00 : f32
        %61 = vector.broadcast %cst_35 : f32 to vector<128x1xf32>
        %c0_36 = arith.constant 0 : index
        %c0_37 = arith.constant 0 : index
        %62 = vector.load %arg14[%c0_36, %c0_37] : memref<128x1xf32, #tpu.memory_space<vmem>>, vector<128x1xf32>
        tpu.vector_store %arg14[%c0_36, %c0_37], %61 {strides = array<i32>} : memref<128x1xf32, #tpu.memory_space<vmem>>, vector<128x1xf32>,
        %cst_38 = arith.constant -1.000000e+30 : f32
        %63 = vector.broadcast %cst_38 : f32 to vector<128x1xf32>
        %c0_39 = arith.constant 0 : index
        %c0_40 = arith.constant 0 : index
        %64 = vector.load %arg13[%c0_39, %c0_40] : memref<128x1xf32, #tpu.memory_space<vmem>>, vector<128x1xf32>
        tpu.vector_store %arg13[%c0_39, %c0_40], %63 {strides = array<i32>} : memref<128x1xf32, #tpu.memory_space<vmem>>, vector<128x1xf32>,
      } else {
      }
      %c0_12 = arith.constant 0 : index
      %c0_13 = arith.constant 0 : index
      %32 = vector.load %arg5[%c0_12, %c0_13] : memref<256x4xf32, #tpu.memory_space<vmem>>, vector<256x4xf32>
      %cst_14 = arith.constant dense<0.000000e+00> : vector<256x256xf32>
      %33 = tpu.matmul %32, %22, %cst_14 {dimension_numbers = #tpu.dot_dimension_numbers<[1], [0], [0], [1], [0, 0, 1, 1], [], []>} : vector<256x4xf32>, vector<4x256xf32>, vector<256x256xf32> -> vector<256x256xf32>
      %34 = vector.extract_strided_slice %33 {offsets = [0, 0], sizes = [128, 256], strides = [1, 1]} : vector<256x256xf32> to vector<128x256xf32>
      %35 = vector.extract_strided_slice %33 {offsets = [128, 0], sizes = [128, 256], strides = [1, 1]} : vector<256x256xf32> to vector<128x256xf32>
      %cst_15 = arith.constant dense<0xFF800000> : vector<128xf32>
      %36 = vector.multi_reduction <maximumf>, %34, %cst_15 [1] : vector<128x256xf32> to vector<128xf32>
      %37 = vector.shape_cast %36 : vector<128xf32> to vector<128x1xf32>
      %c0_16 = arith.constant 0 : index
      %c0_17 = arith.constant 0 : index
      %38 = vector.load %arg13[%c0_16, %c0_17] : memref<128x1xf32, #tpu.memory_space<vmem>>, vector<128x1xf32>
      %39 = arith.maximumf %38, %37 : vector<128x1xf32>
      %c0_18 = arith.constant 0 : index
      %c0_19 = arith.constant 0 : index
      %40 = vector.load %arg13[%c0_18, %c0_19] : memref<128x1xf32, #tpu.memory_space<vmem>>, vector<128x1xf32>
      %41 = arith.subf %40, %39 : vector<128x1xf32>
      %42 = math.exp %41 : vector<128x1xf32>
      %43 = vector.broadcast %39 : vector<128x1xf32> to vector<128x256xf32>
      %44 = arith.subf %34, %43 : vector<128x256xf32>
      %45 = math.exp %44 : vector<128x256xf32>
      %c0_20 = arith.constant 0 : index
      %c0_21 = arith.constant 0 : index
      %46 = vector.load %arg14[%c0_20, %c0_21] : memref<128x1xf32, #tpu.memory_space<vmem>>, vector<128x1xf32>
      %47 = arith.mulf %42, %46 : vector<128x1xf32>
      %cst_22 = arith.constant dense<0.000000e+00> : vector<128xf32>
      %48 = vector.multi_reduction <add>, %45, %cst_22 [1] : vector<128x256xf32> to vector<128xf32>
      %49 = vector.shape_cast %48 : vector<128xf32> to vector<128x1xf32>
      %50 = arith.addf %47, %49 : vector<128x1xf32>
      %c0_23 = arith.constant 0 : index
      %c0_24 = arith.constant 0 : index
      %51 = vector.load %arg14[%c0_23, %c0_24] : memref<128x1xf32, #tpu.memory_space<vmem>>, vector<128x1xf32>
      tpu.vector_store %arg14[%c0_23, %c0_24], %50 {strides = array<i32>} : memref<128x1xf32, #tpu.memory_space<vmem>>, vector<128x1xf32>,
      %cst_25 = arith.constant dense<0.000000e+00> : vector<128x128xf32>
      %52 = tpu.matmul %45, %35, %cst_25 {dimension_numbers = #tpu.dot_dimension_numbers<[1], [1], [0], [0], [0, 0, 1, 0], [], []>} : vector<128x256xf32>, vector<128x256xf32>, vector<128x128xf32> -> vector<128x128xf32>
      %c0_26 = arith.constant 0 : index
      %c0_27 = arith.constant 0 : index
      %53 = vector.load %arg12[%c0_26, %c0_27] : memref<128x128xf32, #tpu.memory_space<vmem>>, vector<128x128xf32>
      %54 = vector.broadcast %42 : vector<128x1xf32> to vector<128x128xf32>
      %55 = arith.mulf %54, %53 : vector<128x128xf32>
      %56 = arith.addf %55, %52 : vector<128x128xf32>
      %c0_28 = arith.constant 0 : index
      %c0_29 = arith.constant 0 : index
      %57 = vector.load %arg12[%c0_28, %c0_29] : memref<128x128xf32, #tpu.memory_space<vmem>>, vector<128x128xf32>
      tpu.vector_store %arg12[%c0_28, %c0_29], %56 {strides = array<i32>} : memref<128x128xf32, #tpu.memory_space<vmem>>, vector<128x128xf32>,
      %c0_30 = arith.constant 0 : index
      %c0_31 = arith.constant 0 : index
      %58 = vector.load %arg13[%c0_30, %c0_31] : memref<128x1xf32, #tpu.memory_space<vmem>>, vector<128x1xf32>
      tpu.vector_store %arg13[%c0_30, %c0_31], %39 {strides = array<i32>} : memref<128x1xf32, #tpu.memory_space<vmem>>, vector<128x1xf32>,
    } else {
    }
    %c1_i32 = arith.constant 1 : i32
    %26 = arith.cmpi eq, %arg1, %c1_i32 : i32
    %27 = arith.extui %26 : i1 to i32
    %c0_i32_9 = arith.constant 0 : i32
    %28 = arith.cmpi ne, %27, %c0_i32_9 : i32
    scf.if %28 {
      %c0_i32_10 = arith.constant 0 : i32
      %29 = arith.cmpi eq, %arg2, %c0_i32_10 : i32
      %30 = arith.extui %29 : i1 to i32
      %c0_i32_11 = arith.constant 0 : i32
      %31 = arith.cmpi ne, %30, %c0_i32_11 : i32
      scf.if %31 {
        %c0_35 = arith.constant 0 : index
        %c0_36 = arith.constant 0 : index
        %74 = vector.load %arg12[%c0_35, %c0_36] : memref<128x128xf32, #tpu.memory_space<vmem>>, vector<128x128xf32>
        %c0_37 = arith.constant 0 : index
        %c0_38 = arith.constant 0 : index
        %75 = vector.load %arg14[%c0_37, %c0_38] : memref<128x1xf32, #tpu.memory_space<vmem>>, vector<128x1xf32>
        %76 = tpu.reciprocal %75 {approx = true} : vector<128x1xf32> -> vector<128x1xf32>
        %77 = vector.broadcast %76 : vector<128x1xf32> to vector<128x128xf32>
        %78 = arith.mulf %74, %77 : vector<128x128xf32>
        %c0_39 = arith.constant 0 : index
        %c0_40 = arith.constant 0 : index
        %79 = vector.load %arg10[%c0_39, %c0_40] : memref<128x128xf32, #tpu.memory_space<vmem>>, vector<128x128xf32>
        %80 = arith.mulf %79, %78 : vector<128x128xf32>
        %c0_41 = arith.constant 0 : index
        %c0_42 = arith.constant 0 : index
        %81 = vector.load %arg6[%c0_41, %c0_42] : memref<4x128xf32, #tpu.memory_space<vmem>>, vector<4x128xf32>
        %cst_43 = arith.constant dense<0.000000e+00> : vector<4x128xf32>
        %82 = tpu.matmul %81, %80, %cst_43 {dimension_numbers = #tpu.dot_dimension_numbers<[1], [1], [0], [0], [0, 0, 1, 0], [], []>} : vector<4x128xf32>, vector<128x128xf32>, vector<4x128xf32> -> vector<4x128xf32>
        %cst_44 = arith.constant 6.90533954E-4 : f32
        %83 = vector.broadcast %cst_44 : f32 to vector<4x128xf32>
        %84 = arith.mulf %82, %83 : vector<4x128xf32>
        %c0_45 = arith.constant 0 : index
        %c0_46 = arith.constant 0 : index
        %85 = vector.load %arg15[%c0_45, %c0_46] : memref<4x128xf32, #tpu.memory_space<vmem>>, vector<4x128xf32>
        tpu.vector_store %arg15[%c0_45, %c0_46], %84 {strides = array<i32>} : memref<4x128xf32, #tpu.memory_space<vmem>>, vector<4x128xf32>,
      } else {
      }
      %c0_12 = arith.constant 0 : index
      %c0_13 = arith.constant 0 : index
      %32 = vector.load %arg4[%c0_12, %c0_13] : memref<128x4xf32, #tpu.memory_space<vmem>>, vector<128x4xf32>
      %cst_14 = arith.constant dense<0.000000e+00> : vector<128x256xf32>
      %33 = tpu.matmul %32, %22, %cst_14 {dimension_numbers = #tpu.dot_dimension_numbers<[1], [0], [0], [1], [0, 0, 1, 1], [], []>} : vector<128x4xf32>, vector<4x256xf32>, vector<128x256xf32> -> vector<128x256xf32>
      %cst_15 = arith.constant dense<0xFF800000> : vector<256xf32>
      %34 = vector.multi_reduction <maximumf>, %33, %cst_15 [0] : vector<128x256xf32> to vector<256xf32>
      %35 = vector.shape_cast %34 : vector<256xf32> to vector<1x256xf32>
      %36 = vector.broadcast %35 : vector<1x256xf32> to vector<128x256xf32>
      %37 = arith.subf %33, %36 : vector<128x256xf32>
      %38 = math.exp %37 : vector<128x256xf32>
      %c0_16 = arith.constant 0 : index
      %c0_17 = arith.constant 0 : index
      %39 = vector.load %arg10[%c0_16, %c0_17] : memref<128x128xf32, #tpu.memory_space<vmem>>, vector<128x128xf32>
      %cst_18 = arith.constant dense<0.000000e+00> : vector<128x256xf32>
      %40 = tpu.matmul %39, %38, %cst_18 {dimension_numbers = #tpu.dot_dimension_numbers<[1], [0], [0], [1], [0, 0, 1, 1], [], []>} : vector<128x128xf32>, vector<128x256xf32>, vector<128x256xf32> -> vector<128x256xf32>
      %cst_19 = arith.constant 1.000000e-30 : f32
      %41 = vector.broadcast %cst_19 : f32 to vector<128x256xf32>
      %42 = arith.maximumf %40, %41 : vector<128x256xf32>
      %43 = tpu.reciprocal %42 {approx = true} : vector<128x256xf32> -> vector<128x256xf32>
      %44 = arith.mulf %38, %43 : vector<128x256xf32>
      %c0_20 = arith.constant 0 : index
      %c0_21 = arith.constant 0 : index
      %45 = vector.load %arg15[%c0_20, %c0_21] : memref<4x128xf32, #tpu.memory_space<vmem>>, vector<4x128xf32>
      %cst_22 = arith.constant dense<0.000000e+00> : vector<4x256xf32>
      %46 = tpu.matmul %45, %44, %cst_22 {dimension_numbers = #tpu.dot_dimension_numbers<[1], [0], [0], [1], [0, 0, 1, 1], [], []>} : vector<4x128xf32>, vector<128x256xf32>, vector<4x256xf32> -> vector<4x256xf32>
      %c0_23 = arith.constant 0 : index
      %c0_24 = arith.constant 0 : index
      %47 = vector.load %arg7[%c0_23, %c0_24] : memref<4x1xf32, #tpu.memory_space<vmem>>, vector<4x1xf32>
      %48 = vector.broadcast %47 : vector<4x1xf32> to vector<4x256xf32>
      %49 = arith.addf %46, %48 : vector<4x256xf32>
      %cst_25 = arith.constant dense<0.000000e+00> : vector<256xf32>
      %50 = vector.multi_reduction <add>, %49, %cst_25 [0] : vector<4x256xf32> to vector<256xf32>
      %51 = vector.shape_cast %50 : vector<256xf32> to vector<1x256xf32>
      %cst_26 = arith.constant 4.000000e+00 : f32
      %52 = vector.broadcast %cst_26 : f32 to vector<1x256xf32>
      %53 = arith.divf %51, %52 : vector<1x256xf32>
      %54 = vector.broadcast %53 : vector<1x256xf32> to vector<4x256xf32>
      %55 = arith.subf %49, %54 : vector<4x256xf32>
      %56 = arith.mulf %55, %55 : vector<4x256xf32>
      %cst_27 = arith.constant dense<0.000000e+00> : vector<256xf32>
      %57 = vector.multi_reduction <add>, %56, %cst_27 [0] : vector<4x256xf32> to vector<256xf32>
      %58 = vector.shape_cast %57 : vector<256xf32> to vector<1x256xf32>
      %cst_28 = arith.constant 4.000000e+00 : f32
      %59 = vector.broadcast %cst_28 : f32 to vector<1x256xf32>
      %60 = arith.divf %58, %59 : vector<1x256xf32>
      %61 = vector.broadcast %53 : vector<1x256xf32> to vector<4x256xf32>
      %62 = arith.subf %49, %61 : vector<4x256xf32>
      %cst_29 = arith.constant 9.99999974E-6 : f32
      %63 = vector.broadcast %cst_29 : f32 to vector<1x256xf32>
      %64 = arith.addf %60, %63 : vector<1x256xf32>
      %65 = math.rsqrt %64 : vector<1x256xf32>
      %66 = vector.broadcast %65 : vector<1x256xf32> to vector<4x256xf32>
      %67 = arith.mulf %62, %66 : vector<4x256xf32>
      %c0_30 = arith.constant 0 : index
      %c0_31 = arith.constant 0 : index
      %68 = vector.load %arg9[%c0_30, %c0_31] : memref<4x1xf32, #tpu.memory_space<vmem>>, vector<4x1xf32>
      %69 = vector.broadcast %68 : vector<4x1xf32> to vector<4x256xf32>
      %70 = arith.mulf %67, %69 : vector<4x256xf32>
      %c0_32 = arith.constant 0 : index
      %c0_33 = arith.constant 0 : index
      %c0_34 = arith.constant 0 : index
      %71 = vector.load %arg11[%c0_32, %c0_33, %c0_34] : memref<1x4x256xf32, #tpu.memory_space<vmem>>, vector<1x4x256xf32>
      %72 = vector.shape_cast %71 : vector<1x4x256xf32> to vector<4x256xf32>
      %73 = vector.shape_cast %70 : vector<4x256xf32> to vector<1x4x256xf32>
      tpu.vector_store %arg11[%c0_32, %c0_33, %c0_34], %73 {strides = array<i32>} : memref<1x4x256xf32, #tpu.memory_space<vmem>>, vector<1x4x256xf32>,
    } else {
    }
    return
  }
  func.func @transform_0(%arg0: i32, %arg1: i32, %arg2: i32) -> (i32, i32, i32) {
    %c0_i32 = arith.constant 0 : i32
    %c0_i32_0 = arith.constant 0 : i32
    return %arg0, %c0_i32, %arg2 : i32, i32, i32
  }
  func.func @transform_1(%arg0: i32, %arg1: i32, %arg2: i32) -> (i32, i32) {
    %c0_i32 = arith.constant 0 : i32
    %c0_i32_0 = arith.constant 0 : i32
    %c0_i32_1 = arith.constant 0 : i32
    return %c0_i32, %c0_i32_0 : i32, i32
  }
  func.func @transform_2(%arg0: i32, %arg1: i32, %arg2: i32) -> (i32, i32) {
    %c0_i32 = arith.constant 0 : i32
    %c0_i32_0 = arith.constant 0 : i32
    %c0_i32_1 = arith.constant 0 : i32
    return %c0_i32, %c0_i32_0 : i32, i32
  }
  func.func @transform_3(%arg0: i32, %arg1: i32, %arg2: i32) -> (i32, i32) {
    %c0_i32 = arith.constant 0 : i32
    %c0_i32_0 = arith.constant 0 : i32
    %c0_i32_1 = arith.constant 0 : i32
    return %c0_i32, %c0_i32_0 : i32, i32
  }
  func.func @transform_4(%arg0: i32, %arg1: i32, %arg2: i32) -> (i32, i32) {
    %c0_i32 = arith.constant 0 : i32
    %c0_i32_0 = arith.constant 0 : i32
    %c0_i32_1 = arith.constant 0 : i32
    return %c0_i32, %c0_i32_0 : i32, i32
  }
  func.func @transform_5(%arg0: i32, %arg1: i32, %arg2: i32) -> (i32, i32) {
    %c0_i32 = arith.constant 0 : i32
    %c0_i32_0 = arith.constant 0 : i32
    %c0_i32_1 = arith.constant 0 : i32
    return %c0_i32, %c0_i32_0 : i32, i32
  }
  func.func @transform_6(%arg0: i32, %arg1: i32, %arg2: i32) -> (i32, i32) {
    %c0_i32 = arith.constant 0 : i32
    %c0_i32_0 = arith.constant 0 : i32
    %c0_i32_1 = arith.constant 0 : i32
    return %c0_i32, %c0_i32_0 : i32, i32
  }
  func.func @transform_7(%arg0: i32, %arg1: i32, %arg2: i32) -> (i32, i32) {
    %c0_i32 = arith.constant 0 : i32
    %c0_i32_0 = arith.constant 0 : i32
    %c0_i32_1 = arith.constant 0 : i32
    return %c0_i32, %c0_i32_0 : i32, i32
  }
  func.func @transform_8(%arg0: i32, %arg1: i32, %arg2: i32) -> (i32, i32, i32) {
    %0 = arith.muli %arg2, %arg1 : i32
    %c0_i32 = arith.constant 0 : i32
    %c0_i32_0 = arith.constant 0 : i32
    return %arg0, %c0_i32, %0 : i32, i32, i32
  }
}

</mosaic_0001>

<bundles_post_ra>
// kernel: tpu_custom_call.1
= control target key start
LH: loop header
LB: loop body
LE: loop exit
PB: predicated region body
PF: predicated region fallthrough
CT: control target
= control target key end

     0   :  { %s4705_s0 = inlined_call_operand.vmem [shape: f32[2,4,256], index: 0, kind: input, shape index: {}]   ;;  %s4706_s1 = inlined_call_operand.vmem [shape: f32[128,4], index: 1, kind: input, shape index: {}]   ;;  %s4707_s2 = inlined_call_operand.vmem [shape: f32[256,4], index: 2, kind: input, shape index: {}]   ;;  %s4708_s3 = inlined_call_operand.vmem [shape: f32[4,128], index: 3, kind: input, shape index: {}]   ;;  %s4709_s4 = inlined_call_operand.vmem [shape: f32[4,1], index: 4, kind: input, shape index: {}]   ;;  %s4710_s5 = inlined_call_operand.vmem [shape: f32[4,1], index: 5, kind: input, shape index: {}]   ;;  %s4711_s6 = inlined_call_operand.vmem [shape: f32[4,1], index: 6, kind: input, shape index: {}]   ;;  %s4712_s7 = inlined_call_operand.vmem [shape: f32[128,128], index: 7, kind: input, shape index: {}]   ;;  %s4713_s8 = inlined_call_operand.hbm [shape: f32[2,4,256], index: 8, kind: output, shape index: {}]  }
   0x1   :  { %4755 = sst [smem:[#allocation49_spill]] %s4705_s0 }
   0x2   :  { %4756 = sst [smem:[#allocation50_spill]] %s4706_s1 }
   0x3   :  { %4757 = sst [smem:[#allocation51_spill]] %s4707_s2 }
   0x4   :  { %4758 = sst [smem:[#allocation52_spill]] %s4708_s3 }
   0x5   :  { %13 = vsyncpa [#allocation7], 0 }
   0x6   :  { %15 = vsyncpa [#allocation7 + $0x1], 0  ;;  %s3217_s27 = smov 0   ;;  %s3219_s28 = smov 0  }
   0x7   :  { %s3221_s29 = smov 0   ;;  %s3223_s30 = smov 0  }
   0x8   :  { %s3225_s9 = smov 0   ;;  %s3227_s10 = smov 0  }
   0x9   :  { %s3229_s11 = smov 0   ;;  %s3231_s12 = smov 0  }
   0xa LB: > { %s2584_s13 = sadd.s32 4294967295, %s3163_s12   ;;  %s2585_s14 = sadd.s32 4294967294, %s3163_s12   ;;  %s3163_s12 = sphi %s3231_s12, %s21_s12   ;;  %s3159_s11 = sphi %s3229_s11, %s4863_s11   ;;  %s3155_s10 = sphi %s3227_s10, %s4862_s10   ;;  %s3151_s9 = sphi %s3225_s9, %s4861_s9   ;;  %s3147_s30 = sphi %s3223_s30, %s4860_s30   ;;  %s3143_s29 = sphi %s3221_s29, %s4859_s29   ;;  %s3139_s28 = sphi %s3219_s28, %s4858_s28   ;;  %s3135_s27 = sphi %s3217_s27, %s4857_s27  }
   0xb   : > { %s36_s15 = sadd.s32 1, %s3155_s10  ;;  %s40_s16 = sadd.s32 1, %s3159_s11 }
   0xc   : > { %p38_p0 = scmp.ge.s32.totalorder %s36_s15, 2  ;;  %p236_p1 = scmp.ne.s32.totalorder %s3143_s29, %s3139_s28 }
   0xd   : > { %p237_p2 = scmp.eq.s32.totalorder %s2584_s13, 3  ;;  %p242_p4 = scmp.ne.s32.totalorder %s3139_s28, %s3135_s27 }
   0xe   : > { %s4865_s15 = smov (%p38_p0, %s36_s15), 0  ;;  %s4867_s16 = smov (!%p38_p0, %s40_s16), %s3159_s11 }
   0xf   : > { %p3266_p3 = por %p237_p2, %p236_p1  ;;  %p42_p5 = scmp.ge.s32.totalorder %s4867_s16, 2 }
  0x10   : > { %p243_p6 = scmp.eq.s32.totalorder %s2585_s14, 3  ;;  %p2588_p7 = scmp.ge.s32.totalorder %s3163_s12, 1 }
  0x11   : > { %p295_p8 = scmp.lt.s32.totalorder %s3163_s12, 5  ;;  %s4869_s16 = smov (%p42_p5, %s4867_s16), 0 }
  0x12   : > { %p3276_p9 = por %p243_p6, %p242_p4  ;;  %s221_s19 = ssub.s32 %s3159_s11, %s4869_s16 }
  0x13   : > { %p296_p10 = pnand %p2588_p7, %p295_p8  ;;  %s226_s20 = sadd.s32 1, %s3143_s29 }
  0x14   : > { %p224_p11 = scmp.eq.s32.totalorder %s221_s19, 0 }
  0x15   : > { %299 = sbr.rel (%p296_p10) target bundleno = 1797 (0x705), region = 52 }
  0x16   : > { %s3284_s21 = scalar_select %p224_p11, %s3143_s29, %s226_s20  }
  0x1a   : > { %v433_v0 = vld [vmem:[%s4710_s5] sm:$0xf]  ;;  %p334_p12 = scmp.lt.s32.totalorder %s3151_s9, 1  ;;  %v3165_v1 = vmov 0   ;;  %s4747_s24 = sand.u32 1, %s3139_s28   ;;  %v3166_v3 = vmov 4.0  }
  0x1b   : > { %2796 = vset.pattern.permute.xlu0 %v3165_v1  ;;  %s3294_s26 = sshll.u32 %s4747_s24, 3  ;;  %s4761_s0 = sld [smem:[#allocation49_spill]]  ;;  %2797 = vrcp.f32 %v3166_v3  ;;  %vm352_vm0 = vcmask 1043456  }
  0x1c   : > { %436 = vperm.xlu0 %2796, %v433_v0   ;;  %s335_s25 = scalar_select %p334_p12, %s3151_s9, 1 }
  0x1d   : > { %s332_s22 = scalar_lea.vmem [#allocation6], %s3294_s26  ;;  %p2592_p13 = scmp.ne.s32.totalorder %s3147_s30, 0 }
  0x1e   : > { %s2699_s13 = sshll.u32 %s335_s25, 3 }
  0x21   : > { %s341_s20 = scalar_lea.vmem %s4761_s0, %s2699_s13  ;;  %v2798_v9 = vpop.eup %2797 }
  0x22   : > { %v345_v2 = vld [vmem:[%s341_s20] sm:$0xff]  ;;  %v368_v12 = vmul.f32 4.0, %v2798_v9  ;;  %vm372_vm1 = vweird.f32 %v2798_v9 }
  0x23   : > { %347 = vst [vmem:[#allocation1] ss:$2 sm:$0xff] %v345_v2 }
  0x24   : > { %v369_v15 = vsub.f32 1.0, %v368_v12 }
  0x26   : > { %v370_v18 = vmul.f32 %v2798_v9, %v369_v15 }
  0x28   : > { %v371_v21 = vadd.f32 %v2798_v9, %v370_v18 }
  0x2a   : > { %v349_v4 = vld.sshfl [vmem:[#allocation1 + $0x8] sm:$0xff pattern:$0x75316420]  ;;  %v348_v6 = vld.sshfl [vmem:[#allocation1] sm:$0xff pattern:$0x75316420]  ;;  %v3301_v24 = vsel %vm372_vm1, %v2798_v9, %v371_v21 }
  0x2b   : > { %v360_v5 = vsel %vm352_vm0, %v349_v4, 0.0  ;;  %v353_v8 = vsel %vm352_vm0, %v348_v6, 0.0  ;;  %4762 = vst [vmem:[#allocation9_spill] sm:$0xff] %v3301_v24 }
  0x2c   : > { %v361_v7 = vrot.slane %v360_v5, 4  ;;  %v354_v10 = vrot.slane %v353_v8, 4 }
  0x2e   : > { %v362_v11 = vadd.f32 %v361_v7, %v360_v5  ;;  %v355_v13 = vadd.f32 %v354_v10, %v353_v8  ;;  %v3167_v5 = vmov 839922192  }
  0x2f   : > { %v439_v6 = vunpack.c.l.s4 %v3167_v5 }
  0x30   : > { %v363_v14 = vrot.slane %v362_v11, 2  ;;  %v356_v16 = vrot.slane %v355_v13, 2 }
  0x31   : > { %v440_v7 = vunpack.c.0.s8 %v439_v6 }
  0x32   : > { %v364_v17 = vadd.f32 %v363_v14, %v362_v11  ;;  %v357_v19 = vadd.f32 %v356_v16, %v355_v13 }
  0x34   : > { %v365_v20 = vrot.slane %v364_v17, 1  ;;  %v358_v22 = vrot.slane %v357_v19, 1 }
  0x36   : > { %v366_v23 = vadd.f32 %v365_v20, %v364_v17  ;;  %v359_v25 = vadd.f32 %v358_v22, %v357_v19 }
  0x38   : > { %v375_v26 = vmul.f32 %v3301_v24, %v366_v23  ;;  %v374_v27 = vmul.f32 %v3301_v24, %v359_v25 }
  0x3a   : > { %v378_v28 = vrot.slane %v375_v26, 4 }
  0x3c   : > { %v379_v29 = vsel %vm352_vm0, %v374_v27, %v378_v28 }
  0x3d   : > { %v381_v30 = vsub.f32 %v345_v2, %v379_v29 }
  0x3f   : > { %v382_v31 = vmul.f32 %v381_v30, %v381_v30 }
  0x41   : > { %384 = vst [vmem:[#allocation1] ss:$2 sm:$0xff] %v382_v31 }
  0x48   : > { %v386_v32 = vld.sshfl [vmem:[#allocation1 + $0x8] sm:$0xff pattern:$0x75316420]  ;;  %v385_v34 = vld.sshfl [vmem:[#allocation1] sm:$0xff pattern:$0x75316420] }
  0x49   : > { %v396_v33 = vsel %vm352_vm0, %v386_v32, 0.0  ;;  %v389_v36 = vsel %vm352_vm0, %v385_v34, 0.0 }
  0x4a   : > { %v397_v35 = vrot.slane %v396_v33, 4  ;;  %v390_v37 = vrot.slane %v389_v36, 4 }
  0x4c   : > { %v398_v38 = vadd.f32 %v397_v35, %v396_v33  ;;  %v391_v39 = vadd.f32 %v390_v37, %v389_v36 }
  0x4e   : > { %v399_v40 = vrot.slane %v398_v38, 2  ;;  %v392_v41 = vrot.slane %v391_v39, 2 }
  0x50   : > { %v400_v42 = vadd.f32 %v399_v40, %v398_v38  ;;  %v393_v43 = vadd.f32 %v392_v41, %v391_v39 }
  0x52   : > { %v401_v44 = vrot.slane %v400_v42, 1  ;;  %v394_v45 = vrot.slane %v393_v43, 1 }
  0x54   : > { %v402_v46 = vadd.f32 %v401_v44, %v400_v42  ;;  %v395_v47 = vadd.f32 %v394_v45, %v393_v43 }
  0x56   : > { %v404_v48 = vmul.f32 %v402_v46, %v3301_v24  ;;  %v403_v49 = vmul.f32 %v395_v47, %v3301_v24 }
  0x58   : > { %v406_v50 = vadd.f32 1e-05, %v404_v48  ;;  %v405_v51 = vadd.f32 1e-05, %v403_v49 }
  0x5a   : > { %2799 = vrsqrt.f32 %v406_v50  ;;  %vm423_vm2 = vweird.f32 %v406_v50  ;;  %vm413_vm5 = vweird.f32 %v405_v51 }
  0x5b   : > { %2801 = vrsqrt.f32 %v405_v51 }
  0x60   : > { %v2800_v52 = vpop.eup %2799 }
  0x61   : > { %v418_v53 = vmul.f32 %v2800_v52, %v406_v50  ;;  %v2802_v54 = vpop.eup %2801  ;;  %vm424_vm3 = vweird.f32 %v2800_v52 }
  0x62   : > { %v408_v55 = vmul.f32 %v2802_v54, %v405_v51  ;;  %vm425_vm4 = vmor %vm423_vm2, %vm424_vm3  ;;  %vm414_vm6 = vweird.f32 %v2802_v54 }
  0x63   : > { %v419_v56 = vmul.f32 %v2800_v52, %v418_v53  ;;  %vm415_vm7 = vmor %vm413_vm5, %vm414_vm6 }
  0x64   : > { %v409_v57 = vmul.f32 %v2802_v54, %v408_v55 }
  0x65   : > { %v420_v58 = vmul.f32 0.5, %v419_v56 }
  0x66   : > { %v410_v59 = vmul.f32 0.5, %v409_v57 }
  0x67   : > { %v421_v60 = vsub.f32 1.5, %v420_v58 }
  0x68   : > { %v411_v61 = vsub.f32 1.5, %v410_v59 }
  0x69   : > { %v422_v62 = vmul.f32 %v2800_v52, %v421_v60 }
  0x6a   : > { %v412_v63 = vmul.f32 %v2802_v54, %v411_v61 }
  0x6b   : > { %v426_v0 = vsel %vm425_vm4, %v2800_v52, %v422_v62 }
  0x6c   : > { %v429_v1 = vrot.slane %v426_v0, 4  ;;  %v416_v2 = vsel %vm415_vm7, %v2802_v54, %v412_v63 }
  0x6e   : > { %v430_v3 = vsel %vm352_vm0, %v416_v2, %v429_v1 }
  0x6f   : > { %v432_v4 = vmul.f32 %v430_v3, %v381_v30 }
  0x8e   : > { %v437_v8 = vpop.permute.xlu0 %436 }
  0x8f   : > { %v441_v9 = vperm.slane %v437_v8, %v440_v7  ;;  %447 = sbr.rel (%p2592_p13) target bundleno = 995 (0x3e3), region = 56 }
  0x91   : > { %v3311_v10 = vmul.f32 %v441_v9, %v432_v4 }
  0x93   : > { %4763 = vst [vmem:[#allocation10_spill] sm:$0xff] %v3311_v10 }
  0x94   : > { %534 = vst [vmem:[#allocation1] ss:$2 sm:$0xff] %v3311_v10  ;;  %s4764_s2 = sld [smem:[#allocation51_spill]]  ;;  %vm537_vm8 = vcmask 31744   ;;  %vm468_vm9 = vcmask 7168  }
  0x95   : > { %v3168_v8 = vmov -1e+30  }
  0x96   : > { %485 = vst.msk [vmem:[#allocation3] sm:$0xff] %vm468_vm9, %v3168_v8 }
  0x97   : > { %486 = vst.msk [vmem:[#allocation3 + $0x8] sm:$0xff] %vm468_vm9, %v3168_v8 }
  0x98   : > { %487 = vst.msk [vmem:[#allocation3 + $0x10] sm:$0xff] %vm468_vm9, %v3168_v8 }
  0x99   : > { %488 = vst.msk [vmem:[#allocation3 + $0x18] sm:$0xff] %vm468_vm9, %v3168_v8 }
  0x9a   : > { %v501_v11 = vld [vmem:[%s4764_s2] sm:$0xff]  ;;  %v502_v14 = vld [vmem:[%s4764_s2 + $0x8] sm:$0xff]  ;;  %v503_v15 = vld [vmem:[%s4764_s2 + $0x10] sm:$0xff]  ;;  %489 = vst.msk [vmem:[#allocation3 + $0x20] sm:$0xff] %vm468_vm9, %v3168_v8 }
  0x9b   : > { %v535_v12 = vld.sshfl [vmem:[#allocation1] sm:$0xff pattern:$0x75316420]  ;;  %v536_v13 = vld.sshfl [vmem:[#allocation1 + $0x8] sm:$0xff pattern:$0x75316420] }
  0x9c   : > { %2593 = vmatpush.msk.msra.mxu0 %vm352_vm0, %v535_v12  ;;  %2626 = vmatpush.msk.msra.mxu1 %vm352_vm0, %v536_v13  ;;  %v504_v16 = vld [vmem:[%s4764_s2 + $0x18] sm:$0xff]  ;;  %v505_v17 = vld [vmem:[%s4764_s2 + $0x20] sm:$0xff]  ;;  %v506_v18 = vld [vmem:[%s4764_s2 + $0x28] sm:$0xff]  ;;  %490 = vst.msk [vmem:[#allocation3 + $0x28] sm:$0xff] %vm468_vm9, %v3168_v8 }
  0x9d   : > { %2594 = vmatmul.msk.f32.vlgmr.msra.gmra.mxu0 %vm537_vm8, %v501_v11  ;;  %2627 = vmatmul.msk.f32.vlgmr.msra.gmra.mxu1 %vm537_vm8, %v501_v11  ;;  %v507_v19 = vld [vmem:[%s4764_s2 + $0x30] sm:$0xff]  ;;  %v508_v20 = vld [vmem:[%s4764_s2 + $0x38] sm:$0xff]  ;;  %v509_v21 = vld [vmem:[%s4764_s2 + $0x40] sm:$0xff]  ;;  %491 = vst.msk [vmem:[#allocation3 + $0x30] sm:$0xff] %vm468_vm9, %v3168_v8 }
  0x9e   : > { %v510_v22 = vld [vmem:[%s4764_s2 + $0x48] sm:$0xff]  ;;  %v511_v23 = vld [vmem:[%s4764_s2 + $0x50] sm:$0xff]  ;;  %v512_v25 = vld [vmem:[%s4764_s2 + $0x58] sm:$0xff]  ;;  %492 = vst.msk [vmem:[#allocation3 + $0x38] sm:$0xff] %vm468_vm9, %v3168_v8 }
  0x9f   : > { %v513_v26 = vld [vmem:[%s4764_s2 + $0x60] sm:$0xff]  ;;  %v514_v27 = vld [vmem:[%s4764_s2 + $0x68] sm:$0xff]  ;;  %v515_v28 = vld [vmem:[%s4764_s2 + $0x70] sm:$0xff]  ;;  %493 = vst.msk [vmem:[#allocation3 + $0x40] sm:$0xff] %vm468_vm9, %v3168_v8 }
  0xa0   : > { %v516_v29 = vld [vmem:[%s4764_s2 + $0x78] sm:$0xff]  ;;  %v517_v32 = vld [vmem:[%s4764_s2 + $0x80] sm:$0xff]  ;;  %v518_v36 = vld [vmem:[%s4764_s2 + $0x88] sm:$0xff]  ;;  %494 = vst.msk [vmem:[#allocation3 + $0x48] sm:$0xff] %vm468_vm9, %v3168_v8 }
  0xa1   : > { %v519_v40 = vld [vmem:[%s4764_s2 + $0x90] sm:$0xff]  ;;  %v520_v44 = vld [vmem:[%s4764_s2 + $0x98] sm:$0xff]  ;;  %v521_v48 = vld [vmem:[%s4764_s2 + $0xa0] sm:$0xff]  ;;  %495 = vst.msk [vmem:[#allocation3 + $0x50] sm:$0xff] %vm468_vm9, %v3168_v8 }
  0xa2   : > { %v522_v52 = vld [vmem:[%s4764_s2 + $0xa8] sm:$0xff]  ;;  %v523_v56 = vld [vmem:[%s4764_s2 + $0xb0] sm:$0xff]  ;;  %v524_v60 = vld [vmem:[%s4764_s2 + $0xb8] sm:$0xff]  ;;  %496 = vst.msk [vmem:[#allocation3 + $0x58] sm:$0xff] %vm468_vm9, %v3168_v8 }
  0xa3   : > { %v525_v0 = vld [vmem:[%s4764_s2 + $0xc0] sm:$0xff]  ;;  %v526_v3 = vld [vmem:[%s4764_s2 + $0xc8] sm:$0xff]  ;;  %v527_v7 = vld [vmem:[%s4764_s2 + $0xd0] sm:$0xff]  ;;  %497 = vst.msk [vmem:[#allocation3 + $0x60] sm:$0xff] %vm468_vm9, %v3168_v8 }
  0xa4   : > { %v528_v13 = vld [vmem:[%s4764_s2 + $0xd8] sm:$0xff]  ;;  %498 = vst.msk [vmem:[#allocation3 + $0x68] sm:$0xff] %vm468_vm9, %v3168_v8 }
  0xa5   : > { %2595 = vmatmul.msk.f32.gmra.mxu0 %vm537_vm8, %v502_v14  ;;  %2628 = vmatmul.msk.f32.gmra.mxu1 %vm537_vm8, %v502_v14  ;;  %499 = vst.msk [vmem:[#allocation3 + $0x70] sm:$0xff] %vm468_vm9, %v3168_v8 }
  0xa6   : > { %500 = vst.msk [vmem:[#allocation3 + $0x78] sm:$0xff] %vm468_vm9, %v3168_v8 }
  0xad   : > { %2596 = vmatmul.msk.f32.gmra.mxu0 %vm537_vm8, %v503_v15  ;;  %2629 = vmatmul.msk.f32.gmra.mxu1 %vm537_vm8, %v503_v15  ;;  %v3169_v15 = vmov 0  }
  0xae   : > { %2804 = vset.pattern.permute.xlu0 %v3169_v15  ;;  %2803 = vset.pattern.permute.xlu2 %v3169_v15 }
  0xaf   : > { %2805 = vset.pattern.permute.xlu1 %v3169_v15 }
  0xb5   : > { %2597 = vmatmul.msk.f32.gmra.mxu0 %vm537_vm8, %v504_v16  ;;  %2630 = vmatmul.msk.f32.gmra.mxu1 %vm537_vm8, %v504_v16 }
  0xbd   : > { %2598 = vmatmul.msk.f32.gmra.mxu0 %vm537_vm8, %v505_v17  ;;  %2631 = vmatmul.msk.f32.gmra.mxu1 %vm537_vm8, %v505_v17 }
  0xc5   : > { %2599 = vmatmul.msk.f32.gmra.mxu0 %vm537_vm8, %v506_v18  ;;  %2632 = vmatmul.msk.f32.gmra.mxu1 %vm537_vm8, %v506_v18  ;;  %v529_v18 = vld [vmem:[%s4764_s2 + $0xe0] sm:$0xff] }
  0xcd   : > { %2600 = vmatmul.msk.f32.gmra.mxu0 %vm537_vm8, %v507_v19  ;;  %2633 = vmatmul.msk.f32.gmra.mxu1 %vm537_vm8, %v507_v19  ;;  %v3170_v19 = vmov 0.0  }
  0xce   : > { %469 = vst.msk [vmem:[#allocation4] sm:$0xff] %vm468_vm9, %v3170_v19 }
  0xcf   : > { %470 = vst.msk [vmem:[#allocation4 + $0x8] sm:$0xff] %vm468_vm9, %v3170_v19 }
  0xd0   : > { %471 = vst.msk [vmem:[#allocation4 + $0x10] sm:$0xff] %vm468_vm9, %v3170_v19 }
  0xd1   : > { %472 = vst.msk [vmem:[#allocation4 + $0x18] sm:$0xff] %vm468_vm9, %v3170_v19 }
  0xd2   : > { %473 = vst.msk [vmem:[#allocation4 + $0x20] sm:$0xff] %vm468_vm9, %v3170_v19 }
  0xd3   : > { %474 = vst.msk [vmem:[#allocation4 + $0x28] sm:$0xff] %vm468_vm9, %v3170_v19 }
  0xd4   : > { %475 = vst.msk [vmem:[#allocation4 + $0x30] sm:$0xff] %vm468_vm9, %v3170_v19 }
  0xd5   : > { %2601 = vmatmul.msk.f32.gmra.mxu0 %vm537_vm8, %v508_v20  ;;  %2634 = vmatmul.msk.f32.gmra.mxu1 %vm537_vm8, %v508_v20  ;;  %476 = vst.msk [vmem:[#allocation4 + $0x38] sm:$0xff] %vm468_vm9, %v3170_v19 }
  0xd6   : > { %477 = vst.msk [vmem:[#allocation4 + $0x40] sm:$0xff] %vm468_vm9, %v3170_v19 }
  0xd7   : > { %478 = vst.msk [vmem:[#allocation4 + $0x48] sm:$0xff] %vm468_vm9, %v3170_v19 }
  0xd8   : > { %479 = vst.msk [vmem:[#allocation4 + $0x50] sm:$0xff] %vm468_vm9, %v3170_v19 }
  0xd9   : > { %480 = vst.msk [vmem:[#allocation4 + $0x58] sm:$0xff] %vm468_vm9, %v3170_v19 }
  0xda   : > { %481 = vst.msk [vmem:[#allocation4 + $0x60] sm:$0xff] %vm468_vm9, %v3170_v19 }
  0xdb   : > { %482 = vst.msk [vmem:[#allocation4 + $0x68] sm:$0xff] %vm468_vm9, %v3170_v19 }
  0xdc   : > { %483 = vst.msk [vmem:[#allocation4 + $0x70] sm:$0xff] %vm468_vm9, %v3170_v19 }
  0xdd   : > { %2602 = vmatmul.msk.f32.gmra.mxu0 %vm537_vm8, %v509_v21  ;;  %2635 = vmatmul.msk.f32.gmra.mxu1 %vm537_vm8, %v509_v21  ;;  %484 = vst.msk [vmem:[#allocation4 + $0x78] sm:$0xff] %vm468_vm9, %v3170_v19 }
  0xe5   : > { %2603 = vmatmul.msk.f32.gmra.mxu0 %vm537_vm8, %v510_v22  ;;  %2636 = vmatmul.msk.f32.gmra.mxu1 %vm537_vm8, %v510_v22  ;;  %v530_v22 = vld [vmem:[%s4764_s2 + $0xe8] sm:$0xff] }
  0xed   : > { %2604 = vmatmul.msk.f32.gmra.mxu0 %vm537_vm8, %v511_v23  ;;  %2637 = vmatmul.msk.f32.gmra.mxu1 %vm537_vm8, %v511_v23 }
  0xf5   : > { %2605 = vmatmul.msk.f32.gmra.mxu0 %vm537_vm8, %v512_v25  ;;  %2638 = vmatmul.msk.f32.gmra.mxu1 %vm537_vm8, %v512_v25 }
  0xfd   : > { %2606 = vmatmul.msk.f32.gmra.mxu0 %vm537_vm8, %v513_v26  ;;  %2639 = vmatmul.msk.f32.gmra.mxu1 %vm537_vm8, %v513_v26  ;;  %v531_v26 = vld [vmem:[%s4764_s2 + $0xf0] sm:$0xff] }
 0x105   : > { %2607 = vmatmul.msk.f32.gmra.mxu0 %vm537_vm8, %v514_v27  ;;  %2640 = vmatmul.msk.f32.gmra.mxu1 %vm537_vm8, %v514_v27  ;;  %v3587_v27 = vld [vmem:[#allocation3] sm:$0xff] }
 0x106   : > { %4777 = vst [vmem:[#allocation23_spill] sm:$0xff] %v3587_v27 }
 0x10d   : > { %2608 = vmatmul.msk.f32.gmra.mxu0 %vm537_vm8, %v515_v28  ;;  %2641 = vmatmul.msk.f32.gmra.mxu1 %vm537_vm8, %v515_v28 }
 0x115   : > { %2609 = vmatmul.msk.f32.gmra.mxu0 %vm537_vm8, %v516_v29  ;;  %2642 = vmatmul.msk.f32.gmra.mxu1 %vm537_vm8, %v516_v29 }
 0x11a   : > { %v3398_v30 = vpop.f32.mrf.mxu0  ;;  %v3400_v31 = vpop.f32.mrf.mxu1 }
 0x11b   : > { %v864_v33 = vmax.f32 %v3398_v30, %v3400_v31 }
 0x11d   : > { %2610 = vmatmul.msk.f32.gmra.mxu0 %vm537_vm8, %v517_v32  ;;  %2643 = vmatmul.msk.f32.gmra.mxu1 %vm537_vm8, %v517_v32 }
 0x11e   : > { %865 = vmax.xlane.f32.xlu0 %v864_v33 }
 0x122   : > { %v3409_v34 = vpop.f32.mrf.mxu0  ;;  %v3411_v35 = vpop.f32.mrf.mxu1 }
 0x123   : > { %v867_v37 = vmax.f32 %v3409_v34, %v3411_v35 }
 0x125   : > { %2611 = vmatmul.msk.f32.gmra.mxu0 %vm537_vm8, %v518_v36  ;;  %2644 = vmatmul.msk.f32.gmra.mxu1 %vm537_vm8, %v518_v36  ;;  %v532_v36 = vld [vmem:[%s4764_s2 + $0xf8] sm:$0xff] }
 0x126   : > { %868 = vmax.xlane.f32.xlu0 %v867_v37 }
 0x12a   : > { %v3420_v38 = vpop.f32.mrf.mxu0  ;;  %v3422_v39 = vpop.f32.mrf.mxu1 }
 0x12b   : > { %v870_v41 = vmax.f32 %v3420_v38, %v3422_v39 }
 0x12d   : > { %2612 = vmatmul.msk.f32.gmra.mxu0 %vm537_vm8, %v519_v40  ;;  %2645 = vmatmul.msk.f32.gmra.mxu1 %vm537_vm8, %v519_v40  ;;  %v3606_v40 = vld [vmem:[#allocation3 + $0x8] sm:$0xff] }
 0x12e   : > { %871 = vmax.xlane.f32.xlu1 %v870_v41  ;;  %4781 = vst [vmem:[#allocation27_spill] sm:$0xff] %v3606_v40 }
 0x132   : > { %v3431_v42 = vpop.f32.mrf.mxu0  ;;  %v3433_v43 = vpop.f32.mrf.mxu1 }
 0x133   : > { %v873_v45 = vmax.f32 %v3431_v42, %v3433_v43 }
 0x135   : > { %2613 = vmatmul.msk.f32.gmra.mxu0 %vm537_vm8, %v520_v44  ;;  %2646 = vmatmul.msk.f32.gmra.mxu1 %vm537_vm8, %v520_v44 }
 0x136   : > { %874 = vmax.xlane.f32.xlu1 %v873_v45 }
 0x13a   : > { %v3442_v46 = vpop.f32.mrf.mxu0  ;;  %v3444_v47 = vpop.f32.mrf.mxu1 }
 0x13b   : > { %v876_v49 = vmax.f32 %v3442_v46, %v3444_v47 }
 0x13d   : > { %2614 = vmatmul.msk.f32.gmra.mxu0 %vm537_vm8, %v521_v48  ;;  %2647 = vmatmul.msk.f32.gmra.mxu1 %vm537_vm8, %v521_v48 }
 0x13e   : > { %877 = vmax.xlane.f32.xlu2 %v876_v49 }
 0x142   : > { %v3453_v50 = vpop.f32.mrf.mxu0  ;;  %v3455_v51 = vpop.f32.mrf.mxu1 }
 0x143   : > { %v879_v53 = vmax.f32 %v3453_v50, %v3455_v51 }
 0x145   : > { %2615 = vmatmul.msk.f32.gmra.mxu0 %vm537_vm8, %v522_v52  ;;  %2648 = vmatmul.msk.f32.gmra.mxu1 %vm537_vm8, %v522_v52  ;;  %v3620_v52 = vld [vmem:[#allocation3 + $0x10] sm:$0xff] }
 0x146   : > { %880 = vmax.xlane.f32.xlu2 %v879_v53 }
 0x14a   : > { %v3464_v54 = vpop.f32.mrf.mxu0  ;;  %v3466_v55 = vpop.f32.mrf.mxu1 }
 0x14b   : > { %v882_v57 = vmax.f32 %v3464_v54, %v3466_v55 }
 0x14d   : > { %2616 = vmatmul.msk.f32.gmra.mxu0 %vm537_vm8, %v523_v56  ;;  %2649 = vmatmul.msk.f32.gmra.mxu1 %vm537_vm8, %v523_v56 }
 0x14e   : > { %883 = vmax.xlane.f32.xlu1 %v882_v57 }
 0x152   : > { %v3475_v58 = vpop.f32.mrf.mxu0  ;;  %v3477_v59 = vpop.f32.mrf.mxu1 }
 0x153   : > { %v885_v61 = vmax.f32 %v3475_v58, %v3477_v59 }
 0x155   : > { %2617 = vmatmul.msk.f32.gmra.mxu0 %vm537_vm8, %v524_v60  ;;  %2650 = vmatmul.msk.f32.gmra.mxu1 %vm537_vm8, %v524_v60 }
 0x156   : > { %886 = vmax.xlane.f32.xlu1 %v885_v61 }
 0x15a   : > { %v3486_v62 = vpop.f32.mrf.mxu0  ;;  %v3488_v63 = vpop.f32.mrf.mxu1 }
 0x15b   : > { %4765 = vst [vmem:[#allocation11_spill] sm:$0xff] %v3486_v62 }
 0x15c   : > { %4766 = vst [vmem:[#allocation12_spill] sm:$0xff] %v3488_v63 }
 0x15d   : > { %2618 = vmatmul.msk.f32.gmra.mxu0 %vm537_vm8, %v525_v0  ;;  %2651 = vmatmul.msk.f32.gmra.mxu1 %vm537_vm8, %v525_v0  ;;  %v3634_v0 = vld [vmem:[#allocation3 + $0x18] sm:$0xff] }
 0x15e   : > { %4783 = vst [vmem:[#allocation29_spill] sm:$0xff] %v3634_v0 }
 0x162   : > { %v3495_v1 = vpop.f32.mrf.mxu0  ;;  %v3497_v2 = vpop.f32.mrf.mxu1 }
 0x163   : > { %4767 = vst [vmem:[#allocation13_spill] sm:$0xff] %v3495_v1  ;;  %v891_v4 = vmax.f32 %v3495_v1, %v3497_v2 }
 0x164   : > { %4768 = vst [vmem:[#allocation14_spill] sm:$0xff] %v3497_v2 }
 0x165   : > { %2619 = vmatmul.msk.f32.gmra.mxu0 %vm537_vm8, %v526_v3  ;;  %2652 = vmatmul.msk.f32.gmra.mxu1 %vm537_vm8, %v526_v3 }
 0x166   : > { %892 = vmax.xlane.f32.xlu1 %v891_v4 }
 0x16a   : > { %v3506_v5 = vpop.f32.mrf.mxu0  ;;  %v3508_v6 = vpop.f32.mrf.mxu1 }
 0x16b   : > { %4769 = vst [vmem:[#allocation15_spill] sm:$0xff] %v3506_v5  ;;  %v894_v9 = vmax.f32 %v3506_v5, %v3508_v6 }
 0x16c   : > { %4770 = vst [vmem:[#allocation16_spill] sm:$0xff] %v3508_v6 }
 0x16d   : > { %2620 = vmatmul.msk.f32.gmra.mxu0 %vm537_vm8, %v527_v7  ;;  %2653 = vmatmul.msk.f32.gmra.mxu1 %vm537_vm8, %v527_v7 }
 0x16e   : > { %895 = vmax.xlane.f32.xlu0 %v894_v9  ;;  %v888_v9 = vmax.f32 %v3486_v62, %v3488_v63 }
 0x172   : > { %v3525_v11 = vpop.f32.mrf.mxu0  ;;  %v3527_v12 = vpop.f32.mrf.mxu1 }
 0x173   : > { %4771 = vst [vmem:[#allocation17_spill] sm:$0xff] %v3525_v11  ;;  %v897_v14 = vmax.f32 %v3525_v11, %v3527_v12 }
 0x174   : > { %4772 = vst [vmem:[#allocation18_spill] sm:$0xff] %v3527_v12 }
 0x175   : > { %2621 = vmatmul.msk.f32.gmra.mxu0 %vm537_vm8, %v528_v13  ;;  %2654 = vmatmul.msk.f32.gmra.mxu1 %vm537_vm8, %v528_v13  ;;  %v3648_v13 = vld [vmem:[#allocation3 + $0x20] sm:$0xff] }
 0x176   : > { %898 = vmax.xlane.f32.xlu1 %v897_v14 }
 0x17a   : > { %v3544_v16 = vpop.f32.mrf.mxu0  ;;  %v3546_v17 = vpop.f32.mrf.mxu1 }
 0x17b   : > { %4773 = vst [vmem:[#allocation19_spill] sm:$0xff] %v3544_v16 }
 0x17c   : > { %4774 = vst [vmem:[#allocation20_spill] sm:$0xff] %v3546_v17 }
 0x17d   : > { %2622 = vmatmul.msk.f32.gmra.mxu0 %vm537_vm8, %v529_v18  ;;  %2655 = vmatmul.msk.f32.gmra.mxu1 %vm537_vm8, %v529_v18 }
 0x182   : > { %v3561_v20 = vpop.f32.mrf.mxu0  ;;  %v3563_v21 = vpop.f32.mrf.mxu1 }
 0x183   : > { %4775 = vst [vmem:[#allocation21_spill] sm:$0xff] %v3561_v20 }
 0x184   : > { %4776 = vst [vmem:[#allocation22_spill] sm:$0xff] %v3563_v21 }
 0x185   : > { %2623 = vmatmul.msk.f32.gmra.mxu0 %vm537_vm8, %v530_v22  ;;  %2656 = vmatmul.msk.f32.gmra.mxu1 %vm537_vm8, %v530_v22 }
 0x18a   : > { %v3578_v23 = vpop.f32.mrf.mxu1  ;;  %v3580_v25 = vpop.f32.mrf.mxu0 }
 0x18d   : > { %2624 = vmatmul.msk.f32.gmra.mxu0 %vm537_vm8, %v531_v26  ;;  %2657 = vmatmul.msk.f32.gmra.mxu1 %vm537_vm8, %v531_v26  ;;  %v3662_v26 = vld [vmem:[#allocation3 + $0x28] sm:$0xff] }
 0x18e   : > { %4785 = vst [vmem:[#allocation31_spill] sm:$0xff] %v3662_v26 }
 0x191   : > { %v866_v28 = vpop.xlane.xlu0 %865 }
 0x192   : > { %v3590_v29 = vmax.f32 %v3587_v27, %v866_v28  ;;  %v3592_v32 = vpop.f32.mrf.mxu0  ;;  %v3594_v33 = vpop.f32.mrf.mxu1 }
 0x193   : > { %4779 = vst [vmem:[#allocation25_spill] sm:$0xff] %v3592_v32 }
 0x194   : > { %4778 = vst [vmem:[#allocation24_spill] sm:$0xff] %v3590_v29  ;;  %994 = vperm.xlu0 %2804, %v3590_v29  }
 0x195   : > { %4780 = vst [vmem:[#allocation26_spill] sm:$0xff] %v3594_v33  ;;  %2625 = vmatmul.msk.f32.gmra.mxu0 %vm537_vm8, %v532_v36  ;;  %2658 = vmatmul.msk.f32.gmra.mxu1 %vm537_vm8, %v532_v36 }
 0x196   : > { %1555 = vst.msk [vmem:[#allocation3] sm:$0xff] %vm468_vm9, %v3590_v29  ;;  %v3709_v29 = vld [vmem:[#allocation3 + $0x48] sm:$0xff] }
 0x197   : > { %4789 = vst [vmem:[#allocation35_spill] sm:$0xff] %v3709_v29 }
 0x199   : > { %v869_v41 = vpop.xlane.xlu0 %868 }
 0x19a   : > { %v3609_v44 = vmax.f32 %v3606_v40, %v869_v41  ;;  %v3611_v45 = vpop.f32.mrf.mxu0  ;;  %v3613_v48 = vpop.f32.mrf.mxu1 }
 0x19c   : > { %4782 = vst [vmem:[#allocation28_spill] sm:$0xff] %v3609_v44  ;;  %999 = vperm.xlu2 %2803, %v3609_v44  }
 0x19d   : > { %1556 = vst.msk [vmem:[#allocation3 + $0x8] sm:$0xff] %vm468_vm9, %v3609_v44 }
 0x1a1   : > { %v872_v53 = vpop.xlane.xlu1 %871 }
 0x1a2   : > { %v3623_v56 = vmax.f32 %v3620_v52, %v872_v53  ;;  %v3625_v57 = vpop.f32.mrf.mxu0  ;;  %v3627_v60 = vpop.f32.mrf.mxu1 }
 0x1a4   : > { %1557 = vst.msk [vmem:[#allocation3 + $0x10] sm:$0xff] %vm468_vm9, %v3623_v56  ;;  %1004 = vperm.xlu1 %2805, %v3623_v56  }
 0x1a9   : > { %v875_v3 = vpop.xlane.xlu1 %874 }
 0x1aa   : > { %v3637_v4 = vmax.f32 %v3634_v0, %v875_v3  ;;  %v3639_v7 = vpop.f32.mrf.mxu0  ;;  %v3641_v8 = vpop.f32.mrf.mxu1  ;;  %v3690_v3 = vld [vmem:[#allocation3 + $0x38] sm:$0xff] }
 0x1ab   : > { %4787 = vst [vmem:[#allocation33_spill] sm:$0xff] %v3690_v3 }
 0x1ac   : > { %4784 = vst [vmem:[#allocation30_spill] sm:$0xff] %v3637_v4  ;;  %1009 = vperm.xlu0 %2804, %v3637_v4  }
 0x1ad   : > { %1558 = vst.msk [vmem:[#allocation3 + $0x18] sm:$0xff] %vm468_vm9, %v3637_v4  ;;  %v900_v4 = vmax.f32 %v3544_v16, %v3546_v17 }
 0x1b1   : > { %v878_v14 = vpop.xlane.xlu2 %877 }
 0x1b2   : > { %v3651_v15 = vmax.f32 %v3648_v13, %v878_v14  ;;  %v3653_v18 = vpop.f32.mrf.mxu0  ;;  %v3655_v19 = vpop.f32.mrf.mxu1  ;;  %v3675_v14 = vld [vmem:[#allocation3 + $0x30] sm:$0xff] }
 0x1b4   : > { %1559 = vst.msk [vmem:[#allocation3 + $0x20] sm:$0xff] %vm468_vm9, %v3651_v15  ;;  %1014 = vperm.xlu0 %2804, %v3651_v15  }
 0x1b9   : > { %v881_v41 = vpop.xlane.xlu2 %880 }
 0x1ba   : > { %v3664_v28 = vpop.f32.mrf.mxu0  ;;  %v3666_v36 = vpop.f32.mrf.mxu1  ;;  %v3669_v53 = vmax.f32 %v3662_v26, %v881_v41 }
 0x1bc   : > { %4786 = vst [vmem:[#allocation32_spill] sm:$0xff] %v3669_v53 }
 0x1bd   : > { %1560 = vst.msk [vmem:[#allocation3 + $0x28] sm:$0xff] %vm468_vm9, %v3669_v53 }
 0x1c1   : > { %v884_v37 = vpop.xlane.xlu1 %883 }
 0x1c2   : > { %v3679_v49 = vpop.f32.mrf.mxu0  ;;  %v3681_v22 = vpop.f32.mrf.mxu1  ;;  %v3684_v61 = vmax.f32 %v3675_v14, %v884_v37 }
 0x1c4   : > { %1561 = vst.msk [vmem:[#allocation3 + $0x30] sm:$0xff] %vm468_vm9, %v3684_v61 }
 0x1c5   : > { %889 = vmax.xlane.f32.xlu2 %v888_v9 }
 0x1c9   : > { %v887_v24 = vpop.xlane.xlu1 %886 }
 0x1ca   : > { %v3692_v10 = vpop.f32.mrf.mxu0  ;;  %v3694_v26 = vpop.f32.mrf.mxu1  ;;  %v3699_v37 = vmax.f32 %v3690_v3, %v887_v24  ;;  %v903_v24 = vmax.f32 %v3561_v20, %v3563_v21  ;;  %v3725_v3 = vld [vmem:[#allocation3 + $0x50] sm:$0xff] }
 0x1cb   : > { %4791 = vst [vmem:[#allocation37_spill] sm:$0xff] %v3725_v3 }
 0x1cc   : > { %4788 = vst [vmem:[#allocation34_spill] sm:$0xff] %v3699_v37 }
 0x1cd   : > { %1562 = vst.msk [vmem:[#allocation3 + $0x38] sm:$0xff] %vm468_vm9, %v3699_v37 }
 0x1ce   : > { %901 = vmax.xlane.f32.xlu1 %v900_v4  ;;  %v3739_v4 = vld [vmem:[#allocation3 + $0x58] sm:$0xff] }
 0x1cf   : > { %4793 = vst [vmem:[#allocation39_spill] sm:$0xff] %v3739_v4 }
 0x1d2   : > { %v3705_v9 = vpop.f32.mrf.mxu0  ;;  %v3707_v0 = vpop.f32.mrf.mxu1 }
 0x1d9   : > { %v893_v27 = vpop.xlane.xlu1 %892 }
 0x1da   : > { %v3711_v12 = vpop.f32.mrf.mxu0  ;;  %v3713_v11 = vpop.f32.mrf.mxu1  ;;  %v3718_v41 = vmax.f32 %v3709_v29, %v893_v27 }
 0x1dc   : > { %4790 = vst [vmem:[#allocation36_spill] sm:$0xff] %v3718_v41 }
 0x1dd   : > { %1564 = vst.msk [vmem:[#allocation3 + $0x48] sm:$0xff] %vm468_vm9, %v3718_v41  ;;  %1019 = vperm.xlu2 %2803, %v3669_v53  }
 0x1de   : > { %904 = vmax.xlane.f32.xlu0 %v903_v24 }
 0x1e1   : > { %v896_v6 = vpop.xlane.xlu0 %895 }
 0x1e2   : > { %v3727_v5 = vpop.f32.mrf.mxu0  ;;  %v3729_v17 = vpop.f32.mrf.mxu1  ;;  %v3732_v21 = vmax.f32 %v3725_v3, %v896_v6 }
 0x1e4   : > { %4792 = vst [vmem:[#allocation38_spill] sm:$0xff] %v3732_v21 }
 0x1e5   : > { %1565 = vst.msk [vmem:[#allocation3 + $0x50] sm:$0xff] %vm468_vm9, %v3732_v21  ;;  %1024 = vperm.xlu2 %2803, %v3684_v61  }
 0x1e9   : > { %v899_v24 = vpop.xlane.xlu1 %898 }
 0x1ea   : > { %v733_v53 = vpop.f32.mrf.mxu0  ;;  %v846_v20 = vpop.f32.mrf.mxu1  ;;  %v3742_v16 = vmax.f32 %v3739_v4, %v899_v24 }
 0x1ec   : > { %4794 = vst [vmem:[#allocation40_spill] sm:$0xff] %v3742_v16 }
 0x1ed   : > { %1566 = vst.msk [vmem:[#allocation3 + $0x58] sm:$0xff] %vm468_vm9, %v3742_v16  ;;  %1029 = vperm.xlu2 %2803, %v3699_v37  }
 0x1f2   : > { %1039 = vperm.xlu0 %2804, %v3718_v41   ;;  %v736_v27 = vpop.f32.mrf.mxu0  ;;  %v849_v3 = vpop.f32.mrf.mxu1 }
 0x1fa   : > { %1044 = vperm.xlu0 %2804, %v3732_v21   ;;  %v739_v2 = vpop.f32.mrf.mxu0  ;;  %v852_v1 = vpop.f32.mrf.mxu1 }
 0x202   : > { %1049 = vperm.xlu0 %2804, %v3742_v16   ;;  %v742_v24 = vpop.f32.mrf.mxu0  ;;  %v855_v63 = vpop.f32.mrf.mxu1  ;;  %v906_v16 = vmax.f32 %v3580_v25, %v3578_v23 }
 0x206   : > { %v995_v62 = vpop.permute.xlu0 %994 }
 0x207   : > { %v1072_v6 = vsub.f32 %v3398_v30, %v995_v62  ;;  %v1073_v4 = vsub.f32 %v3400_v31, %v995_v62 }
 0x209   : > { %v1104_v44 = vmul.f32 1.442695, %v1072_v6  ;;  %v1106_v40 = vmul.f32 1.442695, %v1073_v4 }
 0x20a   : > { %v745_v37 = vpop.f32.mrf.mxu0  ;;  %v858_v29 = vpop.f32.mrf.mxu1 }
 0x20b   : > { %2806 = vpow2.f32 %v1104_v44 }
 0x20c   : > { %2808 = vpow2.f32 %v1106_v40 }
 0x211   : > { %v3754_v41 = vpop.eup %2806 }
 0x212   : > { %v3756_v21 = vpop.eup %2808  ;;  %v748_v32 = vpop.f32.mrf.mxu0 }
 0x213   : > { %v861_v33 = vpop.f32.mrf.mxu1  ;;  %1281 = vmatpush.xpose.msra.mxu2 %v748_v32  ;;  %v3762_v30 = vadd.f32 %v3756_v21, %v3754_v41 }
 0x214   : > { %1346 = vmatpush.xpose.msra.mxu3 %v861_v33 }
 0x215   : > { %4795 = vst [vmem:[#allocation41_spill] sm:$0xff] %v3762_v30 }
 0x216   : > { %v1005_v31 = vpop.permute.xlu1 %1004  ;;  %907 = vmax.xlane.f32.xlu2 %v906_v16 }
 0x217   : > { %v1076_v62 = vsub.f32 %v3420_v38, %v1005_v31  ;;  %v1077_v40 = vsub.f32 %v3422_v39, %v1005_v31  ;;  %1282 = vmatpush.xpose.msra.mxu2 %v745_v37 }
 0x218   : > { %1347 = vmatpush.xpose.msra.mxu3 %v858_v29 }
 0x219   : > { %v1112_v44 = vmul.f32 1.442695, %v1076_v62  ;;  %v1114_v4 = vmul.f32 1.442695, %v1077_v40 }
 0x21b   : > { %2810 = vpow2.f32 %v1112_v44  ;;  %1283 = vmatpush.xpose.msra.mxu2 %v742_v24 }
 0x21c   : > { %1348 = vmatpush.xpose.msra.mxu3 %v855_v63  ;;  %2812 = vpow2.f32 %v1114_v4 }
 0x21e   : > { %v1010_v32 = vpop.permute.xlu0 %1009 }
 0x21f   : > { %v1078_v33 = vsub.f32 %v3431_v42, %v1010_v32  ;;  %v1079_v6 = vsub.f32 %v3433_v43, %v1010_v32  ;;  %1284 = vmatpush.xpose.msra.mxu2 %v739_v2 }
 0x220   : > { %1349 = vmatpush.xpose.msra.mxu3 %v852_v1 }
 0x221   : > { %v3768_v16 = vpop.eup %2810  ;;  %v1116_v38 = vmul.f32 1.442695, %v1078_v33  ;;  %v1118_v30 = vmul.f32 1.442695, %v1079_v6 }
 0x222   : > { %v3770_v39 = vpop.eup %2812 }
 0x223   : > { %2814 = vpow2.f32 %v1116_v38  ;;  %1285 = vmatpush.xpose.msra.mxu2 %v736_v27  ;;  %v3774_v63 = vadd.f32 %v3770_v39, %v3768_v16 }
 0x224   : > { %1350 = vmatpush.xpose.msra.mxu3 %v849_v3  ;;  %2816 = vpow2.f32 %v1118_v30 }
 0x226   : > { %v1015_v29 = vpop.permute.xlu0 %1014 }
 0x227   : > { %v1080_v42 = vsub.f32 %v3442_v46, %v1015_v29  ;;  %v1081_v43 = vsub.f32 %v3444_v47, %v1015_v29  ;;  %1286 = vmatpush.xpose.msra.mxu2 %v733_v53  ;;  %v1000_v46 = vpop.permute.xlu2 %999 }
 0x228   : > { %1351 = vmatpush.xpose.msra.mxu3 %v846_v20  ;;  %v1075_v40 = vsub.f32 %v3411_v35, %v1000_v46 }
 0x229   : > { %v3778_v1 = vpop.eup %2814  ;;  %v1120_v2 = vmul.f32 1.442695, %v1080_v42  ;;  %v1122_v37 = vmul.f32 1.442695, %v1081_v43 }
 0x22a   : > { %v3780_v24 = vpop.eup %2816 }
 0x22b   : > { %2818 = vpow2.f32 %v1120_v2  ;;  %1287 = vmatpush.xpose.msra.mxu2 %v3727_v5  ;;  %v3786_v3 = vadd.f32 %v3780_v24, %v3778_v1  ;;  %v4798_v2 = vsub.f32 %v3675_v14, %v3684_v61 }
 0x22c   : > { %1352 = vmatpush.xpose.msra.mxu3 %v3729_v17  ;;  %2820 = vpow2.f32 %v1122_v37  ;;  %v3800_v17 = vld [vmem:[#allocation3 + $0x40] sm:$0xff] }
 0x22d   : > { %v972_v37 = vmul.f32 1.442695, %v4798_v2  ;;  %v4814_v2 = vld [vmem:[#allocation19_spill] sm:$0xff] }
 0x22f   : > { %1288 = vmatpush.xpose.msra.mxu2 %v3711_v12 }
 0x230   : > { %1353 = vmatpush.xpose.msra.mxu3 %v3713_v11 }
 0x231   : > { %v3790_v47 = vpop.eup %2818 }
 0x232   : > { %v3792_v20 = vpop.eup %2820 }
 0x233   : > { %1289 = vmatpush.xpose.msra.mxu2 %v3705_v9  ;;  %v3798_v5 = vadd.f32 %v3792_v20, %v3790_v47 }
 0x234   : > { %1354 = vmatpush.xpose.msra.mxu3 %v3707_v0 }
 0x237   : > { %1290 = vmatpush.xpose.msra.mxu2 %v3692_v10  ;;  %v3815_v10 = vld [vmem:[#allocation3 + $0x60] sm:$0xff] }
 0x238   : > { %1355 = vmatpush.xpose.msra.mxu3 %v3694_v26  ;;  %v890_v11 = vpop.xlane.xlu2 %889 }
 0x239   : > { %v3805_v12 = vmax.f32 %v3800_v17, %v890_v11 }
 0x23b   : > { %v952_v53 = vsub.f32 %v3800_v17, %v3805_v12  ;;  %1563 = vst.msk [vmem:[#allocation3 + $0x40] sm:$0xff] %vm468_vm9, %v3805_v12  ;;  %1034 = vperm.xlu1 %2805, %v3805_v12   ;;  %1291 = vmatpush.xpose.msra.mxu2 %v3679_v49  ;;  %v926_v17 = vld [vmem:[#allocation3 + $0x70] sm:$0xff] }
 0x23c   : > { %1356 = vmatpush.xpose.msra.mxu3 %v3681_v22 }
 0x23f   : > { %1292 = vmatpush.xpose.msra.mxu2 %v3664_v28 }
 0x240   : > { %1357 = vmatpush.xpose.msra.mxu3 %v3666_v36  ;;  %v1020_v0 = vpop.permute.xlu2 %1019 }
 0x241   : > { %v1082_v26 = vsub.f32 %v3453_v50, %v1020_v0  ;;  %v1083_v9 = vsub.f32 %v3455_v51, %v1020_v0  ;;  %v902_v27 = vpop.xlane.xlu1 %901  ;;  %v4801_v0 = vld [vmem:[#allocation35_spill] sm:$0xff] }
 0x242   : > { %v3821_v30 = vmax.f32 %v3815_v10, %v902_v27 }
 0x243   : > { %v1124_v31 = vmul.f32 1.442695, %v1082_v26  ;;  %v1126_v62 = vmul.f32 1.442695, %v1083_v9  ;;  %1293 = vmatpush.xpose.msra.mxu2 %v3653_v18  ;;  %v1074_v18 = vsub.f32 %v3409_v34, %v1000_v46  ;;  %v4800_v46 = vld [vmem:[#allocation25_spill] sm:$0xff]  ;;  %v4802_v26 = vld [vmem:[#allocation36_spill] sm:$0xff] }
 0x244   : > { %1567 = vst.msk [vmem:[#allocation3 + $0x60] sm:$0xff] %vm468_vm9, %v3821_v30  ;;  %1358 = vmatpush.xpose.msra.mxu3 %v3655_v19  ;;  %1054 = vperm.xlu0 %2804, %v3821_v30   ;;  %v4803_v9 = vsub.f32 %v4801_v0, %v4802_v26  ;;  %v956_v14 = vsub.f32 %v3815_v10, %v3821_v30  ;;  %v4808_v10 = vld [vmem:[#allocation40_spill] sm:$0xff] }
 0x245   : > { %2822 = vpow2.f32 %v1124_v31  ;;  %v1108_v34 = vmul.f32 1.442695, %v1074_v18  ;;  %v4804_v31 = vld [vmem:[#allocation27_spill] sm:$0xff] }
 0x246   : > { %2824 = vpow2.f32 %v1126_v62  ;;  %v978_v27 = vmul.f32 1.442695, %v4803_v9  ;;  %v4805_v62 = vld [vmem:[#allocation28_spill] sm:$0xff] }
 0x247   : > { %1294 = vmatpush.xpose.msra.mxu2 %v3639_v7 }
 0x248   : > { %1359 = vmatpush.xpose.msra.mxu3 %v3641_v8  ;;  %v1025_v50 = vpop.permute.xlu2 %1024  ;;  %v1110_v8 = vmul.f32 1.442695, %v1075_v40 }
 0x249   : > { %v1084_v51 = vsub.f32 %v3464_v54, %v1025_v50  ;;  %v1085_v49 = vsub.f32 %v3466_v55, %v1025_v50  ;;  %v4796_v55 = vsub.f32 %v3620_v52, %v3623_v56  ;;  %v4806_v50 = vsub.f32 %v4804_v31, %v4805_v62 }
 0x24b   : > { %v3832_v22 = vpop.eup %2822  ;;  %v1128_v28 = vmul.f32 1.442695, %v1084_v51  ;;  %v1130_v36 = vmul.f32 1.442695, %v1085_v49  ;;  %1295 = vmatpush.xpose.msra.mxu2 %v3625_v57  ;;  %v964_v7 = vmul.f32 1.442695, %v4796_v55 }
 0x24c   : > { %v3836_v19 = vpop.eup %2824  ;;  %1360 = vmatpush.xpose.msra.mxu3 %v3627_v60  ;;  %v3848_v57 = vld [vmem:[#allocation3 + $0x68] sm:$0xff]  ;;  %v962_v51 = vmul.f32 1.442695, %v4806_v50 }
 0x24d   : > { %2826 = vpow2.f32 %v1128_v28  ;;  %v3842_v54 = vadd.f32 %v3836_v19, %v3832_v22  ;;  %v4817_v50 = vld [vmem:[#allocation16_spill] sm:$0xff] }
 0x24e   : > { %2828 = vpow2.f32 %v1130_v36 }
 0x24f   : > { %1296 = vmatpush.xpose.msra.mxu2 %v3611_v45  ;;  %2830 = vpow2.f32 %v964_v7 }
 0x250   : > { %1361 = vmatpush.xpose.msra.mxu3 %v3613_v48  ;;  %v1030_v35 = vpop.permute.xlu2 %1029  ;;  %2832 = vpow2.f32 %v1108_v34 }
 0x251   : > { %v1086_v60 = vsub.f32 %v3475_v58, %v1030_v35  ;;  %v1087_v44 = vsub.f32 %v3477_v59, %v1030_v35  ;;  %v905_v4 = vpop.xlane.xlu0 %904  ;;  %2834 = vpow2.f32 %v1110_v8  ;;  %v4810_v8 = vld [vmem:[#allocation11_spill] sm:$0xff] }
 0x252   : > { %v3854_v32 = vmax.f32 %v3848_v57, %v905_v4  ;;  %1297 = vmatmul.f32.vlgmr.msra.gmra.mxu2 %v3754_v41 }
 0x253   : > { %v2827_v52 = vpop.eup %2826  ;;  %v1132_v45 = vmul.f32 1.442695, %v1086_v60  ;;  %v1134_v56 = vmul.f32 1.442695, %v1087_v44  ;;  %1362 = vmatmul.f32.vlgmr.msra.gmra.mxu3 %v3756_v21  ;;  %v4797_v21 = vsub.f32 %v3648_v13, %v3651_v15  ;;  %v4799_v15 = vld [vmem:[#allocation26_spill] sm:$0xff]  ;;  %v4811_v60 = vld [vmem:[#allocation12_spill] sm:$0xff] }
 0x254   : > { %v2829_v33 = vpop.eup %2828  ;;  %v957_v58 = vsub.f32 %v3848_v57, %v3854_v32  ;;  %1568 = vst.msk [vmem:[#allocation3 + $0x68] sm:$0xff] %vm468_vm9, %v3854_v32  ;;  %1059 = vperm.xlu2 %2803, %v3854_v32   ;;  %v909_v11 = vmax.f32 %v4800_v46, %v4799_v15 }
 0x255   : > { %2836 = vpow2.f32 %v1132_v45  ;;  %v3863_v59 = vadd.f32 %v2829_v33, %v2827_v52  ;;  %v3865_v48 = vpop.eup %2830  ;;  %v968_v6 = vmul.f32 1.442695, %v4797_v21  ;;  %v4812_v45 = vld [vmem:[#allocation13_spill] sm:$0xff] }
 0x256   : > { %2838 = vpow2.f32 %v1134_v56  ;;  %v3867_v41 = vpop.eup %2832 }
 0x257   : > { %v3872_v38 = vpop.eup %2834  ;;  %2840 = vpow2.f32 %v968_v6 }
 0x258   : > { %2842 = vpow2.f32 %v972_v37 }
 0x259   : > { %2844 = vpow2.f32 %v978_v27 }
 0x25a   : > { %1300 = vmatmul.f32.gmra.mxu2 %v3867_v41 }
 0x25b   : > { %v2837_v29 = vpop.eup %2836  ;;  %1365 = vmatmul.f32.gmra.mxu3 %v3872_v38 }
 0x25c   : > { %v2839_v42 = vpop.eup %2838  ;;  %1439 = vperm.xlu2 %2803, %v3865_v48  }
 0x25d   : > { %v3877_v43 = vadd.f32 %v2839_v42, %v2837_v29  ;;  %v3883_v13 = vpop.eup %2840 }
 0x25e   : > { %v3893_v61 = vpop.eup %2842 }
 0x262   : > { %1303 = vmatmul.f32.gmra.mxu2 %v3768_v16  ;;  %v984_v16 = vmul.f32 1.442695, %v956_v14 }
 0x263   : > { %1368 = vmatmul.f32.gmra.mxu3 %v3770_v39  ;;  %v3900_v39 = vpop.eup %2844 }
 0x264   : > { %1449 = vperm.xlu2 %2803, %v3883_v13   ;;  %2846 = vpow2.f32 %v984_v16  ;;  %v1040_v40 = vpop.permute.xlu0 %1039  ;;  %v4816_v16 = vld [vmem:[#allocation15_spill] sm:$0xff] }
 0x265   : > { %910 = vmax.xlane.f32.xlu1 %v909_v11  ;;  %2848 = vpow2.f32 %v962_v51  ;;  %v1090_v56 = vsub.f32 %v4812_v45, %v1040_v40  ;;  %v4815_v11 = vld [vmem:[#allocation20_spill] sm:$0xff] }
 0x267   : > { %v1140_v6 = vmul.f32 1.442695, %v1090_v56 }
 0x26a   : > { %1306 = vmatmul.f32.gmra.mxu2 %v3778_v1  ;;  %v3907_v1 = vpop.eup %2846 }
 0x26b   : > { %1371 = vmatmul.f32.gmra.mxu3 %v3780_v24  ;;  %v976_v24 = vmul.f32 1.442695, %v952_v53 }
 0x26c   : > { %1459 = vperm.xlu2 %2803, %v3893_v61   ;;  %v1045_v55 = vpop.permute.xlu0 %1044 }
 0x26d   : > { %2850 = vpow2.f32 %v976_v24  ;;  %v1092_v31 = vsub.f32 %v4816_v16, %v1045_v55  ;;  %v1093_v51 = vsub.f32 %v4817_v50, %v1045_v55 }
 0x26f   : > { %v1144_v24 = vmul.f32 1.442695, %v1092_v31 }
 0x272   : > { %1309 = vmatmul.f32.gmra.mxu2 %v3790_v47  ;;  %v3915_v47 = vpop.eup %2848 }
 0x273   : > { %1374 = vmatmul.f32.gmra.mxu3 %v3792_v20  ;;  %v4807_v20 = vld [vmem:[#allocation39_spill] sm:$0xff] }
 0x274   : > { %1474 = vperm.xlu2 %2803, %v3900_v39   ;;  %v4809_v30 = vsub.f32 %v4807_v20, %v4808_v10  ;;  %v1050_v34 = vpop.permute.xlu0 %1049  ;;  %v1146_v10 = vmul.f32 1.442695, %v1093_v51 }
 0x276   : > { %v982_v49 = vmul.f32 1.442695, %v4809_v30  ;;  %v1203_v30 = vadd.f32 %v3872_v38, %v3867_v41 }
 0x278   : > { %2852 = vpow2.f32 %v982_v49 }
 0x27a   : > { %1312 = vmatmul.f32.gmra.mxu2 %v3832_v22  ;;  %v3921_v22 = vpop.eup %2850 }
 0x27b   : > { %1377 = vmatmul.f32.gmra.mxu3 %v3836_v19 }
 0x27c   : > { %1489 = vperm.xlu2 %2803, %v3907_v1  }
 0x27e   : > { %1434 = vperm.xlu1 %2805, %v3915_v47   ;;  %v3925_v28 = vpop.eup %2852 }
 0x282   : > { %1315 = vmatmul.f32.gmra.mxu2 %v2827_v52 }
 0x283   : > { %1380 = vmatmul.f32.gmra.mxu3 %v2829_v33  ;;  %v4813_v33 = vld [vmem:[#allocation14_spill] sm:$0xff] }
 0x284   : > { %v1091_v21 = vsub.f32 %v4813_v33, %v1040_v40 }
 0x286   : > { %1469 = vperm.xlu1 %2805, %v3921_v22  }
 0x289   : > { %v908_v12 = vpop.xlane.xlu2 %907 }
 0x28a   : > { %v942_v53 = vmax.f32 %v926_v17, %v908_v12  ;;  %1318 = vmatmul.f32.gmra.mxu2 %v2837_v29  ;;  %v1142_v29 = vmul.f32 1.442695, %v1091_v21 }
 0x28b   : > { %1383 = vmatmul.f32.gmra.mxu3 %v2839_v42 }
 0x28c   : > { %v958_v18 = vsub.f32 %v926_v17, %v942_v53  ;;  %1569 = vst.msk [vmem:[#allocation3 + $0x70] sm:$0xff] %vm468_vm9, %v942_v53  ;;  %1064 = vperm.xlu0 %2804, %v942_v53   ;;  %v4818_v53 = vld [vmem:[#allocation17_spill] sm:$0xff] }
 0x28e   : > { %v988_v36 = vmul.f32 1.442695, %v958_v18  ;;  %1484 = vperm.xlu1 %2805, %v3925_v28   ;;  %v1094_v18 = vsub.f32 %v4818_v53, %v1050_v34 }
 0x290   : > { %2854 = vpow2.f32 %v988_v36  ;;  %v4819_v36 = vld [vmem:[#allocation18_spill] sm:$0xff] }
 0x291   : > { %v1095_v40 = vsub.f32 %v4819_v36, %v1050_v34 }
 0x296   : > { %v3928_v19 = vpop.eup %2854 }
 0x297   : > { %1499 = vperm.xlu1 %2805, %v3928_v19  }
 0x2ad   : > { %v1035_v7 = vpop.permute.xlu1 %1034 }
 0x2ae   : > { %v1088_v35 = vsub.f32 %v4810_v8, %v1035_v7  ;;  %v1089_v44 = vsub.f32 %v4811_v60, %v1035_v7  ;;  %v1148_v7 = vmul.f32 1.442695, %v1094_v18  ;;  %v1150_v8 = vmul.f32 1.442695, %v1095_v40  ;;  %v4820_v60 = vld [vmem:[#allocation21_spill] sm:$0xff] }
 0x2b0   : > { %v1136_v4 = vmul.f32 1.442695, %v1088_v35  ;;  %v1138_v52 = vmul.f32 1.442695, %v1089_v44  ;;  %v1060_v35 = vpop.permute.xlu2 %1059 }
 0x2b1   : > { %v1098_v44 = vsub.f32 %v4820_v60, %v1060_v35 }
 0x2b2   : > { %2856 = vpow2.f32 %v1136_v4  ;;  %v4821_v4 = vld [vmem:[#allocation22_spill] sm:$0xff] }
 0x2b3   : > { %2858 = vpow2.f32 %v1138_v52  ;;  %v1099_v52 = vsub.f32 %v4821_v4, %v1060_v35  ;;  %v1156_v56 = vmul.f32 1.442695, %v1098_v44 }
 0x2b4   : > { %2860 = vpow2.f32 %v1140_v6  ;;  %v927_v6 = vld [vmem:[#allocation3 + $0x78] sm:$0xff] }
 0x2b5   : > { %2862 = vpow2.f32 %v1142_v29  ;;  %v1158_v33 = vmul.f32 1.442695, %v1099_v52 }
 0x2b6   : > { %v1055_v42 = vpop.permute.xlu0 %1054 }
 0x2b7   : > { %v1096_v37 = vsub.f32 %v4814_v2, %v1055_v42  ;;  %v1097_v0 = vsub.f32 %v4815_v11, %v1055_v42  ;;  %v4822_v2 = vld [vmem:[#allocation23_spill] sm:$0xff] }
 0x2b8   : > { %v2857_v26 = vpop.eup %2856 }
 0x2b9   : > { %v2859_v9 = vpop.eup %2858  ;;  %v1152_v27 = vmul.f32 1.442695, %v1096_v37  ;;  %v1154_v14 = vmul.f32 1.442695, %v1097_v0  ;;  %1321 = vmatmul.f32.gmra.mxu2 %v2857_v26  ;;  %v4823_v37 = vld [vmem:[#allocation24_spill] sm:$0xff] }
 0x2ba   : > { %1386 = vmatmul.f32.gmra.mxu3 %v2859_v9  ;;  %v3938_v62 = vadd.f32 %v2859_v9, %v2857_v26  ;;  %v3941_v20 = vpop.eup %2860  ;;  %v4824_v11 = vsub.f32 %v4822_v2, %v4823_v37 }
 0x2bb   : > { %2864 = vpow2.f32 %v1152_v27  ;;  %v3945_v49 = vpop.eup %2862 }
 0x2bc   : > { %2866 = vpow2.f32 %v1154_v14  ;;  %v960_v0 = vmul.f32 1.442695, %v4824_v11 }
 0x2bd   : > { %2868 = vpow2.f32 %v1144_v24  ;;  %v4825_v24 = vld [vmem:[#allocation29_spill] sm:$0xff] }
 0x2be   : > { %2870 = vpow2.f32 %v1146_v10  ;;  %v4826_v10 = vld [vmem:[#allocation30_spill] sm:$0xff] }
 0x2bf   : > { %2872 = vpow2.f32 %v1148_v7 }
 0x2c0   : > { %2874 = vpow2.f32 %v1150_v8 }
 0x2c1   : > { %v2865_v17 = vpop.eup %2864  ;;  %1204 = vadd.xlane.f32.xlu1 %v1203_v30  ;;  %1324 = vmatmul.f32.gmra.mxu2 %v3941_v20  ;;  %2876 = vpow2.f32 %v1156_v56  ;;  %v4827_v30 = vsub.f32 %v4825_v24, %v4826_v10  ;;  %v4835_v24 = vld [vmem:[#allocation38_spill] sm:$0xff] }
 0x2c2   : > { %v2867_v12 = vpop.eup %2866  ;;  %1389 = vmatmul.f32.gmra.mxu3 %v3945_v49  ;;  %2878 = vpow2.f32 %v1158_v33 }
 0x2c3   : > { %v3951_v55 = vadd.f32 %v2867_v12, %v2865_v17  ;;  %v2869_v41 = vpop.eup %2868  ;;  %2880 = vpow2.f32 %v960_v0  ;;  %v966_v53 = vmul.f32 1.442695, %v4827_v30 }
 0x2c4   : > { %v2871_v38 = vpop.eup %2870 }
 0x2c5   : > { %v3956_v45 = vpop.eup %2872  ;;  %v1230_v42 = vadd.f32 %v2871_v38, %v2869_v41 }
 0x2c6   : > { %v3958_v34 = vpop.eup %2874 }
 0x2c9   : > { %1213 = vadd.xlane.f32.xlu1 %v3798_v5  ;;  %1327 = vmatmul.f32.gmra.mxu2 %v2869_v41  ;;  %v4828_v41 = vld [vmem:[#allocation31_spill] sm:$0xff] }
 0x2ca   : > { %1392 = vmatmul.f32.gmra.mxu3 %v2871_v38  ;;  %v4829_v38 = vld [vmem:[#allocation32_spill] sm:$0xff] }
 0x2cb   : > { %v4830_v35 = vsub.f32 %v4828_v41, %v4829_v38 }
 0x2cd   : > { %v970_v60 = vmul.f32 1.442695, %v4830_v35 }
 0x2d1   : > { %1222 = vadd.xlane.f32.xlu1 %v3877_v43  ;;  %1330 = vmatmul.f32.gmra.mxu2 %v3956_v45  ;;  %v2877_v43 = vpop.eup %2876 }
 0x2d2   : > { %1395 = vmatmul.f32.gmra.mxu3 %v3958_v34  ;;  %v2879_v14 = vpop.eup %2878 }
 0x2d3   : > { %v1239_v51 = vadd.f32 %v2879_v14, %v2877_v43 }
 0x2d5   : > { %v1298_v5 = vpop.f32.mrf.mxu2 }
 0x2d6   : > { %v1363_v21 = vpop.f32.mrf.mxu3 }
 0x2d7   : > { %v3963_v29 = vadd.f32 %v1363_v21, %v1298_v5  ;;  %v4831_v5 = vld [vmem:[#allocation33_spill] sm:$0xff]  ;;  %v4832_v21 = vld [vmem:[#allocation34_spill] sm:$0xff] }
 0x2d8   : > { %v911_v26 = vpop.xlane.xlu1 %910 }
 0x2d9   : > { %v943_v9 = vmax.f32 %v927_v6, %v911_v26  ;;  %1231 = vadd.xlane.f32.xlu1 %v1230_v42  ;;  %1333 = vmatmul.f32.gmra.mxu2 %v2865_v17  ;;  %v3972_v17 = vpop.eup %2880 }
 0x2da   : > { %1398 = vmatmul.f32.gmra.mxu3 %v2867_v12  ;;  %v1440_v12 = vpop.permute.xlu2 %1439 }
 0x2db   : > { %v959_v27 = vsub.f32 %v927_v6, %v943_v9  ;;  %1570 = vst.msk [vmem:[#allocation3 + $0x78] sm:$0xff] %vm468_vm9, %v943_v9  ;;  %1069 = vperm.xlu0 %2804, %v943_v9   ;;  %v1509_v7 = vmul.f32 0.0, %v1440_v12  ;;  %v4833_v6 = vsub.f32 %v4831_v5, %v4832_v21 }
 0x2dd   : > { %v990_v16 = vmul.f32 1.442695, %v959_v27  ;;  %v1301_v31 = vpop.f32.mrf.mxu2  ;;  %v974_v42 = vmul.f32 1.442695, %v4833_v6 }
 0x2de   : > { %v1366_v50 = vpop.f32.mrf.mxu3 }
 0x2df   : > { %2882 = vpow2.f32 %v990_v16  ;;  %v1367_v37 = vadd.f32 %v1366_v50, %v1301_v31  ;;  %v986_v50 = vmul.f32 1.442695, %v957_v58 }
 0x2e0   : > { %2884 = vpow2.f32 %v966_v53 }
 0x2e1   : > { %1240 = vadd.xlane.f32.xlu1 %v1239_v51  ;;  %1336 = vmatmul.f32.gmra.mxu2 %v2877_v43  ;;  %2886 = vpow2.f32 %v970_v60  ;;  %v4834_v51 = vld [vmem:[#allocation37_spill] sm:$0xff] }
 0x2e2   : > { %1401 = vmatmul.f32.gmra.mxu3 %v2879_v14  ;;  %2888 = vpow2.f32 %v974_v42  ;;  %v1450_v9 = vpop.permute.xlu2 %1449  ;;  %v4836_v10 = vsub.f32 %v4834_v51, %v4835_v24  ;;  %v1233_v42 = vadd.f32 %v3958_v34, %v3956_v45 }
 0x2e3   : > { %1429 = vperm.xlu0 %2804, %v3972_v17   ;;  %v1511_v14 = vmul.f32 0.0, %v1450_v9 }
 0x2e4   : > { %v980_v30 = vmul.f32 1.442695, %v4836_v10 }
 0x2e5   : > { %v3975_v18 = vpop.eup %2882  ;;  %v1304_v36 = vpop.f32.mrf.mxu2 }
 0x2e6   : > { %v1369_v40 = vpop.f32.mrf.mxu3  ;;  %1504 = vperm.xlu2 %2803, %v3975_v18   ;;  %v3981_v4 = vpop.eup %2884  ;;  %2890 = vpow2.f32 %v980_v30  ;;  %v1175_v30 = vld [vmem:[#allocation4 + $0x38] sm:$0xff] }
 0x2e7   : > { %v1370_v8 = vadd.f32 %v1369_v40, %v1304_v36  ;;  %v3989_v0 = vpop.eup %2886  ;;  %2892 = vpow2.f32 %v986_v50 }
 0x2e8   : > { %v3995_v12 = vpop.eup %2888 }
 0x2e9   : > { %v1525_v44 = vadd.f32 %v1509_v7, %v1370_v8 }
 0x2eb   : > { %1541 = vst [vmem:[#allocation2 + $0x58] sm:$0xff] %v1525_v44  ;;  %1444 = vperm.xlu0 %2804, %v3981_v4   ;;  %v1460_v44 = vpop.permute.xlu2 %1459 }
 0x2ec   : > { %v2891_v60 = vpop.eup %2890  ;;  %v1513_v57 = vmul.f32 0.0, %v1460_v44  ;;  %v1227_v44 = vadd.f32 %v3945_v49, %v3941_v20 }
 0x2ed   : > { %v1307_v52 = vpop.f32.mrf.mxu2  ;;  %v4005_v58 = vpop.eup %2892 }
 0x2ee   : > { %v1372_v56 = vpop.f32.mrf.mxu3 }
 0x2ef   : > { %v3984_v33 = vadd.f32 %v1372_v56, %v1307_v52 }
 0x2f0   : > { %v1435_v2 = vpop.permute.xlu1 %1434 }
 0x2f1   : > { %v1508_v11 = vmul.f32 0.0, %v1435_v2 }
 0x2f3   : > { %v1524_v26 = vadd.f32 %v1508_v11, %v1367_v37  ;;  %1454 = vperm.xlu0 %2804, %v3989_v0   ;;  %v1169_v11 = vld [vmem:[#allocation4 + $0x8] sm:$0xff] }
 0x2f5   : > { %1540 = vst [vmem:[#allocation2] sm:$0xff] %v1524_v26  ;;  %v1310_v43 = vpop.f32.mrf.mxu2  ;;  %v1185_v26 = vmul.f32 %v3915_v47, %v1169_v11 }
 0x2f6   : > { %v1375_v27 = vpop.f32.mrf.mxu3 }
 0x2f7   : > { %v1376_v16 = vadd.f32 %v1375_v27, %v1310_v43  ;;  %v4837_v27 = vld [vmem:[#allocation41_spill] sm:$0xff] }
 0x2f9   : > { %v1527_v53 = vadd.f32 %v1511_v14, %v1376_v16 }
 0x2fb   : > { %1543 = vst [vmem:[#allocation2 + $0x50] sm:$0xff] %v1527_v53  ;;  %1464 = vperm.xlu0 %2804, %v3995_v12   ;;  %v1475_v53 = vpop.permute.xlu2 %1474 }
 0x2fd   : > { %v1313_v31 = vpop.f32.mrf.mxu2 }
 0x2fe   : > { %v1378_v36 = vpop.f32.mrf.mxu3  ;;  %v1065_v40 = vpop.permute.xlu0 %1064 }
 0x2ff   : > { %v4001_v7 = vadd.f32 %v1378_v36, %v1313_v31  ;;  %v1100_v8 = vsub.f32 %v3580_v25, %v1065_v40  ;;  %v1101_v41 = vsub.f32 %v3578_v23, %v1065_v40  ;;  %v1470_v23 = vpop.permute.xlu1 %1469  ;;  %v1191_v31 = vmul.f32 %v3995_v12, %v1175_v30 }
 0x300   : > { %v1515_v47 = vmul.f32 0.0, %v1470_v23  ;;  %v1181_v23 = vld [vmem:[#allocation4 + $0x68] sm:$0xff] }
 0x301   : > { %v1160_v38 = vmul.f32 1.442695, %v1100_v8  ;;  %v1162_v35 = vmul.f32 1.442695, %v1101_v41  ;;  %v1516_v8 = vmul.f32 0.0, %v1475_v53 }
 0x303   : > { %2894 = vpow2.f32 %v1160_v38  ;;  %1479 = vperm.xlu0 %2804, %v2891_v60   ;;  %v1178_v38 = vld [vmem:[#allocation4 + $0x50] sm:$0xff] }
 0x304   : > { %2896 = vpow2.f32 %v1162_v35  ;;  %v1194_v35 = vmul.f32 %v2891_v60, %v1178_v38  ;;  %v1197_v60 = vmul.f32 %v4005_v58, %v1181_v23  ;;  %v1176_v23 = vld [vmem:[#allocation4 + $0x40] sm:$0xff] }
 0x305   : > { %v1316_v52 = vpop.f32.mrf.mxu2 }
 0x306   : > { %v1381_v56 = vpop.f32.mrf.mxu3 }
 0x307   : > { %v1382_v32 = vadd.f32 %v1381_v56, %v1316_v52  ;;  %v1485_v25 = vpop.permute.xlu1 %1484 }
 0x309   : > { %v2895_v5 = vpop.eup %2894  ;;  %v1529_v21 = vadd.f32 %v1513_v57, %v1382_v32 }
 0x30a   : > { %v2897_v6 = vpop.eup %2896  ;;  %1339 = vmatmul.f32.gmra.mxu2 %v2895_v5 }
 0x30b   : > { %1545 = vst [vmem:[#allocation2 + $0x8] sm:$0xff] %v1529_v21  ;;  %1404 = vmatmul.f32.gmra.mxu3 %v2897_v6  ;;  %1494 = vperm.xlu0 %2804, %v4005_v58   ;;  %v1242_v37 = vadd.f32 %v2897_v6, %v2895_v5  ;;  %v1490_v58 = vpop.permute.xlu2 %1489 }
 0x30d   : > { %v4016_v9 = vpop.f32.mrf.mxu2 }
 0x30e   : > { %v4018_v43 = vpop.f32.mrf.mxu3 }
 0x30f   : > { %1207 = vadd.xlane.f32.xlu2 %v3774_v63  ;;  %v4013_v2 = vpop.permute.xlu1 %1499 }
 0x317   : > { %1216 = vadd.xlane.f32.xlu2 %v3842_v54 }
 0x31f   : > { %1225 = vadd.xlane.f32.xlu2 %v3938_v62  ;;  %v1172_v62 = vld [vmem:[#allocation4 + $0x20] sm:$0xff] }
 0x320   : > { %v1188_v45 = vmul.f32 %v3883_v13, %v1172_v62 }
 0x327   : > { %1234 = vadd.xlane.f32.xlu2 %v1233_v42 }
 0x32f   : > { %1243 = vadd.xlane.f32.xlu2 %v1242_v37 }
 0x334   : > { %v1205_v63 = vpop.xlane.xlu1 %1204 }
 0x335   : > { %v1249_v54 = vadd.f32 %v1205_v63, %v1185_v26  ;;  %1201 = vadd.xlane.f32.xlu0 %v4837_v27  ;;  %v1518_v26 = vmul.f32 0.0, %v1485_v25  ;;  %v1519_v25 = vmul.f32 0.0, %v1490_v58 }
 0x337   : > { %1266 = vst.msk [vmem:[#allocation4 + $0x8] sm:$0xff] %vm468_vm9, %v1249_v54 }
 0x33c   : > { %v1322_v34 = vpop.f32.mrf.mxu2  ;;  %v1214_v14 = vpop.xlane.xlu1 %1213 }
 0x33d   : > { %v1387_v16 = vpop.f32.mrf.mxu3  ;;  %v1252_v51 = vadd.f32 %v1214_v14, %v1188_v45  ;;  %1210 = vadd.xlane.f32.xlu0 %v3786_v3 }
 0x33e   : > { %v1388_v24 = vadd.f32 %v1387_v16, %v1322_v34 }
 0x33f   : > { %1269 = vst.msk [vmem:[#allocation4 + $0x20] sm:$0xff] %vm468_vm9, %v1252_v51 }
 0x340   : > { %v1531_v10 = vadd.f32 %v1515_v47, %v1388_v24 }
 0x342   : > { %1547 = vst [vmem:[#allocation2 + $0x40] sm:$0xff] %v1531_v10 }
 0x344   : > { %v1223_v50 = vpop.xlane.xlu1 %1222  ;;  %v1325_v36 = vpop.f32.mrf.mxu2 }
 0x345   : > { %v1255_v40 = vadd.f32 %v1223_v50, %v1191_v31  ;;  %v1390_v13 = vpop.f32.mrf.mxu3  ;;  %1219 = vadd.xlane.f32.xlu0 %v3863_v59  ;;  %v1385_v31 = vadd.f32 %v4018_v43, %v4016_v9 }
 0x346   : > { %v1391_v41 = vadd.f32 %v1390_v13, %v1325_v36 }
 0x347   : > { %1272 = vst.msk [vmem:[#allocation4 + $0x38] sm:$0xff] %vm468_vm9, %v1255_v40 }
 0x348   : > { %v1532_v3 = vadd.f32 %v1516_v8, %v1391_v41 }
 0x34a   : > { %1548 = vst [vmem:[#allocation2 + $0x20] sm:$0xff] %v1532_v3  ;;  %v4041_v3 = vpop.permute.xlu2 %1504 }
 0x34c   : > { %v1328_v52 = vpop.f32.mrf.mxu2  ;;  %v1232_v56 = vpop.xlane.xlu1 %1231 }
 0x34d   : > { %v1393_v12 = vpop.f32.mrf.mxu3  ;;  %v1258_v57 = vadd.f32 %v1232_v56, %v1194_v35  ;;  %v1070_v32 = vpop.permute.xlu0 %1069  ;;  %1228 = vadd.xlane.f32.xlu0 %v1227_v44  ;;  %v1170_v56 = vld [vmem:[#allocation4 + $0x10] sm:$0xff] }
 0x34e   : > { %v1102_v5 = vsub.f32 %v4800_v46, %v1070_v32  ;;  %v1103_v59 = vsub.f32 %v4799_v15, %v1070_v32  ;;  %v1394_v13 = vadd.f32 %v1393_v12, %v1328_v52  ;;  %v1186_v32 = vmul.f32 %v3865_v48, %v1170_v56  ;;  %v1173_v52 = vld [vmem:[#allocation4 + $0x28] sm:$0xff] }
 0x34f   : > { %1275 = vst.msk [vmem:[#allocation4 + $0x50] sm:$0xff] %vm468_vm9, %v1258_v57  ;;  %v1189_v12 = vmul.f32 %v3989_v0, %v1173_v52  ;;  %v1192_v48 = vmul.f32 %v3921_v22, %v1176_v23 }
 0x350   : > { %v1164_v21 = vmul.f32 1.442695, %v1102_v5  ;;  %v1166_v6 = vmul.f32 1.442695, %v1103_v59 }
 0x352   : > { %2898 = vpow2.f32 %v1164_v21 }
 0x353   : > { %2900 = vpow2.f32 %v1166_v6 }
 0x354   : > { %v1241_v20 = vpop.xlane.xlu1 %1240  ;;  %v1331_v49 = vpop.f32.mrf.mxu2 }
 0x355   : > { %v1261_v42 = vadd.f32 %v1241_v20, %v1197_v60  ;;  %v1396_v37 = vpop.f32.mrf.mxu3  ;;  %1237 = vadd.xlane.f32.xlu0 %v3951_v55  ;;  %v1430_v11 = vpop.permute.xlu0 %1429  ;;  %v1521_v60 = vmul.f32 0.0, %v4013_v2 }
 0x356   : > { %v1397_v46 = vadd.f32 %v1396_v37, %v1331_v49  ;;  %v1507_v63 = vmul.f32 0.0, %v1430_v11  ;;  %v1179_v11 = vld [vmem:[#allocation4 + $0x58] sm:$0xff] }
 0x357   : > { %1278 = vst.msk [vmem:[#allocation4 + $0x68] sm:$0xff] %vm468_vm9, %v1261_v42  ;;  %v1195_v0 = vmul.f32 %v3925_v28, %v1179_v11 }
 0x358   : > { %v2899_v15 = vpop.eup %2898  ;;  %v1534_v54 = vadd.f32 %v1518_v26, %v1397_v46  ;;  %v1523_v27 = vadd.f32 %v1507_v63, %v3963_v29  ;;  %v1182_v63 = vld [vmem:[#allocation4 + $0x70] sm:$0xff] }
 0x359   : > { %v2901_v62 = vpop.eup %2900  ;;  %1342 = vmatmul.f32.gmra.mxu2 %v2899_v15 }
 0x35a   : > { %1550 = vst [vmem:[#allocation2 + $0x38] sm:$0xff] %v1534_v54  ;;  %1407 = vmatmul.f32.gmra.mxu3 %v2901_v62  ;;  %v1245_v45 = vadd.f32 %v2901_v62, %v2899_v15  ;;  %v1198_v15 = vmul.f32 %v3928_v19, %v1182_v63 }
 0x35b   : > { %1539 = vst [vmem:[#allocation2 + $0x30] sm:$0xff] %v1523_v27  ;;  %v1168_v27 = vld [vmem:[#allocation4] sm:$0xff] }
 0x35c   : > { %v1334_v34 = vpop.f32.mrf.mxu2  ;;  %v1184_v22 = vmul.f32 %v3972_v17, %v1168_v27 }
 0x35d   : > { %v1399_v14 = vpop.f32.mrf.mxu3  ;;  %1246 = vadd.xlane.f32.xlu0 %v1245_v45  ;;  %v1445_v55 = vpop.permute.xlu0 %1444  ;;  %v1171_v45 = vld [vmem:[#allocation4 + $0x18] sm:$0xff] }
 0x35e   : > { %v1400_v16 = vadd.f32 %v1399_v14, %v1334_v34  ;;  %v1510_v51 = vmul.f32 0.0, %v1445_v55  ;;  %v1187_v28 = vmul.f32 %v3981_v4, %v1171_v45  ;;  %v1174_v55 = vld [vmem:[#allocation4 + $0x30] sm:$0xff] }
 0x35f   : > { %v1190_v19 = vmul.f32 %v3893_v61, %v1174_v55 }
 0x360   : > { %v1535_v47 = vadd.f32 %v1519_v25, %v1400_v16  ;;  %v1526_v24 = vadd.f32 %v1510_v51, %v3984_v33  ;;  %v1177_v51 = vld [vmem:[#allocation4 + $0x48] sm:$0xff] }
 0x361   : > { %v1193_v17 = vmul.f32 %v3900_v39, %v1177_v51 }
 0x362   : > { %1551 = vst [vmem:[#allocation2 + $0x60] sm:$0xff] %v1535_v47 }
 0x363   : > { %1542 = vst [vmem:[#allocation2 + $0x18] sm:$0xff] %v1526_v24 }
 0x364   : > { %v1337_v33 = vpop.f32.mrf.mxu2 }
 0x365   : > { %v1455_v29 = vpop.permute.xlu0 %1454  ;;  %v1402_v38 = vpop.f32.mrf.mxu3 }
 0x366   : > { %v1512_v10 = vmul.f32 0.0, %v1455_v29  ;;  %v1403_v44 = vadd.f32 %v1402_v38, %v1337_v33  ;;  %v1180_v29 = vld [vmem:[#allocation4 + $0x60] sm:$0xff] }
 0x367   : > { %v1196_v4 = vmul.f32 %v3907_v1, %v1180_v29 }
 0x368   : > { %v1528_v30 = vadd.f32 %v1512_v10, %v4001_v7 }
 0x36a   : > { %1544 = vst [vmem:[#allocation2 + $0x68] sm:$0xff] %v1528_v30 }
 0x36d   : > { %v1465_v53 = vpop.permute.xlu0 %1464 }
 0x36e   : > { %v1514_v50 = vmul.f32 0.0, %v1465_v53  ;;  %v1183_v53 = vld [vmem:[#allocation4 + $0x78] sm:$0xff] }
 0x36f   : > { %v1199_v61 = vmul.f32 %v3975_v18, %v1183_v53 }
 0x370   : > { %v1530_v36 = vadd.f32 %v1514_v50, %v1385_v31 }
 0x372   : > { %1546 = vst [vmem:[#allocation2 + $0x48] sm:$0xff] %v1530_v36 }
 0x375   : > { %v1480_v40 = vpop.permute.xlu0 %1479 }
 0x376   : > { %v1517_v8 = vmul.f32 0.0, %v1480_v40  ;;  %v1522_v40 = vmul.f32 0.0, %v4041_v3 }
 0x378   : > { %v1533_v41 = vadd.f32 %v1517_v8, %v1394_v13 }
 0x37a   : > { %1549 = vst [vmem:[#allocation2 + $0x10] sm:$0xff] %v1533_v41 }
 0x37d   : > { %v1495_v35 = vpop.permute.xlu0 %1494 }
 0x37e   : > { %v1520_v7 = vmul.f32 0.0, %v1495_v35 }
 0x380   : > { %v1536_v57 = vadd.f32 %v1520_v7, %v1403_v44 }
 0x382   : > { %1552 = vst [vmem:[#allocation2 + $0x70] sm:$0xff] %v1536_v57  ;;  %v1208_v9 = vpop.xlane.xlu2 %1207 }
 0x383   : > { %v1250_v43 = vadd.f32 %v1208_v9, %v1186_v32 }
 0x385   : > { %1267 = vst.msk [vmem:[#allocation4 + $0x10] sm:$0xff] %vm468_vm9, %v1250_v43 }
 0x38a   : > { %v1217_v5 = vpop.xlane.xlu2 %1216 }
 0x38b   : > { %v1253_v59 = vadd.f32 %v1217_v5, %v1189_v12 }
 0x38d   : > { %1270 = vst.msk [vmem:[#allocation4 + $0x28] sm:$0xff] %vm468_vm9, %v1253_v59  ;;  %v1340_v21 = vpop.f32.mrf.mxu2 }
 0x38e   : > { %v1405_v6 = vpop.f32.mrf.mxu3 }
 0x38f   : > { %v1406_v20 = vadd.f32 %v1405_v6, %v1340_v21 }
 0x391   : > { %v1537_v49 = vadd.f32 %v1521_v60, %v1406_v20 }
 0x392   : > { %v1226_v42 = vpop.xlane.xlu2 %1225 }
 0x393   : > { %1553 = vst [vmem:[#allocation2 + $0x78] sm:$0xff] %v1537_v49  ;;  %v1256_v37 = vadd.f32 %v1226_v42, %v1192_v48 }
 0x395   : > { %1273 = vst.msk [vmem:[#allocation4 + $0x40] sm:$0xff] %vm468_vm9, %v1256_v37 }
 0x39a   : > { %v1235_v26 = vpop.xlane.xlu2 %1234 }
 0x39b   : > { %v1259_v46 = vadd.f32 %v1235_v26, %v1195_v0 }
 0x39d   : > { %1276 = vst.msk [vmem:[#allocation4 + $0x58] sm:$0xff] %vm468_vm9, %v1259_v46 }
 0x3a2   : > { %v1244_v2 = vpop.xlane.xlu2 %1243 }
 0x3a3   : > { %v1262_v54 = vadd.f32 %v1244_v2, %v1198_v15 }
 0x3a5   : > { %1279 = vst.msk [vmem:[#allocation4 + $0x70] sm:$0xff] %vm468_vm9, %v1262_v54 }
 0x3a8   : > { %v1202_v62 = vpop.xlane.xlu0 %1201 }
 0x3a9   : > { %v1248_v58 = vadd.f32 %v1202_v62, %v1184_v22 }
 0x3ab   : > { %1265 = vst.msk [vmem:[#allocation4] sm:$0xff] %vm468_vm9, %v1248_v58 }
 0x3b0   : > { %v1211_v34 = vpop.xlane.xlu0 %1210 }
 0x3b1   : > { %v1251_v14 = vadd.f32 %v1211_v34, %v1187_v28 }
 0x3b3   : > { %1268 = vst.msk [vmem:[#allocation4 + $0x18] sm:$0xff] %vm468_vm9, %v1251_v14 }
 0x3b8   : > { %v1220_v25 = vpop.xlane.xlu0 %1219 }
 0x3b9   : > { %v1254_v16 = vadd.f32 %v1220_v25, %v1190_v19 }
 0x3bb   : > { %1271 = vst.msk [vmem:[#allocation4 + $0x30] sm:$0xff] %vm468_vm9, %v1254_v16 }
 0x3c0   : > { %v1229_v47 = vpop.xlane.xlu0 %1228 }
 0x3c1   : > { %v1257_v24 = vadd.f32 %v1229_v47, %v1193_v17 }
 0x3c3   : > { %1274 = vst.msk [vmem:[#allocation4 + $0x48] sm:$0xff] %vm468_vm9, %v1257_v24 }
 0x3c8   : > { %v1238_v10 = vpop.xlane.xlu0 %1237 }
 0x3c9   : > { %v1260_v30 = vadd.f32 %v1238_v10, %v1196_v4 }
 0x3cb   : > { %1277 = vst.msk [vmem:[#allocation4 + $0x60] sm:$0xff] %vm468_vm9, %v1260_v30 }
 0x3d0   : > { %v1247_v31 = vpop.xlane.xlu0 %1246 }
 0x3d1   : > { %v1263_v50 = vadd.f32 %v1247_v31, %v1199_v61 }
 0x3d3   : > { %1280 = vst.msk [vmem:[#allocation4 + $0x78] sm:$0xff] %vm468_vm9, %v1263_v50 }
 0x3dc   : > { %v1343_v36 = vpop.f32.mrf.mxu2 }
 0x3dd   : > { %v1408_v39 = vpop.f32.mrf.mxu3 }
 0x3de   : > { %v1409_v13 = vadd.f32 %v1408_v39, %v1343_v36 }
 0x3e0   : > { %v1538_v8 = vadd.f32 %v1522_v40, %v1409_v13 }
 0x3e2   : > { %1554 = vst [vmem:[#allocation2 + $0x28] sm:$0xff] %v1538_v8 }
 0x3e3 PF: > { %p2659_p0 = scmp.ne.s32.totalorder %s3147_s30, 1 }
 0x3e5   : > { %1574 = sbr.rel (%p2659_p0) target bundleno = 1782 (0x6f6), region = 64 }
 0x3ea   : > { %v4838_v1 = vld [vmem:[#allocation10_spill] sm:$0xff]  ;;  %s4839_s1 = sld [smem:[#allocation50_spill]]  ;;  %vm1798_vm10 = vcmask 31744   ;;  %v3171_v52 = vmov 0   ;;  %v1609_v5 = vld [vmem:[#allocation4 + $0x70] sm:$0xff]  ;;  %v1608_v59 = vld [vmem:[#allocation4 + $0x68] sm:$0xff] }
 0x3eb   : > { %1795 = vst [vmem:[#allocation1] ss:$2 sm:$0xff] %v4838_v1  ;;  %v1610_v9 = vld [vmem:[#allocation4 + $0x78] sm:$0xff]  ;;  %2902 = vset.pattern.permute.xlu0 %v3171_v52  ;;  %2903 = vset.pattern.permute.xlu1 %v3171_v52  ;;  %v1607_v60 = vld [vmem:[#allocation4 + $0x60] sm:$0xff]  ;;  %v1604_v48 = vld [vmem:[#allocation4 + $0x48] sm:$0xff]  ;;  %s4847_s3 = sld [smem:[#allocation52_spill]] }
 0x3ec   : > { %2905 = vrcp.f32 %v1610_v9  ;;  %2904 = vset.pattern.permute.xlu2 %v3171_v52  ;;  %v1603_v37 = vld [vmem:[#allocation4 + $0x40] sm:$0xff]  ;;  %v1606_v46 = vld [vmem:[#allocation4 + $0x58] sm:$0xff]  ;;  %v1601_v63 = vld [vmem:[#allocation4 + $0x30] sm:$0xff] }
 0x3ed   : > { %2907 = vrcp.f32 %v1609_v5  ;;  %v1600_v15 = vld [vmem:[#allocation4 + $0x28] sm:$0xff]  ;;  %v1605_v22 = vld [vmem:[#allocation4 + $0x50] sm:$0xff]  ;;  %v1598_v58 = vld [vmem:[#allocation4 + $0x18] sm:$0xff] }
 0x3ee   : > { %2909 = vrcp.f32 %v1608_v59  ;;  %v1597_v34 = vld [vmem:[#allocation4 + $0x10] sm:$0xff]  ;;  %v1602_v55 = vld [vmem:[#allocation4 + $0x38] sm:$0xff]  ;;  %v1595_v25 = vld [vmem:[#allocation4] sm:$0xff] }
 0x3ef   : > { %2911 = vrcp.f32 %v1607_v60  ;;  %v1599_v17 = vld [vmem:[#allocation4 + $0x20] sm:$0xff]  ;;  %v2362_v24 = vld [vmem:[%s4709_s4] sm:$0xf]  ;;  %v1596_v29 = vld [vmem:[#allocation4 + $0x8] sm:$0xff] }
 0x3f0   : > { %v1778_v18 = vld [vmem:[%s4839_s1] sm:$0xff]  ;;  %v4075_v41 = vld [vmem:[%s4839_s1 + $0x68] sm:$0xff]  ;;  %v4089_v35 = vld [vmem:[%s4839_s1 + $0x70] sm:$0xff]  ;;  %2913 = vrcp.f32 %v1604_v48 }
 0x3f1   : > { %v1779_v38 = vld [vmem:[%s4839_s1 + $0x8] sm:$0xff]  ;;  %v1780_v44 = vld [vmem:[%s4839_s1 + $0x10] sm:$0xff]  ;;  %v4100_v7 = vld [vmem:[%s4839_s1 + $0x78] sm:$0xff]  ;;  %2915 = vrcp.f32 %v1603_v37 }
 0x3f2   : > { %v1796_v3 = vld.sshfl [vmem:[#allocation1] sm:$0xff pattern:$0x75316420]  ;;  %v1797_v33 = vld.sshfl [vmem:[#allocation1 + $0x8] sm:$0xff pattern:$0x75316420]  ;;  %v2906_v43 = vpop.eup %2905  ;;  %2917 = vrcp.f32 %v1606_v46 }
 0x3f3   : > { %2660 = vmatpush.msk.msra.mxu1 %vm352_vm0, %v1796_v3  ;;  %2701 = vmatpush.msk.msra.mxu2 %vm352_vm0, %v1796_v3  ;;  %v1781_v56 = vld [vmem:[%s4839_s1 + $0x18] sm:$0xff]  ;;  %v1782_v57 = vld [vmem:[%s4839_s1 + $0x20] sm:$0xff]  ;;  %v1783_v32 = vld [vmem:[%s4839_s1 + $0x28] sm:$0xff]  ;;  %v2908_v21 = vpop.eup %2907  ;;  %2919 = vrcp.f32 %v1601_v63 }
 0x3f4   : > { %2661 = vmatmul.msk.f32.vlgmr.msra.gmra.mxu1 %vm1798_vm10, %v1778_v18  ;;  %2674 = vmatmul.msk.f32.vlgmr.msra.gmra.mxu2 %vm1798_vm10, %v4075_v41  ;;  %v1784_v12 = vld [vmem:[%s4839_s1 + $0x30] sm:$0xff]  ;;  %v2910_v6 = vpop.eup %2909  ;;  %v1785_v23 = vld [vmem:[%s4839_s1 + $0x38] sm:$0xff]  ;;  %v1786_v49 = vld [vmem:[%s4839_s1 + $0x40] sm:$0xff]  ;;  %2921 = vrcp.f32 %v1600_v15 }
 0x3f5   : > { %2677 = vmatpush.msk.msrb.mxu2 %vm352_vm0, %v1797_v33  ;;  %1704 = vperm.xlu0 %2902, %v2906_v43   ;;  %v2912_v20 = vpop.eup %2911  ;;  %v1787_v42 = vld [vmem:[%s4839_s1 + $0x48] sm:$0xff]  ;;  %v1788_v26 = vld [vmem:[%s4839_s1 + $0x50] sm:$0xff]  ;;  %v1789_v27 = vld [vmem:[%s4839_s1 + $0x58] sm:$0xff]  ;;  %2923 = vrcp.f32 %v1605_v22 }
 0x3f6   : > { %1694 = vperm.xlu1 %2903, %v2910_v6   ;;  %v2914_v11 = vpop.eup %2913  ;;  %2925 = vrcp.f32 %v1598_v58  ;;  %v1790_v28 = vld [vmem:[%s4839_s1 + $0x60] sm:$0xff]  ;;  %v4195_v33 = vld [vmem:[%s4712_s7 + $0x78] sm:$0xff]  ;;  %v4211_v5 = vld [vmem:[%s4712_s7 + $0x68] sm:$0xff] }
 0x3f7   : > { %v2916_v0 = vpop.eup %2915  ;;  %2927 = vrcp.f32 %v1597_v34  ;;  %v2468_v36 = vld [vmem:[%s4711_s6] sm:$0xf]  ;;  %v1592_v43 = vld [vmem:[#allocation2 + $0x70] sm:$0xff]  ;;  %v1588_v58 = vld [vmem:[#allocation2 + $0x20] sm:$0xff] }
 0x3f8   : > { %v2918_v2 = vpop.eup %2917  ;;  %2929 = vrcp.f32 %v1602_v55  ;;  %v4219_v48 = vld [vmem:[%s4712_s7 + $0x60] sm:$0xff]  ;;  %v1589_v63 = vld [vmem:[#allocation2 + $0x10] sm:$0xff]  ;;  %v4245_v34 = vld [vmem:[%s4712_s7 + $0x48] sm:$0xff] }
 0x3f9   : > { %v2920_v54 = vpop.eup %2919  ;;  %1684 = vperm.xlu2 %2904, %v2918_v2   ;;  %2931 = vrcp.f32 %v1595_v25  ;;  %v1587_v25 = vld [vmem:[#allocation2 + $0x40] sm:$0xff] }
 0x3fa   : > { %v2922_v62 = vpop.eup %2921  ;;  %2933 = vrcp.f32 %v1599_v17 }
 0x3fb   : > { %v2924_v45 = vpop.eup %2923  ;;  %2935 = vrcp.f32 %v1596_v29  ;;  %v1586_v29 = vld [vmem:[#allocation2 + $0x48] sm:$0xff] }
 0x3fc   : > { %2662 = vmatmul.msk.f32.gmra.mxu1 %vm1798_vm10, %v1779_v38  ;;  %2675 = vmatmul.msk.f32.gmra.mxu2 %vm1798_vm10, %v4089_v35  ;;  %v2926_v14 = vpop.eup %2925 }
 0x3fd   : > { %1699 = vperm.xlu0 %2902, %v2908_v21   ;;  %v2928_v19 = vpop.eup %2927  ;;  %v1591_v21 = vld [vmem:[#allocation2 + $0x60] sm:$0xff] }
 0x3fe   : > { %1689 = vperm.xlu1 %2903, %v2912_v20   ;;  %v2930_v16 = vpop.eup %2929 }
 0x3ff   : > { %v2932_v51 = vpop.eup %2931 }
 0x400   : > { %v2934_v47 = vpop.eup %2933 }
 0x401   : > { %1679 = vperm.xlu2 %2904, %v2924_v45   ;;  %v2936_v10 = vpop.eup %2935 }
 0x404   : > { %2663 = vmatmul.msk.f32.gmra.mxu1 %vm1798_vm10, %v1780_v44  ;;  %2676 = vmatmul.msk.f32.gmra.mxu2 %vm1798_vm10, %v4100_v7 }
 0x405   : > { %1674 = vperm.xlu0 %2902, %v2914_v11  }
 0x406   : > { %1669 = vperm.xlu1 %2903, %v2916_v0   ;;  %v4227_v0 = vld [vmem:[%s4712_s7 + $0x58] sm:$0xff] }
 0x409   : > { %1664 = vperm.xlu2 %2904, %v2930_v16  }
 0x40c   : > { %2664 = vmatmul.msk.f32.gmra.mxu1 %vm1798_vm10, %v1781_v56  ;;  %2678 = vmatmul.msk.f32.vlgmr.msrb.gmra.mxu2 %vm1798_vm10, %v1778_v18  ;;  %v1594_v18 = vld [vmem:[#allocation2 + $0x28] sm:$0xff] }
 0x40d   : > { %1659 = vperm.xlu0 %2902, %v2920_v54  }
 0x40e   : > { %1654 = vperm.xlu1 %2903, %v2922_v62  }
 0x411   : > { %1649 = vperm.xlu2 %2904, %v2934_v47  }
 0x414   : > { %2665 = vmatmul.msk.f32.gmra.mxu1 %vm1798_vm10, %v1782_v57  ;;  %2679 = vmatmul.msk.f32.gmra.mxu2 %vm1798_vm10, %v1779_v38 }
 0x415   : > { %1644 = vperm.xlu0 %2902, %v2926_v14  }
 0x416   : > { %1639 = vperm.xlu1 %2903, %v2928_v19  }
 0x419   : > { %1634 = vperm.xlu2 %2904, %v2936_v10  }
 0x41c   : > { %2666 = vmatmul.msk.f32.gmra.mxu1 %vm1798_vm10, %v1783_v32  ;;  %2680 = vmatmul.msk.f32.gmra.mxu2 %vm1798_vm10, %v1780_v44  ;;  %v1593_v44 = vld [vmem:[#allocation2 + $0x78] sm:$0xff] }
 0x41d   : > { %1629 = vperm.xlu0 %2902, %v2932_v51   ;;  %v4253_v51 = vld [vmem:[%s4712_s7 + $0x40] sm:$0xff] }
 0x41e   : > { %2365 = vperm.xlu1 %2903, %v2362_v24  }
 0x421   : > { %2471 = vperm.xlu2 %2904, %v2468_v36  }
 0x424   : > { %2667 = vmatmul.msk.f32.gmra.mxu1 %vm1798_vm10, %v1784_v12  ;;  %2681 = vmatmul.msk.f32.gmra.mxu2 %vm1798_vm10, %v1781_v56 }
 0x42c   : > { %2668 = vmatmul.msk.f32.gmra.mxu1 %vm1798_vm10, %v1785_v23  ;;  %2682 = vmatmul.msk.f32.gmra.mxu2 %vm1798_vm10, %v1782_v57  ;;  %v4201_v57 = vld [vmem:[%s4712_s7 + $0x70] sm:$0xff] }
 0x434   : > { %2669 = vmatmul.msk.f32.gmra.mxu1 %vm1798_vm10, %v1786_v49  ;;  %2683 = vmatmul.msk.f32.gmra.mxu2 %vm1798_vm10, %v1783_v32 }
 0x43c   : > { %2670 = vmatmul.msk.f32.gmra.mxu1 %vm1798_vm10, %v1787_v42  ;;  %2684 = vmatmul.msk.f32.gmra.mxu2 %vm1798_vm10, %v1784_v12 }
 0x444   : > { %2671 = vmatmul.msk.f32.gmra.mxu1 %vm1798_vm10, %v1788_v26  ;;  %2685 = vmatmul.msk.f32.gmra.mxu2 %vm1798_vm10, %v1785_v23 }
 0x44c   : > { %2672 = vmatmul.msk.f32.gmra.mxu1 %vm1798_vm10, %v1789_v27  ;;  %2686 = vmatmul.msk.f32.gmra.mxu2 %vm1798_vm10, %v1786_v49  ;;  %v1590_v49 = vld [vmem:[#allocation2 + $0x38] sm:$0xff] }
 0x453   : > { %v1685_v23 = vpop.permute.xlu2 %1684 }
 0x454   : > { %2673 = vmatmul.msk.f32.gmra.mxu1 %vm1798_vm10, %v1790_v28  ;;  %2687 = vmatmul.msk.f32.gmra.mxu2 %vm1798_vm10, %v1787_v42  ;;  %v1718_v11 = vmul.f32 %v1685_v23, %v1590_v49 }
 0x45b   : > { %v1680_v46 = vpop.permute.xlu2 %1679 }
 0x45c   : > { %2688 = vmatmul.msk.f32.gmra.mxu2 %vm1798_vm10, %v1788_v26  ;;  %v1750_v26 = vmul.f32 %v4227_v0, %v1718_v11  ;;  %v1717_v2 = vmul.f32 %v1680_v46, %v1589_v63  ;;  %v1584_v11 = vld [vmem:[#allocation2 + $0x68] sm:$0xff] }
 0x463   : > { %v1665_v24 = vpop.permute.xlu2 %1664 }
 0x464   : > { %2689 = vmatmul.msk.f32.gmra.mxu2 %vm1798_vm10, %v1789_v27  ;;  %v4237_v27 = vld [vmem:[%s4712_s7 + $0x50] sm:$0xff]  ;;  %v1714_v36 = vmul.f32 %v1665_v24, %v1586_v29  ;;  %v4302_v29 = vld [vmem:[%s4712_s7 + $0x20] sm:$0xff] }
 0x465   : > { %v1749_v22 = vmul.f32 %v4237_v27, %v1717_v2 }
 0x467   : > { %v1705_v8 = vpop.permute.xlu0 %1704 }
 0x468   : > { %v1695_v56 = vpop.permute.xlu1 %1694 }
 0x469   : > { %v1720_v52 = vmul.f32 %v1695_v56, %v1592_v43 }
 0x46b   : > { %v1752_v59 = vmul.f32 %v4211_v5, %v1720_v52 }
 0x46c   : > { %2690 = vmatmul.msk.f32.gmra.mxu2 %vm1798_vm10, %v1790_v28 }
 0x470   : > { %v1690_v6 = vpop.permute.xlu1 %1689 }
 0x471   : > { %v4161_v4 = vpop.f32.mrf.mxu1  ;;  %v1719_v60 = vmul.f32 %v1690_v6, %v1591_v21  ;;  %v4281_v6 = vld [vmem:[%s4712_s7 + $0x30] sm:$0xff] }
 0x473   : > { %v1751_v42 = vmul.f32 %v4219_v48, %v1719_v60 }
 0x474   : > { %2691 = vmatmul.msk.f32.gmra.mxu2 %vm1798_vm10, %v4075_v41  ;;  %v1722_v41 = vmul.f32 %v1705_v8, %v1594_v18  ;;  %v4265_v18 = vld [vmem:[%s4712_s7 + $0x38] sm:$0xff] }
 0x476   : > { %v1754_v38 = vmul.f32 %v4195_v33, %v1722_v41  ;;  %v1746_v41 = vmul.f32 %v4265_v18, %v1714_v36 }
 0x477   : > { %v4165_v30 = vpop.f32.mrf.mxu2 }
 0x478   : > { %1756 = vmatpush.xpose.msra.mxu0 %v1754_v38  ;;  %v1670_v19 = vpop.permute.xlu1 %1669 }
 0x479   : > { %v4167_v53 = vpop.f32.mrf.mxu1  ;;  %v1715_v16 = vmul.f32 %v1670_v19, %v1587_v25  ;;  %v1650_v19 = vpop.permute.xlu2 %1649  ;;  %v1583_v25 = vld [vmem:[#allocation2 + $0x50] sm:$0xff] }
 0x47b   : > { %v1747_v47 = vmul.f32 %v4253_v51, %v1715_v16  ;;  %v1711_v16 = vmul.f32 %v1650_v19, %v1583_v25  ;;  %v4324_v19 = vld [vmem:[%s4712_s7 + $0x8] sm:$0xff] }
 0x47c   : > { %2692 = vmatmul.msk.f32.gmra.mxu2 %vm1798_vm10, %v4089_v35  ;;  %v1700_v35 = vpop.permute.xlu0 %1699 }
 0x47d   : > { %v1743_v36 = vmul.f32 %v4302_v29, %v1711_v16 }
 0x47f   : > { %v4171_v61 = vpop.f32.mrf.mxu2 }
 0x481   : > { %v4173_v31 = vpop.f32.mrf.mxu1 }
 0x484   : > { %2693 = vmatmul.msk.f32.gmra.mxu2 %vm1798_vm10, %v4100_v7  ;;  %v1721_v7 = vmul.f32 %v1700_v35, %v1593_v44  ;;  %v1675_v62 = vpop.permute.xlu0 %1674  ;;  %v1585_v44 = vld [vmem:[#allocation2 + $0x8] sm:$0xff] }
 0x485   : > { %v1716_v45 = vmul.f32 %v1675_v62, %v1588_v58  ;;  %v4294_v62 = vld [vmem:[%s4712_s7 + $0x28] sm:$0xff] }
 0x486   : > { %v1753_v32 = vmul.f32 %v4201_v57, %v1721_v7 }
 0x487   : > { %v4177_v50 = vpop.f32.mrf.mxu2  ;;  %v1748_v55 = vmul.f32 %v4245_v34, %v1716_v45 }
 0x488   : > { %1757 = vmatpush.xpose.msra.mxu0 %v1753_v32  ;;  %v1981_v32 = vmax.f32 %v4161_v4, %v4173_v31 }
 0x489   : > { %v4182_v39 = vpop.f32.mrf.mxu1 }
 0x48a   : > { %v1982_v8 = vmax.f32 %v4167_v53, %v4182_v39 }
 0x48c   : > { %1758 = vmatpush.xpose.msra.mxu0 %v1752_v59  ;;  %v1660_v35 = vpop.permute.xlu0 %1659 }
 0x48d   : > { %v1713_v56 = vmul.f32 %v1660_v35, %v1585_v44 }
 0x48f   : > { %v4184_v40 = vpop.f32.mrf.mxu2  ;;  %v1745_v23 = vmul.f32 %v4281_v6, %v1713_v56 }
 0x490   : > { %1759 = vmatpush.xpose.msra.mxu0 %v1751_v42  ;;  %v1655_v42 = vpop.permute.xlu1 %1654 }
 0x491   : > { %v4186_v13 = vpop.f32.mrf.mxu1 }
 0x492   : > { %v1983_v59 = vmax.f32 %v1981_v32, %v4186_v13  ;;  %v4310_v32 = vld [vmem:[%s4712_s7 + $0x18] sm:$0xff] }
 0x494   : > { %1760 = vmatpush.xpose.msra.mxu0 %v1750_v26  ;;  %v1712_v26 = vmul.f32 %v1655_v42, %v1584_v11  ;;  %v4316_v42 = vld [vmem:[%s4712_s7 + $0x10] sm:$0xff] }
 0x496   : > { %v1744_v45 = vmul.f32 %v4294_v62, %v1712_v26 }
 0x497   : > { %v4188_v1 = vpop.f32.mrf.mxu2 }
 0x498   : > { %1761 = vmatpush.xpose.msra.mxu0 %v1749_v22 }
 0x499   : > { %v4190_v3 = vpop.f32.mrf.mxu1 }
 0x49a   : > { %v1984_v38 = vmax.f32 %v1982_v8, %v4190_v3 }
 0x49c   : > { %1762 = vmatpush.xpose.msra.mxu0 %v1748_v55 }
 0x49f   : > { %v4204_v9 = vpop.f32.mrf.mxu2 }
 0x4a0   : > { %1763 = vmatpush.xpose.msra.mxu0 %v1747_v47 }
 0x4a1   : > { %v4206_v12 = vpop.f32.mrf.mxu1 }
 0x4a2   : > { %v1985_v60 = vmax.f32 %v1983_v59, %v4206_v12 }
 0x4a4   : > { %1764 = vmatpush.xpose.msra.mxu0 %v1746_v41  ;;  %v1645_v41 = vpop.permute.xlu0 %1644 }
 0x4a7   : > { %v4214_v20 = vpop.f32.mrf.mxu2 }
 0x4a8   : > { %1765 = vmatpush.xpose.msra.mxu0 %v1745_v23  ;;  %v1581_v23 = vld [vmem:[#allocation2 + $0x58] sm:$0xff] }
 0x4a9   : > { %v4222_v37 = vpop.f32.mrf.mxu1 }
 0x4aa   : > { %v1986_v43 = vmax.f32 %v1984_v38, %v4222_v37  ;;  %v1582_v38 = vld [vmem:[#allocation2 + $0x18] sm:$0xff] }
 0x4ab   : > { %v1710_v44 = vmul.f32 %v1645_v41, %v1582_v38  ;;  %v1579_v38 = vld [vmem:[#allocation2 + $0x30] sm:$0xff] }
 0x4ac   : > { %1766 = vmatpush.xpose.msra.mxu0 %v1744_v45  ;;  %v1630_v41 = vpop.permute.xlu0 %1629 }
 0x4af   : > { %v4230_v15 = vpop.f32.mrf.mxu2 }
 0x4b0   : > { %1767 = vmatpush.xpose.msra.mxu0 %v1743_v36 }
 0x4b1   : > { %v4232_v54 = vpop.f32.mrf.mxu1 }
 0x4b2   : > { %v1987_v46 = vmax.f32 %v1985_v60, %v4232_v54 }
 0x4b7   : > { %v4240_v28 = vpop.f32.mrf.mxu2 }
 0x4b9   : > { %v4247_v14 = vpop.f32.mrf.mxu1 }
 0x4ba   : > { %v1988_v21 = vmax.f32 %v1986_v43, %v4247_v14  ;;  %v1742_v43 = vmul.f32 %v4310_v32, %v1710_v44 }
 0x4bc   : > { %1768 = vmatpush.xpose.msra.mxu0 %v1742_v43 }
 0x4bf   : > { %v4255_v17 = vpop.f32.mrf.mxu2 }
 0x4c1   : > { %v4258_v10 = vpop.f32.mrf.mxu1 }
 0x4c2   : > { %v1989_v2 = vmax.f32 %v1987_v46, %v4258_v10  ;;  %v1635_v46 = vpop.permute.xlu2 %1634 }
 0x4c7   : > { %v4269_v7 = vpop.f32.mrf.mxu2 }
 0x4c9   : > { %v4274_v52 = vpop.f32.mrf.mxu1 }
 0x4ca   : > { %v1990_v49 = vmax.f32 %v1988_v21, %v4274_v52  ;;  %v1640_v21 = vpop.permute.xlu1 %1639 }
 0x4cb   : > { %v1709_v60 = vmul.f32 %v1640_v21, %v1581_v23 }
 0x4cc   : > { %v1992_v22 = vmax.f32 %v1990_v49, %v4165_v30 }
 0x4cd   : > { %v1741_v11 = vmul.f32 %v4316_v42, %v1709_v60 }
 0x4ce   : > { %v1994_v47 = vmax.f32 %v1992_v22, %v4177_v50 }
 0x4cf   : > { %v4287_v63 = vpop.f32.mrf.mxu2  ;;  %1769 = vmatpush.xpose.msra.mxu0 %v1741_v11 }
 0x4d1   : > { %v1904_v58 = vpop.f32.mrf.mxu1 }
 0x4d2   : > { %v1991_v55 = vmax.f32 %v1989_v2, %v1904_v58  ;;  %v1580_v2 = vld [vmem:[#allocation2] sm:$0xff] }
 0x4d3   : > { %v1708_v45 = vmul.f32 %v1635_v46, %v1580_v2 }
 0x4d4   : > { %v1993_v24 = vmax.f32 %v1991_v55, %v4171_v61 }
 0x4d5   : > { %v1740_v25 = vmul.f32 %v4324_v19, %v1708_v45 }
 0x4d6   : > { %v1995_v8 = vmax.f32 %v1993_v24, %v1994_v47 }
 0x4d7   : > { %v4305_v35 = vpop.f32.mrf.mxu2  ;;  %1770 = vmatpush.xpose.msra.mxu0 %v1740_v25 }
 0x4d8   : > { %v1996_v56 = vrot.slane %v1995_v8, 4 }
 0x4da   : > { %v1997_v59 = vmax.f32 %v1995_v8, %v1996_v56 }
 0x4dc   : > { %v1998_v49 = vrot.slane %v1997_v59, 2 }
 0x4de   : > { %v1999_v26 = vmax.f32 %v1997_v59, %v1998_v49 }
 0x4df   : > { %v4319_v22 = vpop.f32.mrf.mxu2 }
 0x4e0   : > { %v2000_v55 = vrot.slane %v1999_v26, 1 }
 0x4e2   : > { %v4327_v16 = vmax.f32 %v1999_v26, %v2000_v55 }
 0x4e4   : > { %v2053_v47 = vsub.f32 %v4177_v50, %v4327_v16  ;;  %v2051_v24 = vsub.f32 %v4171_v61, %v4327_v16  ;;  %v2049_v36 = vsub.f32 %v4165_v30, %v4327_v16  ;;  %v2047_v44 = vsub.f32 %v1904_v58, %v4327_v16  ;;  %v4343_v61 = vld [vmem:[%s4712_s7] sm:$0xff] }
 0x4e5   : > { %v2045_v21 = vsub.f32 %v4274_v52, %v4327_v16  ;;  %v1707_v50 = vmul.f32 %v1630_v41, %v1579_v38  ;;  %v2043_v23 = vsub.f32 %v4258_v10, %v4327_v16  ;;  %v2041_v60 = vsub.f32 %v4247_v14, %v4327_v16 }
 0x4e6   : > { %v2115_v8 = vmul.f32 1.442695, %v2053_v47  ;;  %v2111_v43 = vmul.f32 1.442695, %v2051_v24  ;;  %v2107_v59 = vmul.f32 1.442695, %v2049_v36  ;;  %v2039_v46 = vsub.f32 %v4232_v54, %v4327_v16 }
 0x4e7   : > { %v4336_v56 = vpop.f32.mrf.mxu2  ;;  %v2103_v30 = vmul.f32 1.442695, %v2047_v44  ;;  %v2099_v58 = vmul.f32 1.442695, %v2045_v21  ;;  %v1739_v49 = vmul.f32 %v4343_v61, %v1707_v50  ;;  %v2095_v26 = vmul.f32 1.442695, %v2043_v23 }
 0x4e8   : > { %2937 = vpow2.f32 %v2115_v8  ;;  %v2091_v2 = vmul.f32 1.442695, %v2041_v60  ;;  %v2037_v14 = vsub.f32 %v4222_v37, %v4327_v16  ;;  %v2087_v55 = vmul.f32 1.442695, %v2039_v46 }
 0x4e9   : > { %2939 = vpow2.f32 %v2111_v43  ;;  %1771 = vmatpush.xpose.msra.mxu0 %v1739_v49  ;;  %v2035_v25 = vsub.f32 %v4206_v12, %v4327_v16  ;;  %v2033_v24 = vsub.f32 %v4190_v3, %v4327_v16  ;;  %v2031_v12 = vsub.f32 %v4186_v13, %v4327_v16 }
 0x4ea   : > { %2941 = vpow2.f32 %v2107_v59  ;;  %v2083_v47 = vmul.f32 1.442695, %v2037_v14  ;;  %v2029_v3 = vsub.f32 %v4182_v39, %v4327_v16  ;;  %v2027_v59 = vsub.f32 %v4173_v31, %v4327_v16 }
 0x4eb   : > { %2943 = vpow2.f32 %v2103_v30  ;;  %v2079_v8 = vmul.f32 1.442695, %v2035_v25  ;;  %v2075_v38 = vmul.f32 1.442695, %v2033_v24  ;;  %v2071_v43 = vmul.f32 1.442695, %v2031_v12 }
 0x4ec   : > { %2945 = vpow2.f32 %v2099_v58  ;;  %v2002_v13 = vmax.f32 %v4184_v40, %v4204_v9  ;;  %v2003_v21 = vmax.f32 %v4188_v1, %v4214_v20  ;;  %v2067_v39 = vmul.f32 1.442695, %v2029_v3 }
 0x4ed   : > { %2947 = vpow2.f32 %v2095_v26  ;;  %v2025_v30 = vsub.f32 %v4167_v53, %v4327_v16  ;;  %v2063_v49 = vmul.f32 1.442695, %v2027_v59  ;;  %v2023_v26 = vsub.f32 %v4161_v4, %v4327_v16 }
 0x4ee   : > { %v4350_v11 = vpop.eup %2937  ;;  %2949 = vpow2.f32 %v2091_v2  ;;  %v2004_v23 = vmax.f32 %v2002_v13, %v4230_v15  ;;  %v2005_v58 = vmax.f32 %v2003_v21, %v4240_v28 }
 0x4ef   : > { %v4352_v52 = vpop.f32.mrf.mxu2  ;;  %2135 = vmatpush.msra.mxu3 %v4350_v11  ;;  %v4357_v10 = vpop.eup %2939  ;;  %2951 = vpow2.f32 %v2087_v55  ;;  %v2059_v14 = vmul.f32 1.442695, %v2025_v30  ;;  %v2055_v4 = vmul.f32 1.442695, %v2023_v26 }
 0x4f0   : > { %v4362_v45 = vpop.eup %2941  ;;  %2953 = vpow2.f32 %v2083_v47  ;;  %v2006_v46 = vmax.f32 %v2004_v23, %v4255_v17  ;;  %v2007_v2 = vmax.f32 %v2005_v58, %v4269_v7 }
 0x4f1   : > { %2136 = vmatpush.msra.mxu3 %v4357_v10  ;;  %v4367_v54 = vpop.eup %2943  ;;  %2955 = vpow2.f32 %v2079_v8 }
 0x4f2   : > { %v4372_v37 = vpop.eup %2945  ;;  %2957 = vpow2.f32 %v2075_v38  ;;  %v2008_v55 = vmax.f32 %v2006_v46, %v4287_v63  ;;  %v2009_v25 = vmax.f32 %v2007_v2, %v4305_v35 }
 0x4f3   : > { %2137 = vmatpush.msra.mxu3 %v4362_v45  ;;  %v4379_v41 = vpop.eup %2947  ;;  %2959 = vpow2.f32 %v2071_v43 }
 0x4f4   : > { %v4384_v44 = vpop.eup %2949  ;;  %2961 = vpow2.f32 %v2067_v39  ;;  %v2010_v16 = vmax.f32 %v2008_v55, %v4319_v22  ;;  %v2011_v24 = vmax.f32 %v2009_v25, %v4336_v56 }
 0x4f5   : > { %2138 = vmatpush.msra.mxu3 %v4367_v54  ;;  %v4393_v50 = vpop.eup %2951  ;;  %2963 = vpow2.f32 %v2063_v49 }
 0x4f6   : > { %v4400_v31 = vpop.eup %2953  ;;  %2965 = vpow2.f32 %v2059_v14  ;;  %v2012_v12 = vmax.f32 %v2010_v16, %v4352_v52 }
 0x4f7   : > { %v4374_v36 = vpop.f32.mrf.mxu2  ;;  %2139 = vmatpush.msra.mxu3 %v4372_v37  ;;  %v4407_v53 = vpop.eup %2955  ;;  %2967 = vpow2.f32 %v2055_v4 }
 0x4f8   : > { %4840 = vst [vmem:[#allocation42_spill] sm:$0xff] %v4407_v53  ;;  %v4412_v47 = vpop.eup %2957  ;;  %v2013_v38 = vmax.f32 %v2011_v24, %v4374_v36 }
 0x4f9   : > { %2140 = vmatpush.msra.mxu3 %v4379_v41  ;;  %4841 = vst [vmem:[#allocation43_spill] sm:$0xff] %v4412_v47  ;;  %v4417_v8 = vpop.eup %2959 }
 0x4fa   : > { %4842 = vst [vmem:[#allocation44_spill] sm:$0xff] %v4417_v8  ;;  %v4422_v3 = vpop.eup %2961 }
 0x4fb   : > { %2141 = vmatpush.msra.mxu3 %v4384_v44  ;;  %4843 = vst [vmem:[#allocation45_spill] sm:$0xff] %v4422_v3  ;;  %v4425_v21 = vpop.eup %2963 }
 0x4fc   : > { %4844 = vst [vmem:[#allocation46_spill] sm:$0xff] %v4425_v21  ;;  %v4428_v30 = vpop.eup %2965 }
 0x4fd   : > { %2142 = vmatpush.msra.mxu3 %v4393_v50  ;;  %4845 = vst [vmem:[#allocation47_spill] sm:$0xff] %v4428_v30  ;;  %v4431_v58 = vpop.eup %2967 }
 0x4fe   : > { %4846 = vst [vmem:[#allocation48_spill] sm:$0xff] %v4431_v58 }
 0x4ff   : > { %v1975_v60 = vpop.f32.mrf.mxu2  ;;  %2143 = vmatpush.msra.mxu3 %v4400_v31 }
 0x500   : > { %v2014_v59 = vmax.f32 %v2012_v12, %v1975_v60 }
 0x501   : > { %2144 = vmatpush.msra.mxu3 %v4407_v53 }
 0x503   : > { %2145 = vmatpush.msra.mxu3 %v4412_v47 }
 0x505   : > { %2146 = vmatpush.msra.mxu3 %v4417_v8 }
 0x507   : > { %v1978_v43 = vpop.f32.mrf.mxu2  ;;  %2147 = vmatpush.msra.mxu3 %v4422_v3 }
 0x508   : > { %v2015_v13 = vmax.f32 %v2013_v38, %v1978_v43 }
 0x509   : > { %2148 = vmatpush.msra.mxu3 %v4425_v21 }
 0x50a   : > { %v2016_v39 = vmax.f32 %v2014_v59, %v2015_v13  ;;  %v1755_v13 = vld [vmem:[%s4847_s3] sm:$0xf] }
 0x50b   : > { %2149 = vmatpush.msra.mxu3 %v4428_v30  ;;  %1772 = vmatmul.f32.vlgmr.msra.gmra.mxu0 %v1755_v13 }
 0x50c   : > { %v2017_v23 = vrot.slane %v2016_v39, 4 }
 0x50d   : > { %2150 = vmatpush.msra.mxu3 %v4431_v58 }
 0x50e   : > { %v2018_v49 = vmax.f32 %v2016_v39, %v2017_v23  ;;  %2151 = vmatmul.f32.vlgmr.msra.gmra.mxu3 %v4343_v61 }
 0x510   : > { %v2019_v26 = vrot.slane %v2018_v49, 2 }
 0x512   : > { %v2020_v46 = vmax.f32 %v2018_v49, %v2019_v26 }
 0x514   : > { %v2021_v2 = vrot.slane %v2020_v46, 1 }
 0x516   : > { %v4435_v14 = vmax.f32 %v2020_v46, %v2021_v2  ;;  %2154 = vmatmul.f32.gmra.mxu3 %v4324_v19 }
 0x518   : > { %v2054_v55 = vsub.f32 %v1978_v43, %v4435_v14  ;;  %v2052_v25 = vsub.f32 %v1975_v60, %v4435_v14  ;;  %v2050_v4 = vsub.f32 %v4374_v36, %v4435_v14  ;;  %v2048_v12 = vsub.f32 %v4352_v52, %v4435_v14 }
 0x519   : > { %v2046_v59 = vsub.f32 %v4336_v56, %v4435_v14  ;;  %v2044_v60 = vsub.f32 %v4319_v22, %v4435_v14  ;;  %v2042_v52 = vsub.f32 %v4305_v35, %v4435_v14  ;;  %v2040_v23 = vsub.f32 %v4287_v63, %v4435_v14 }
 0x51a   : > { %v2117_v16 = vmul.f32 1.442695, %v2054_v55  ;;  %v2113_v24 = vmul.f32 1.442695, %v2052_v25  ;;  %v2109_v38 = vmul.f32 1.442695, %v2050_v4  ;;  %v2038_v26 = vsub.f32 %v4269_v7, %v4435_v14 }
 0x51b   : > { %v2105_v43 = vmul.f32 1.442695, %v2048_v12  ;;  %v2101_v36 = vmul.f32 1.442695, %v2046_v59  ;;  %v2097_v56 = vmul.f32 1.442695, %v2044_v60  ;;  %v2036_v63 = vsub.f32 %v4255_v17, %v4435_v14 }
 0x51c   : > { %2969 = vpow2.f32 %v2117_v16  ;;  %v2093_v49 = vmul.f32 1.442695, %v2042_v52  ;;  %v2089_v46 = vmul.f32 1.442695, %v2040_v23  ;;  %v2085_v7 = vmul.f32 1.442695, %v2038_v26 }
 0x51d   : > { %2971 = vpow2.f32 %v2113_v24  ;;  %v2034_v55 = vsub.f32 %v4240_v28, %v4435_v14  ;;  %v2081_v17 = vmul.f32 1.442695, %v2036_v63  ;;  %v2032_v4 = vsub.f32 %v4230_v15, %v4435_v14 }
 0x51e   : > { %2157 = vmatmul.f32.gmra.mxu3 %v4316_v42  ;;  %2973 = vpow2.f32 %v2109_v38  ;;  %v2030_v28 = vsub.f32 %v4214_v20, %v4435_v14  ;;  %v2028_v15 = vsub.f32 %v4204_v9, %v4435_v14  ;;  %v2026_v13 = vsub.f32 %v4188_v1, %v4435_v14 }
 0x51f   : > { %2975 = vpow2.f32 %v2105_v43  ;;  %v2077_v24 = vmul.f32 1.442695, %v2034_v55  ;;  %v2073_v38 = vmul.f32 1.442695, %v2032_v4  ;;  %v2024_v60 = vsub.f32 %v4184_v40, %v4435_v14 }
 0x520   : > { %2977 = vpow2.f32 %v2101_v36  ;;  %v2069_v20 = vmul.f32 1.442695, %v2030_v28  ;;  %v2065_v9 = vmul.f32 1.442695, %v2028_v15  ;;  %v2061_v52 = vmul.f32 1.442695, %v2026_v13 }
 0x521   : > { %2979 = vpow2.f32 %v2097_v56  ;;  %v2057_v56 = vmul.f32 1.442695, %v2024_v60 }
 0x522   : > { %v4454_v39 = vpop.eup %2969  ;;  %2981 = vpow2.f32 %v2093_v49 }
 0x523   : > { %2200 = vmatpush.msrb.mxu0 %v4454_v39  ;;  %2702 = vmatpush.msrb.mxu1 %v4454_v39  ;;  %v4460_v22 = vpop.eup %2971  ;;  %2983 = vpow2.f32 %v2089_v46 }
 0x524   : > { %v4466_v35 = vpop.eup %2973  ;;  %2985 = vpow2.f32 %v2085_v7 }
 0x525   : > { %2703 = vmatpush.msrb.mxu1 %v4460_v22  ;;  %2201 = vmatpush.msrb.mxu0 %v4460_v22  ;;  %v4472_v2 = vpop.eup %2975  ;;  %2987 = vpow2.f32 %v2081_v17 }
 0x526   : > { %2160 = vmatmul.f32.gmra.mxu3 %v4310_v32  ;;  %v4478_v25 = vpop.eup %2977  ;;  %2989 = vpow2.f32 %v2077_v24 }
 0x527   : > { %2202 = vmatpush.msrb.mxu0 %v4466_v35  ;;  %2704 = vmatpush.msrb.mxu1 %v4466_v35  ;;  %v4484_v16 = vpop.eup %2979  ;;  %2991 = vpow2.f32 %v2073_v38 }
 0x528   : > { %v4490_v12 = vpop.eup %2981  ;;  %2993 = vpow2.f32 %v2069_v20 }
 0x529   : > { %2203 = vmatpush.msrb.mxu0 %v4472_v2  ;;  %2705 = vmatpush.msrb.mxu1 %v4472_v2  ;;  %v4497_v59 = vpop.eup %2983  ;;  %2995 = vpow2.f32 %v2065_v9 }
 0x52a   : > { %v4503_v43 = vpop.eup %2985  ;;  %2997 = vpow2.f32 %v2061_v52 }
 0x52b   : > { %2204 = vmatpush.msrb.mxu0 %v4478_v25  ;;  %2706 = vmatpush.msrb.mxu1 %v4478_v25  ;;  %v4509_v36 = vpop.eup %2987  ;;  %2999 = vpow2.f32 %v2057_v56 }
 0x52c   : > { %v4513_v1 = vpop.eup %2989 }
 0x52d   : > { %2205 = vmatpush.msrb.mxu0 %v4484_v16  ;;  %2707 = vmatpush.msrb.mxu1 %v4484_v16  ;;  %v4518_v40 = vpop.eup %2991 }
 0x52e   : > { %2163 = vmatmul.f32.gmra.mxu3 %v4302_v29  ;;  %v4522_v14 = vpop.eup %2993 }
 0x52f   : > { %2206 = vmatpush.msrb.mxu0 %v4490_v12  ;;  %2708 = vmatpush.msrb.mxu1 %v4490_v12  ;;  %v4526_v23 = vpop.eup %2995 }
 0x530   : > { %v4530_v49 = vpop.eup %2997 }
 0x531   : > { %2207 = vmatpush.msrb.mxu0 %v4497_v59  ;;  %2709 = vmatpush.msrb.mxu1 %v4497_v59  ;;  %v4535_v26 = vpop.eup %2999 }
 0x533   : > { %2208 = vmatpush.msrb.mxu0 %v4503_v43  ;;  %2710 = vmatpush.msrb.mxu1 %v4503_v43 }
 0x535   : > { %2209 = vmatpush.msrb.mxu0 %v4509_v36  ;;  %2711 = vmatpush.msrb.mxu1 %v4509_v36 }
 0x536   : > { %2166 = vmatmul.f32.gmra.mxu3 %v4294_v62 }
 0x537   : > { %2210 = vmatpush.msrb.mxu0 %v4513_v1  ;;  %2712 = vmatpush.msrb.mxu1 %v4513_v1 }
 0x539   : > { %2211 = vmatpush.msrb.mxu0 %v4518_v40  ;;  %2713 = vmatpush.msrb.mxu1 %v4518_v40 }
 0x53b   : > { %2212 = vmatpush.msrb.mxu0 %v4522_v14  ;;  %2714 = vmatpush.msrb.mxu1 %v4522_v14 }
 0x53d   : > { %2213 = vmatpush.msrb.mxu0 %v4526_v23  ;;  %2715 = vmatpush.msrb.mxu1 %v4526_v23 }
 0x53e   : > { %2169 = vmatmul.f32.gmra.mxu3 %v4281_v6 }
 0x53f   : > { %2214 = vmatpush.msrb.mxu0 %v4530_v49  ;;  %2716 = vmatpush.msrb.mxu1 %v4530_v49 }
 0x541   : > { %2215 = vmatpush.msrb.mxu0 %v4535_v26  ;;  %2717 = vmatpush.msrb.mxu1 %v4535_v26 }
 0x542   : > { %2216 = vmatmul.f32.vlgmr.msrb.gmra.mxu0 %v4343_v61  ;;  %2243 = vmatmul.f32.vlgmr.msrb.gmra.mxu1 %v4245_v34 }
 0x546   : > { %2172 = vmatmul.f32.gmra.mxu3 %v4265_v18 }
 0x54a   : > { %2219 = vmatmul.f32.gmra.mxu0 %v4324_v19  ;;  %2246 = vmatmul.f32.gmra.mxu1 %v4237_v27 }
 0x54e   : > { %2175 = vmatmul.f32.gmra.mxu3 %v4253_v51 }
 0x552   : > { %2222 = vmatmul.f32.gmra.mxu0 %v4316_v42  ;;  %2249 = vmatmul.f32.gmra.mxu1 %v4227_v0 }
 0x556   : > { %2178 = vmatmul.f32.gmra.mxu3 %v4245_v34 }
 0x55a   : > { %2225 = vmatmul.f32.gmra.mxu0 %v4310_v32  ;;  %2252 = vmatmul.f32.gmra.mxu1 %v4219_v48 }
 0x55e   : > { %2181 = vmatmul.f32.gmra.mxu3 %v4237_v27 }
 0x562   : > { %2228 = vmatmul.f32.gmra.mxu0 %v4302_v29  ;;  %2255 = vmatmul.f32.gmra.mxu1 %v4211_v5 }
 0x566   : > { %2184 = vmatmul.f32.gmra.mxu3 %v4227_v0 }
 0x56a   : > { %2231 = vmatmul.f32.gmra.mxu0 %v4294_v62  ;;  %2258 = vmatmul.f32.gmra.mxu1 %v4201_v57 }
 0x56e   : > { %2187 = vmatmul.f32.gmra.mxu3 %v4219_v48 }
 0x572   : > { %2234 = vmatmul.f32.gmra.mxu0 %v4281_v6  ;;  %2261 = vmatmul.f32.gmra.mxu1 %v4195_v33 }
 0x576   : > { %2190 = vmatmul.f32.gmra.mxu3 %v4211_v5 }
 0x57a   : > { %2237 = vmatmul.f32.gmra.mxu0 %v4265_v18 }
 0x57e   : > { %2193 = vmatmul.f32.gmra.mxu3 %v4201_v57 }
 0x582   : > { %2240 = vmatmul.f32.gmra.mxu0 %v4253_v51 }
 0x586   : > { %2196 = vmatmul.f32.gmra.mxu3 %v4195_v33 }
 0x588   : > { %v1773_v34 = vpop.f32.mrf.mxu0 }
 0x589   : > { %v1776_v48 = vmul.f32 0.00069053395, %v1773_v34 }
 0x58b   : > { %1777 = vst [vmem:[#allocation5] sm:$0xf] %v1776_v48 }
 0x591   : > { %v4565_v0 = vpop.f32.mrf.mxu3 }
 0x599   : > { %v4567_v27 = vpop.f32.mrf.mxu3 }
 0x5a1   : > { %v4569_v6 = vpop.f32.mrf.mxu3 }
 0x5a9   : > { %v4571_v62 = vpop.f32.mrf.mxu3 }
 0x5b1   : > { %v4573_v5 = vpop.f32.mrf.mxu3 }
 0x5b9   : > { %v4575_v18 = vpop.f32.mrf.mxu3 }
 0x5bf   : > { %v4577_v57 = vpop.f32.mrf.mxu0  ;;  %v2244_v51 = vpop.f32.mrf.mxu1 }
 0x5c0   : > { %v2284_v8 = vmax.f32 %v2244_v51, 1e-30 }
 0x5c1   : > { %v4579_v29 = vpop.f32.mrf.mxu3 }
 0x5c7   : > { %v4581_v33 = vpop.f32.mrf.mxu0  ;;  %v2247_v32 = vpop.f32.mrf.mxu1 }
 0x5c8   : > { %v2286_v58 = vmax.f32 %v2247_v32, 1e-30 }
 0x5c9   : > { %v4583_v42 = vpop.f32.mrf.mxu3 }
 0x5cf   : > { %v4585_v19 = vpop.f32.mrf.mxu0  ;;  %v2250_v61 = vpop.f32.mrf.mxu1 }
 0x5d0   : > { %v2288_v48 = vmax.f32 %v2250_v61, 1e-30 }
 0x5d1   : > { %v4587_v46 = vpop.f32.mrf.mxu3 }
 0x5d7   : > { %v4589_v63 = vpop.f32.mrf.mxu0  ;;  %v2253_v7 = vpop.f32.mrf.mxu1 }
 0x5d8   : > { %v2290_v34 = vmax.f32 %v2253_v7, 1e-30 }
 0x5d9   : > { %v4591_v55 = vpop.f32.mrf.mxu3 }
 0x5df   : > { %v2229_v17 = vpop.f32.mrf.mxu0  ;;  %v2256_v4 = vpop.f32.mrf.mxu1 }
 0x5e0   : > { %v2292_v60 = vmax.f32 %v2256_v4, 1e-30 }
 0x5e1   : > { %v4593_v24 = vpop.f32.mrf.mxu3 }
 0x5e7   : > { %v2232_v28 = vpop.f32.mrf.mxu0  ;;  %v2259_v38 = vpop.f32.mrf.mxu1 }
 0x5e8   : > { %v2294_v20 = vmax.f32 %v2259_v38, 1e-30 }
 0x5e9   : > { %v4595_v15 = vpop.f32.mrf.mxu3 }
 0x5ea   : > { %3001 = vrcp.f32 %v2294_v20 }
 0x5ef   : > { %v2235_v13 = vpop.f32.mrf.mxu0  ;;  %v2262_v9 = vpop.f32.mrf.mxu1 }
 0x5f0   : > { %v2296_v52 = vmax.f32 %v2262_v9, 1e-30  ;;  %v3002_v21 = vpop.eup %3001 }
 0x5f1   : > { %v4597_v56 = vpop.f32.mrf.mxu3  ;;  %v2358_v4 = vmul.f32 %v3002_v21, %v4460_v22  ;;  %v2272_v22 = vmax.f32 %v4589_v63, 1e-30 }
 0x5f2   : > { %3003 = vrcp.f32 %v2296_v52 }
 0x5f3   : > { %3005 = vrcp.f32 %v2292_v60  ;;  %v2278_v60 = vmax.f32 %v2235_v13, 1e-30 }
 0x5f4   : > { %3007 = vrcp.f32 %v2290_v34 }
 0x5f5   : > { %3009 = vrcp.f32 %v2288_v48  ;;  %v2268_v48 = vmax.f32 %v4581_v33, 1e-30  ;;  %v2287_v33 = vmax.f32 %v4595_v15, 1e-30 }
 0x5f6   : > { %3011 = vrcp.f32 %v2286_v58 }
 0x5f7   : > { %v2238_v30 = vpop.f32.mrf.mxu0  ;;  %3013 = vrcp.f32 %v2284_v8 }
 0x5f8   : > { %v3004_v3 = vpop.eup %3003  ;;  %v2280_v7 = vmax.f32 %v2238_v30, 1e-30  ;;  %v2274_v30 = vmax.f32 %v2229_v17, 1e-30 }
 0x5f9   : > { %v2360_v38 = vmul.f32 %v3004_v3, %v4454_v39  ;;  %v2191_v47 = vpop.f32.mrf.mxu3  ;;  %v3006_v53 = vpop.eup %3005  ;;  %v2276_v39 = vmax.f32 %v2232_v28, 1e-30  ;;  %v2270_v28 = vmax.f32 %v4585_v19, 1e-30  ;;  %v2266_v19 = vmax.f32 %v4577_v57, 1e-30 }
 0x5fa   : > { %v3008_v20 = vpop.eup %3007  ;;  %v2356_v32 = vmul.f32 %v3006_v53, %v4466_v35  ;;  %3015 = vrcp.f32 %v2280_v7  ;;  %v2291_v63 = vmax.f32 %v2191_v47, 1e-30  ;;  %v2285_v57 = vmax.f32 %v4593_v24, 1e-30 }
 0x5fb   : > { %2388 = vmatpush.msra.mxu2 %v2360_v38  ;;  %v3010_v61 = vpop.eup %3009  ;;  %v2354_v51 = vmul.f32 %v3008_v20, %v4472_v2  ;;  %v2289_v20 = vmax.f32 %v4597_v56, 1e-30 }
 0x5fc   : > { %v3012_v3 = vpop.eup %3011  ;;  %v2352_v21 = vmul.f32 %v3010_v61, %v4478_v25 }
 0x5fd   : > { %2389 = vmatpush.msra.mxu2 %v2358_v4  ;;  %v3014_v8 = vpop.eup %3013  ;;  %v2350_v53 = vmul.f32 %v3012_v3, %v4484_v16 }
 0x5fe   : > { %v2348_v35 = vmul.f32 %v3014_v8, %v4490_v12  ;;  %v2361_v8 = vld [vmem:[#allocation5] sm:$0xf] }
 0x5ff   : > { %v2241_v9 = vpop.f32.mrf.mxu0  ;;  %2390 = vmatpush.msra.mxu2 %v2356_v32 }
 0x600   : > { %v2282_v52 = vmax.f32 %v2241_v9, 1e-30  ;;  %v3016_v2 = vpop.eup %3015 }
 0x601   : > { %v2194_v58 = vpop.f32.mrf.mxu3  ;;  %2391 = vmatpush.msra.mxu2 %v2354_v51  ;;  %v2344_v12 = vmul.f32 %v3016_v2, %v4503_v43  ;;  %v2281_v51 = vmax.f32 %v4587_v46, 1e-30  ;;  %v2277_v46 = vmax.f32 %v4579_v29, 1e-30  ;;  %v2273_v29 = vmax.f32 %v4573_v5, 1e-30 }
 0x602   : > { %3017 = vrcp.f32 %v2282_v52  ;;  %v2293_v34 = vmax.f32 %v2194_v58, 1e-30  ;;  %v2267_v5 = vmax.f32 %v4567_v27, 1e-30  ;;  %v4850_v27 = vld [vmem:[#allocation44_spill] sm:$0xff] }
 0x603   : > { %3019 = vrcp.f32 %v2278_v60  ;;  %2392 = vmatpush.msra.mxu2 %v2352_v21 }
 0x604   : > { %3021 = vrcp.f32 %v2276_v39 }
 0x605   : > { %2393 = vmatpush.msra.mxu2 %v2350_v53  ;;  %3023 = vrcp.f32 %v2274_v30 }
 0x606   : > { %3025 = vrcp.f32 %v2272_v22  ;;  %v2269_v22 = vmax.f32 %v4569_v6, 1e-30  ;;  %v4849_v6 = vld [vmem:[#allocation43_spill] sm:$0xff] }
 0x607   : > { %2394 = vmatpush.msra.mxu2 %v2348_v35  ;;  %3027 = vrcp.f32 %v2270_v28 }
 0x608   : > { %v3018_v13 = vpop.eup %3017  ;;  %3029 = vrcp.f32 %v2293_v34 }
 0x609   : > { %v2346_v25 = vmul.f32 %v3018_v13, %v4497_v59  ;;  %v3020_v17 = vpop.eup %3019  ;;  %v2197_v16 = vpop.f32.mrf.mxu3 }
 0x60a   : > { %v2295_v38 = vmax.f32 %v2197_v16, 1e-30  ;;  %v3022_v4 = vpop.eup %3021  ;;  %v2342_v59 = vmul.f32 %v3020_v17, %v4509_v36  ;;  %v2283_v36 = vmax.f32 %v4591_v55, 1e-30  ;;  %v2279_v55 = vmax.f32 %v4583_v42, 1e-30 }
 0x60b   : > { %2395 = vmatpush.msra.mxu2 %v2346_v25  ;;  %v3024_v7 = vpop.eup %3023  ;;  %v2340_v47 = vmul.f32 %v3022_v4, %v4513_v1  ;;  %v2275_v42 = vmax.f32 %v4575_v18, 1e-30 }
 0x60c   : > { %3031 = vrcp.f32 %v2295_v38  ;;  %v3026_v32 = vpop.eup %3025  ;;  %v2338_v56 = vmul.f32 %v3024_v7, %v4518_v40 }
 0x60d   : > { %2396 = vmatpush.msra.mxu2 %v2344_v12  ;;  %3033 = vrcp.f32 %v2268_v48  ;;  %v3028_v43 = vpop.eup %3027  ;;  %v2336_v15 = vmul.f32 %v3026_v32, %v4522_v14  ;;  %v4853_v12 = vld [vmem:[#allocation47_spill] sm:$0xff] }
 0x60e   : > { %3035 = vrcp.f32 %v2291_v63  ;;  %v3030_v61 = vpop.eup %3029  ;;  %v2334_v24 = vmul.f32 %v3028_v43, %v4526_v23 }
 0x60f   : > { %2397 = vmatpush.msra.mxu2 %v2342_v59  ;;  %3037 = vrcp.f32 %v2266_v19  ;;  %v2357_v40 = vmul.f32 %v3030_v61, %v4357_v10  ;;  %v4854_v19 = vld [vmem:[#allocation48_spill] sm:$0xff]  ;;  %v2366_v59 = vpop.permute.xlu1 %2365 }
 0x610   : > { %3039 = vrcp.f32 %v2289_v20 }
 0x611   : > { %2398 = vmatpush.msra.mxu2 %v2340_v47  ;;  %3041 = vrcp.f32 %v2287_v33 }
 0x612   : > { %v3032_v9 = vpop.eup %3031  ;;  %3043 = vrcp.f32 %v2285_v57 }
 0x613   : > { %2399 = vmatpush.msra.mxu2 %v2338_v56  ;;  %v3034_v60 = vpop.eup %3033  ;;  %v2359_v1 = vmul.f32 %v3032_v9, %v4350_v11  ;;  %3045 = vrcp.f32 %v2283_v36  ;;  %v4855_v36 = vld [vmem:[#allocation9_spill] sm:$0xff] }
 0x614   : > { %v3036_v52 = vpop.eup %3035  ;;  %v2332_v14 = vmul.f32 %v3034_v60, %v4530_v49  ;;  %3047 = vrcp.f32 %v2281_v51 }
 0x615   : > { %2400 = vmatpush.msra.mxu2 %v2336_v15  ;;  %v3038_v3 = vpop.eup %3037  ;;  %2368 = vmatpush.msrb.mxu3 %v2359_v1  ;;  %v2355_v11 = vmul.f32 %v3036_v52, %v4362_v45  ;;  %3049 = vrcp.f32 %v2279_v55 }
 0x616   : > { %v3040_v39 = vpop.eup %3039  ;;  %v2330_v23 = vmul.f32 %v3038_v3, %v4535_v26  ;;  %3051 = vrcp.f32 %v2277_v46 }
 0x617   : > { %2401 = vmatpush.msra.mxu2 %v2334_v24  ;;  %2369 = vmatpush.msrb.mxu3 %v2357_v40  ;;  %v3042_v58 = vpop.eup %3041  ;;  %v2353_v10 = vmul.f32 %v3040_v39, %v4367_v54  ;;  %v2271_v54 = vmax.f32 %v4571_v62, 1e-30  ;;  %3053 = vrcp.f32 %v2275_v42  ;;  %v2265_v62 = vmax.f32 %v4565_v0, 1e-30  ;;  %v4852_v0 = vld [vmem:[#allocation46_spill] sm:$0xff] }
 0x618   : > { %v3044_v21 = vpop.eup %3043  ;;  %v2351_v45 = vmul.f32 %v3042_v58, %v4372_v37  ;;  %3055 = vrcp.f32 %v2273_v29 }
 0x619   : > { %2402 = vmatpush.msra.mxu2 %v2332_v14  ;;  %2370 = vmatpush.msrb.mxu3 %v2355_v11  ;;  %v3046_v49 = vpop.eup %3045  ;;  %v2349_v26 = vmul.f32 %v3044_v21, %v4379_v41  ;;  %3057 = vrcp.f32 %v2271_v54 }
 0x61a   : > { %v3048_v30 = vpop.eup %3047  ;;  %v2347_v18 = vmul.f32 %v3046_v49, %v4384_v44  ;;  %3059 = vrcp.f32 %v2269_v22  ;;  %v4848_v44 = vld [vmem:[#allocation42_spill] sm:$0xff] }
 0x61b   : > { %2403 = vmatpush.msra.mxu2 %v2330_v23  ;;  %2371 = vmatpush.msrb.mxu3 %v2353_v10  ;;  %v3050_v53 = vpop.eup %3049  ;;  %v2345_v37 = vmul.f32 %v3048_v30, %v4393_v50  ;;  %3061 = vrcp.f32 %v2267_v5 }
 0x61c   : > { %2404 = vmatmul.f32.vlgmr.msra.gmra.mxu2 %v2361_v8  ;;  %v3052_v35 = vpop.eup %3051  ;;  %v2343_v41 = vmul.f32 %v3050_v53, %v4400_v31  ;;  %3063 = vrcp.f32 %v2265_v62  ;;  %v4851_v31 = vld [vmem:[#allocation45_spill] sm:$0xff] }
 0x61d   : > { %2372 = vmatpush.msrb.mxu3 %v2351_v45  ;;  %v3054_v2 = vpop.eup %3053  ;;  %v2341_v28 = vmul.f32 %v3052_v35, %v4848_v44 }
 0x61e   : > { %v3056_v13 = vpop.eup %3055  ;;  %v2339_v34 = vmul.f32 %v3054_v2, %v4849_v6 }
 0x61f   : > { %2373 = vmatpush.msrb.mxu3 %v2349_v26  ;;  %v3058_v50 = vpop.eup %3057  ;;  %v2337_v25 = vmul.f32 %v3056_v13, %v4850_v27 }
 0x620   : > { %v3060_v17 = vpop.eup %3059  ;;  %v2335_v48 = vmul.f32 %v3058_v50, %v4851_v31 }
 0x621   : > { %2374 = vmatpush.msrb.mxu3 %v2347_v18  ;;  %v3062_v16 = vpop.eup %3061  ;;  %v2333_v63 = vmul.f32 %v3060_v17, %v4852_v0  ;;  %v2472_v0 = vpop.permute.xlu2 %2471 }
 0x622   : > { %v3064_v38 = vpop.eup %3063  ;;  %v2331_v4 = vmul.f32 %v3062_v16, %v4853_v12 }
 0x623   : > { %2375 = vmatpush.msrb.mxu3 %v2345_v37  ;;  %v2329_v20 = vmul.f32 %v3064_v38, %v4854_v19 }
 0x625   : > { %2376 = vmatpush.msrb.mxu3 %v2343_v41 }
 0x627   : > { %2377 = vmatpush.msrb.mxu3 %v2341_v28 }
 0x629   : > { %2378 = vmatpush.msrb.mxu3 %v2339_v34 }
 0x62b   : > { %2379 = vmatpush.msrb.mxu3 %v2337_v25 }
 0x62d   : > { %2380 = vmatpush.msrb.mxu3 %v2335_v48 }
 0x62f   : > { %2381 = vmatpush.msrb.mxu3 %v2333_v63 }
 0x631   : > { %2382 = vmatpush.msrb.mxu3 %v2331_v4 }
 0x633   : > { %2383 = vmatpush.msrb.mxu3 %v2329_v20 }
 0x634   : > { %2384 = vmatmul.f32.vlgmr.msrb.gmra.mxu3 %v2361_v8 }
 0x69f   : > { %v2405_v7 = vpop.f32.mrf.mxu2 }
 0x6a0   : > { %v2406_v33 = vadd.f32 %v2405_v7, %v2366_v59 }
 0x6a2   : > { %v2415_v47 = vsel %vm352_vm0, %v2406_v33, 0.0 }
 0x6a3   : > { %v2416_v32 = vrot.slane %v2415_v47, 4 }
 0x6a5   : > { %v2417_v43 = vadd.f32 %v2416_v32, %v2415_v47 }
 0x6a7   : > { %v2418_v57 = vrot.slane %v2417_v43, 2 }
 0x6a9   : > { %v2419_v56 = vadd.f32 %v2418_v57, %v2417_v43 }
 0x6ab   : > { %v2420_v61 = vrot.slane %v2419_v56, 1 }
 0x6ad   : > { %v2421_v9 = vadd.f32 %v2420_v61, %v2419_v56 }
 0x6af   : > { %v2423_v15 = vmul.f32 %v2421_v9, %v4855_v36 }
 0x6b1   : > { %v2425_v60 = vsub.f32 %v2406_v33, %v2423_v15 }
 0x6b3   : > { %v2427_v1 = vmul.f32 %v2425_v60, %v2425_v60 }
 0x6b5   : > { %v2435_v52 = vsel %vm352_vm0, %v2427_v1, 0.0 }
 0x6b6   : > { %v2436_v51 = vrot.slane %v2435_v52, 4 }
 0x6b7   : > { %v2385_v3 = vpop.f32.mrf.mxu3 }
 0x6b8   : > { %v2437_v24 = vadd.f32 %v2436_v51, %v2435_v52  ;;  %v2386_v40 = vadd.f32 %v2385_v3, %v2366_v59 }
 0x6ba   : > { %v2438_v39 = vrot.slane %v2437_v24, 2  ;;  %v2408_v55 = vsel %vm352_vm0, %v2386_v40, 0.0 }
 0x6bb   : > { %v2409_v11 = vrot.slane %v2408_v55, 4 }
 0x6bc   : > { %v2439_v14 = vadd.f32 %v2438_v39, %v2437_v24 }
 0x6bd   : > { %v2410_v46 = vadd.f32 %v2409_v11, %v2408_v55 }
 0x6be   : > { %v2440_v58 = vrot.slane %v2439_v14, 1 }
 0x6bf   : > { %v2411_v10 = vrot.slane %v2410_v46, 2 }
 0x6c0   : > { %v2441_v23 = vadd.f32 %v2440_v58, %v2439_v14 }
 0x6c1   : > { %v2412_v21 = vadd.f32 %v2411_v10, %v2410_v46 }
 0x6c2   : > { %v2443_v42 = vmul.f32 %v2441_v23, %v4855_v36 }
 0x6c3   : > { %v2413_v8 = vrot.slane %v2412_v21, 1 }
 0x6c4   : > { %v2445_v49 = vadd.f32 1e-05, %v2443_v42 }
 0x6c5   : > { %v2414_v45 = vadd.f32 %v2413_v8, %v2412_v21 }
 0x6c6   : > { %3065 = vrsqrt.f32 %v2445_v49  ;;  %vm2462_vm12 = vweird.f32 %v2445_v49 }
 0x6c7   : > { %v2422_v29 = vmul.f32 %v2414_v45, %v4855_v36 }
 0x6c9   : > { %v2424_v26 = vsub.f32 %v2386_v40, %v2422_v29 }
 0x6cb   : > { %v2426_v30 = vmul.f32 %v2424_v26, %v2424_v26 }
 0x6cc   : > { %v3066_v53 = vpop.eup %3065 }
 0x6cd   : > { %v2428_v54 = vsel %vm352_vm0, %v2426_v30, 0.0  ;;  %v2457_v35 = vmul.f32 %v3066_v53, %v2445_v49  ;;  %vm2463_vm11 = vweird.f32 %v3066_v53 }
 0x6ce   : > { %v2429_v18 = vrot.slane %v2428_v54, 4  ;;  %vm2464_vm13 = vmor %vm2462_vm12, %vm2463_vm11 }
 0x6cf   : > { %v2458_v2 = vmul.f32 %v3066_v53, %v2457_v35 }
 0x6d0   : > { %v2430_v22 = vadd.f32 %v2429_v18, %v2428_v54 }
 0x6d1   : > { %v2459_v28 = vmul.f32 0.5, %v2458_v2 }
 0x6d2   : > { %v2431_v37 = vrot.slane %v2430_v22, 2 }
 0x6d3   : > { %v2460_v6 = vsub.f32 1.5, %v2459_v28 }
 0x6d4   : > { %v2432_v5 = vadd.f32 %v2431_v37, %v2430_v22 }
 0x6d5   : > { %v2461_v34 = vmul.f32 %v3066_v53, %v2460_v6 }
 0x6d6   : > { %v2433_v41 = vrot.slane %v2432_v5, 1 }
 0x6d7   : > { %v2465_v25 = vsel %vm2464_vm13, %v3066_v53, %v2461_v34 }
 0x6d8   : > { %v2434_v62 = vadd.f32 %v2433_v41, %v2432_v5  ;;  %v2467_v48 = vmul.f32 %v2465_v25, %v2425_v60 }
 0x6da   : > { %v2442_v44 = vmul.f32 %v2434_v62, %v4855_v36  ;;  %v2475_v38 = vmul.f32 %v2472_v0, %v2467_v48 }
 0x6dc   : > { %v2444_v13 = vadd.f32 1e-05, %v2442_v44  ;;  %v2478_v19 = vrot.slane %v2475_v38, 4 }
 0x6de   : > { %3067 = vrsqrt.f32 %v2444_v13  ;;  %vm2452_vm15 = vweird.f32 %v2444_v13 }
 0x6e4   : > { %v3068_v50 = vpop.eup %3067 }
 0x6e5   : > { %v2447_v27 = vmul.f32 %v3068_v50, %v2444_v13  ;;  %vm2453_vm14 = vweird.f32 %v3068_v50 }
 0x6e6   : > { %vm2454_vm1 = vmor %vm2452_vm15, %vm2453_vm14 }
 0x6e7   : > { %v2448_v17 = vmul.f32 %v3068_v50, %v2447_v27 }
 0x6e9   : > { %v2449_v31 = vmul.f32 0.5, %v2448_v17 }
 0x6eb   : > { %v2450_v16 = vsub.f32 1.5, %v2449_v31 }
 0x6ed   : > { %v2451_v63 = vmul.f32 %v3068_v50, %v2450_v16 }
 0x6ef   : > { %v2455_v12 = vsel %vm2454_vm1, %v3068_v50, %v2451_v63 }
 0x6f0   : > { %v2466_v4 = vmul.f32 %v2455_v12, %v2424_v26 }
 0x6f2   : > { %v2474_v20 = vmul.f32 %v2472_v0, %v2466_v4 }
 0x6f4   : > { %v2479_v59 = vsel %vm352_vm0, %v2474_v20, %v2478_v19 }
 0x6f5   : > { %2481 = vst [vmem:[%s332_s22] sm:$0xff] %v2479_v59 }
 0x6f6 PF: > { %s2700_s14 = sshll.u32 %s3151_s9, 3  ;;  %s2499_s23 = sshll.u32 %s332_s22, 4  ;;  %s2500_s23 = int_to_ptr.vmem [resolvable:$true] %s2499_s23 }
 0x6f7   : > { %s2497_s20 = scalar_lea.hbm %s4713_s8, %s2700_s14  ;;  %s4856_s30 = sand.u32 1, %s3139_s28  }
 0x6f8   : > { %s2501_s25 = sshll.u32 %s2497_s20, 4  ;;  %s2483_s13 = scalar_lea.sflag [#allocation7], %s4856_s30  ;;  %s2502_s25 = int_to_ptr.hbm [resolvable:$true] %s2501_s25 }
 0x6f9   : > { %s3083_s0 = sshra.s32 %s2502_s25, 4  ;;  %s3089_s3 = scalar_lea.hbm %s4713_s8, 16  ;;  %s3084_s0 = int_to_ptr.hbm [resolvable:$true] %s3083_s0 }
 0x6fa   : > { %s3085_s1 = scalar_lea.hbm %s3084_s0, 8  ;;  %p3090_p5 = scmp.lt.s32.totalorder %s3084_s0, %s4713_s8 }
 0x6fb   : > { %p3086_p1 = scmp.ne.s32.totalorder %s3084_s0, %s3085_s1  ;;  %p3091_p6 = scmp.lt.s32.totalorder %s3089_s3, %s3085_s1 }
 0x6fd   : > { %p3087_p2 = pnand %p3086_p1, %p3266_p3  ;;  %p3092_p7 = por %p3091_p6, %p3090_p5 }
 0x6ff   : > { %p3088_p4 = pneg %p3087_p2 }
 0x701   : > { %p3093_p8 = pnand %p3092_p7, %p3088_p4 }
 0x703   : > { %3096 = shalt.err (!%p3093_p8)
}
 0x704   : > { %2718 = dma.vmem_to_hbm [thread:$0]  (%p3266_p3), %s2500_s23, 128, %s2502_s25, %s2483_s13  }
 0x705 PF: > { %p2724_p10 = scmp.ge.s32.totalorder %s3163_s12, 2  ;;  %s2513_s26 = sand.u32 1, %s3135_s27  }
 0x706   : > { %s2514_s2 = scalar_lea.sflag [#allocation7], %s2513_s26 }
 0x707   : > { %p2721_p11 = pnand %p2724_p10, %p3276_p9 }
 0x709   : > { %p2722_p12 = pneg %p2721_p11 }
 0x70b   : > { %3130 = dma.done.wait (%p2722_p12), %s2514_s2, 128  }
 0x70c   : > { %3132 = vsyncadd (%p2722_p12), %s2514_s2, 4294967168  ;;  %s21_s12 = sadd.s32 1, %s3163_s12   ;;  %s4857_s27 = smov %s3139_s28 }
 0x70d   : > { %p18_p13 = scmp.ge.s32.totalorder %s21_s12, 6   ;;  %s4858_s28 = smov %s3143_s29 }
 0x70e   : > { %s4859_s29 = smov %s3284_s21  ;;  %s4860_s30 = smov %s3155_s10 }
 0x70f   : > { %s4861_s9 = smov %s3159_s11  ;;  %s4862_s10 = smov %s4865_s15 }
 0x710   : > { %s4863_s11 = smov %s4869_s16  ;;  %20 = sbr.rel (!%p18_p13) target bundleno = 10 (0xa), region = 103 }
 0x715   :  { %2520 = vsyncpa [#allocation7], 1 }
 0x716   :  { %2522 = vsyncpa [#allocation7 + $0x1], 1 }

</bundles_post_ra>
